<compile_context>
chip_gen: v7x
topology: tpu7x:2x2x1
jax: 0.10.0
libtpu: 0.0.40
codegen_flags: <defaults>
</compile_context>

<pallas_src>
import functools
import math

import numpy as np

import jax
import jax.numpy as jnp
from jax.experimental import pallas as pl
from jax.experimental.pallas import tpu as pltpu


# ---------------------------------------------------------------------------
# In-kernel helpers
# ---------------------------------------------------------------------------
def _conv3_routed(x, w_ref, b_ref, r_ref):
    """Conv1d(kernel=3, stride=1, pad=1) on a lane-flattened, channel-major map.

    x     : (Cin, Nin)  -- Nin = n_segments * segment_length (segments = batch / time)
    w_ref : (3, Cout, Cin) tap-major weights (ref or array)
    b_ref : (Cout, 1) bias (ref or array)
    r_ref : (3, Nin, Nout) routing tensors: per-tap neighbour shift with per-segment
            zero halo; an optional stride-2 subsample is pre-folded into them.
    """
    y = b_ref[...]
    for k in range(3):
        xk = jnp.dot(x, r_ref[k], preferred_element_type=jnp.float32)        # (Cin, Nout)
        y = y + jnp.dot(w_ref[k], xk, preferred_element_type=jnp.float32)    # (Cout, Nout)
    return y


def _make_routing(n_in, seg_in, subsample):
    """Build (3, Nin, Nout) routing tensors for _conv3_routed (numpy, trace-time const)."""
    ml = np.zeros((n_in, n_in), np.float32)      # column j picks x[:, j-1] (0 at seg start)
    mr = np.zeros((n_in, n_in), np.float32)      # column j picks x[:, j+1] (0 at seg end)
    for j in range(n_in):
        if j % seg_in != 0:
            ml[j - 1, j] = 1.0
        if j % seg_in != seg_in - 1:
            mr[j + 1, j] = 1.0
    ident = np.eye(n_in, dtype=np.float32)
    if subsample:                                 # fused stride-2: keep even cols per segment
        seg_out, n_out = seg_in // 2, n_in // 2
        s = np.zeros((n_in, n_out), np.float32)
        for g in range(n_in // seg_in):
            for p in range(seg_out):
                s[g * seg_in + 2 * p, g * seg_out + p] = 1.0
    else:
        s = ident
    return jnp.asarray(np.stack([ml @ s, ident @ s, mr @ s], axis=0))


# ---------------------------------------------------------------------------
# Kernel 1: track_representation (4x attention + query projections + cond_mlp)
# ---------------------------------------------------------------------------
# TODO(synk): CondAttentionLayer definition not provided in the reference; stand-in is
# learned pn_prime queries cross-attending over the PN points (feature = Tc*track_dim),
# residual query refinement for layers 2-4, last_attn reshaping handled via the
# block-diagonal cond_mlp weights (per-timestep Linear applied on (Tc*C) lane chunks).
def _track_repr_kernel(feats_ref, q0_ref, wq_ref, bq_ref, w1_ref, b1_ref, w2_ref, b2_ref,
                       o_ref, *, scale, n_res_layers):
    feats = feats_ref[0]                                   # (PN, D)
    feats_t = feats.T                                      # (D, PN)

    def attn(q):
        s = jnp.dot(q, feats_t, preferred_element_type=jnp.float32) * scale
        s = s - jnp.max(s, axis=-1, keepdims=True)
        p = jnp.exp(s)
        p = p * pl.reciprocal(jnp.sum(p, axis=-1, keepdims=True), approx=True)
        return jnp.dot(p, feats, preferred_element_type=jnp.float32)

    mc = attn(q0_ref[...])                                 # attn1
    for l in range(n_res_layers):                          # attn2..attn4 (residual)
        q = jnp.dot(mc, wq_ref[l], preferred_element_type=jnp.float32) + bq_ref[l]
        mc = mc + attn(q)

    # cond_mlp (block-diagonal over Tc): Linear(C->2C) -> GELU -> Linear(2C->2C)
    h = jnp.dot(mc, w1_ref[...], preferred_element_type=jnp.float32) + b1_ref[...]
    # TODO(synk): PyTorch nn.GELU default is exact erf; tanh approximation used here.
    h = jax.nn.gelu(h, approximate=True)
    h = jnp.dot(h, w2_ref[...], preferred_element_type=jnp.float32) + b2_ref[...]
    o_ref[0] = h.astype(o_ref.dtype)


def track_representation(params, feats, pn_prime):
    B, PN, D = feats.shape
    ca, mlp = params["cond_attn"], params["cond_mlp"]
    M2 = mlp["w2"].shape[1]
    kern = functools.partial(_track_repr_kernel, scale=1.0 / math.sqrt(D),
                             n_res_layers=ca["wq"].shape[0])
    return pl.pallas_call(
        kern,
        out_shape=jax.ShapeDtypeStruct((B, pn_prime, M2), jnp.float32),
        grid=(B,),
        in_specs=[
            pl.BlockSpec((1, PN, D), lambda b: (b, 0, 0)),
            pl.BlockSpec((pn_prime, D), lambda b: (0, 0)),
            pl.BlockSpec(ca["wq"].shape, lambda b: (0, 0, 0)),
            pl.BlockSpec(ca["bq"].shape, lambda b: (0, 0, 0)),
            pl.BlockSpec(mlp["w1"].shape, lambda b: (0, 0)),
            pl.BlockSpec(mlp["b1"].shape, lambda b: (0, 0)),
            pl.BlockSpec(mlp["w2"].shape, lambda b: (0, 0)),
            pl.BlockSpec(mlp["b2"].shape, lambda b: (0, 0)),
        ],
        out_specs=pl.BlockSpec((1, pn_prime, M2), lambda b: (b, 0, 0)),
        compiler_params=pltpu.CompilerParams(dimension_semantics=("parallel",)),
    )(feats, ca["base_q"], ca["wq"], ca["bq"], mlp["w1"], mlp["b1"], mlp["w2"], mlp["b2"])


# ---------------------------------------------------------------------------
# Kernel 2: motion encoder (all convs + tanh + stride-2 downsample fused)
# ---------------------------------------------------------------------------
# TODO(synk): MotionEncoder definition not provided in the reference; stand-in is
# Conv1d(in->model_ch) + n_downs * [tanh, Conv1d(ch->2ch) stride-2] so the output matches
# the documented [*, model_ch*2**n_downs, pn_prime // 2**n_downs].
def _motion_encoder_kernel(*refs, n_convs):
    x_ref, o_ref = refs[0], refs[-1]
    h = x_ref[0]
    for i in range(n_convs):
        w_ref, b_ref, r_ref = refs[1 + 3 * i], refs[2 + 3 * i], refs[3 + 3 * i]
        h = _conv3_routed(h, w_ref, b_ref, r_ref)
        if i < n_convs - 1:
            h = jnp.tanh(h)
    o_ref[0] = h.astype(o_ref.dtype)


def motion_encoder(params, x, routes):
    B, Cin, N0 = x.shape
    layers = params["motion_encoder"]
    n_convs = len(layers)
    cout_last = layers[-1][0].shape[1]
    n_out = routes[-1].shape[2]
    in_specs = [pl.BlockSpec((1, Cin, N0), lambda b: (b, 0, 0))]
    operands = [x]
    for (w, bias), r in zip(layers, routes):
        in_specs += [pl.BlockSpec(w.shape, lambda b: (0, 0, 0)),
                     pl.BlockSpec(bias.shape, lambda b: (0, 0)),
                     pl.BlockSpec(r.shape, lambda b: (0, 0, 0))]
        operands += [w, bias, r]
    kern = functools.partial(_motion_encoder_kernel, n_convs=n_convs)
    return pl.pallas_call(
        kern,
        out_shape=jax.ShapeDtypeStruct((B, cout_last, n_out), jnp.float32),
        grid=(B,),
        in_specs=in_specs,
        out_specs=pl.BlockSpec((1, cout_last, n_out), lambda b: (b, 0, 0)),
        compiler_params=pltpu.CompilerParams(dimension_semantics=("parallel",)),
    )(*operands)


# ---------------------------------------------------------------------------
# Kernel 3: ConvGRU rollout (both convs + gates fused, Tc as a grid axis)
# ---------------------------------------------------------------------------
# TODO(synk): ConvGRUCell definition not provided; stand-in is the standard conv GRU
# (update / reset / candidate gates, Conv1d k3 s1 p1).
def _conv_gru_kernel(x_ref, wx_ref, bx_ref, wh_ref, bh_ref, r_ref, o_ref, *, C):
    t = pl.program_id(0)

    @pl.when(t == 0)
    def _():
        o_ref[...] = jnp.zeros(o_ref.shape, o_ref.dtype)

    h = o_ref[...]                                          # hidden state lives in VMEM
    x = x_ref[0]
    gx = _conv3_routed(x, wx_ref, bx_ref, r_ref)            # (3C, N)
    gh = _conv3_routed(h, wh_ref, bh_ref, r_ref)
    z = jax.nn.sigmoid(gx[0:C] + gh[0:C])
    r = jax.nn.sigmoid(gx[C:2 * C] + gh[C:2 * C])
    n = jnp.tanh(gx[2 * C:3 * C] + r * gh[2 * C:3 * C])
    o_ref[...] = ((1.0 - z) * n + z * h).astype(o_ref.dtype)


def conv_gru_rollout(params, x_seq, route):
    Tc, C, N = x_seq.shape
    g = params["conv_gru"]
    kern = functools.partial(_conv_gru_kernel, C=C)
    return pl.pallas_call(
        kern,
        out_shape=jax.ShapeDtypeStruct((C, N), jnp.float32),
        grid=(Tc,),
        in_specs=[
            pl.BlockSpec((1, C, N), lambda t: (t, 0, 0)),
            pl.BlockSpec(g["wx"].shape, lambda t: (0, 0, 0)),
            pl.BlockSpec(g["bx"].shape, lambda t: (0, 0)),
            pl.BlockSpec(g["wh"].shape, lambda t: (0, 0, 0)),
            pl.BlockSpec(g["bh"].shape, lambda t: (0, 0)),
            pl.BlockSpec(route.shape, lambda t: (0, 0, 0)),
        ],
        out_specs=pl.BlockSpec((C, N), lambda t: (0, 0)),
        compiler_params=pltpu.CompilerParams(dimension_semantics=("arbitrary",)),
    )(x_seq, g["wx"], g["bx"], g["wh"], g["bh"], route)


# ---------------------------------------------------------------------------
# Kernel 4: full SDE (Euler–Maruyama) rollout, tp as a grid axis, y in VMEM scratch
# ---------------------------------------------------------------------------
# TODO(synk): torchsde.sdeint replaced by a fixed-step Euler–Maruyama integrator over
# idx_p[0] with deterministic Gaussian noise from a PRNGKey.
def _sde_rollout_kernel(dt_ref, sqdt_ref, y0_ref, eps_ref, fw_ref, fb_ref, gw_ref, gb_ref,
                        r_ref, traj_ref, y_ref, *, n_convs):
    t = pl.program_id(0)

    @pl.when(t == 0)
    def _():
        y_ref[...] = y0_ref[...]

    y = y_ref[...]

    def func_net(w_ref, b_ref, x):
        h = x
        for l in range(n_convs - 1):
            h = jnp.tanh(_conv3_routed(h, w_ref[l], b_ref[l], r_ref))
        return _conv3_routed(h, w_ref[n_convs - 1], b_ref[n_convs - 1], r_ref)

    drift = func_net(fw_ref, fb_ref, y)                      # f(y)
    diffusion = jnp.tanh(func_net(gw_ref, gb_ref, y))        # g(y) = tanh(net(y))
    dt = dt_ref[t]
    sqdt = sqdt_ref[t]
    y_new = y + drift * dt + diffusion * (sqdt * eps_ref[0])
    y_ref[...] = y_new
    traj_ref[0] = y_new.astype(traj_ref.dtype)


def sde_rollout(params, y0, dt, sqdt, eps, route):
    tp, C, N = eps.shape
    f, g = params["sde_f"], params["sde_g"]
    n_convs = f["w"].shape[0]
    kern = functools.partial(_sde_rollout_kernel, n_convs=n_convs)
    return pl.pallas_call(
        kern,
        out_shape=jax.ShapeDtypeStruct((tp, C, N), jnp.float32),
        grid=(tp,),
        in_specs=[
            pl.BlockSpec(memory_space=pltpu.MemorySpace.SMEM),     # dt   (tp,)
            pl.BlockSpec(memory_space=pltpu.MemorySpace.SMEM),     # sqdt (tp,)
            pl.BlockSpec((C, N), lambda t: (0, 0)),                # y0
            pl.BlockSpec((1, C, N), lambda t: (t, 0, 0)),          # eps_t
            pl.BlockSpec(f["w"].shape, lambda t: (0, 0, 0, 0)),
            pl.BlockSpec(f["b"].shape, lambda t: (0, 0, 0)),
            pl.BlockSpec(g["w"].shape, lambda t: (0, 0, 0, 0)),
            pl.BlockSpec(g["b"].shape, lambda t: (0, 0, 0)),
            pl.BlockSpec(route.shape, lambda t: (0, 0, 0)),
        ],
        out_specs=pl.BlockSpec((1, C, N), lambda t: (t, 0, 0)),
        scratch_shapes=[pltpu.VMEM((C, N), jnp.float32)],
        compiler_params=pltpu.CompilerParams(dimension_semantics=("arbitrary",)),
    )(dt, sqdt, y0, eps, f["w"], f["b"], g["w"], g["b"], route)


# ---------------------------------------------------------------------------
# Parameter initialization (deterministic, kernel-ready layouts)
# ---------------------------------------------------------------------------
def _init_conv_taps(key, cout, cin, zero=False):
    """Tap-major Conv1d(cin, cout, 3) weights (3, cout, cin) + bias (cout, 1)."""
    if zero:                                        # zero_module() semantics
        return jnp.zeros((3, cout, cin), jnp.float32), jnp.zeros((cout, 1), jnp.float32)
    kw, kb = jax.random.split(key)
    bound = 1.0 / math.sqrt(cin * 3)
    w = jax.random.uniform(kw, (3, cout, cin), jnp.float32, -bound, bound)
    b = jax.random.uniform(kb, (cout, 1), jnp.float32, -bound, bound)
    return w, b


def _init_linear(key, n_in, n_out):
    kw, kb = jax.random.split(key)
    bound = 1.0 / math.sqrt(n_in)
    w = jax.random.uniform(kw, (n_in, n_out), jnp.float32, -bound, bound)
    b = jax.random.uniform(kb, (n_out,), jnp.float32, -bound, bound)
    return w, b


def _block_diag(w, n):
    a, b = w.shape
    out = jnp.zeros((n * a, n * b), w.dtype)
    for t in range(n):
        out = out.at[t * a:(t + 1) * a, t * b:(t + 1) * b].set(w)
    return out


def init_ode_func_net(key, in_ch, hid_ch, out_ch, n_layers):
    """OdeSdeFuncNet: Conv(in->hid), [Tanh, Conv(hid->hid)]*n, Tanh, zeroed Conv(hid->out)."""
    assert in_ch == hid_ch == out_ch  # holds for TrackMotionModel's SDEUnet (stacked weights)
    keys = jax.random.split(key, n_layers + 1)
    ws, bs = [], []
    w, b = _init_conv_taps(keys[0], hid_ch, in_ch)
    ws.append(w); bs.append(b)
    for i in range(n_layers):
        w, b = _init_conv_taps(keys[i + 1], hid_ch, hid_ch)
        ws.append(w); bs.append(b)
    w, b = _init_conv_taps(keys[0], out_ch, hid_ch, zero=True)
    ws.append(w); bs.append(b)
    return {"w": jnp.stack(ws), "b": jnp.stack(bs)}


def init_params(key, cfg):
    Tc, track_dim, pn_prime = cfg["tc"], cfg["track_dim"], cfg["pn_prime"]
    model_ch, n_downs, n_layers = cfg["model_ch"], cfg["n_downs"], cfg["sde_n_layers"]
    D = Tc * track_dim
    tr_dim = 2 * track_dim
    motion_dim = model_ch * 2 ** n_downs
    keys = jax.random.split(key, 7)

    # cond_attn: base queries + 3 residual query projections (stacked)
    k0, k1, k2, k3 = jax.random.split(keys[0], 4)
    base_q = jax.random.normal(k0, (pn_prime, D), jnp.float32) * 0.02
    wqs, bqs = [], []
    for k in (k1, k2, k3):
        w, b = _init_linear(k, D, D)
        wqs.append(w); bqs.append(b)
    cond_attn = {"base_q": base_q, "wq": jnp.stack(wqs), "bq": jnp.stack(bqs)[:, None, :]}

    # cond_mlp, pre-expanded to block-diagonal over Tc (per-timestep Linear on lane chunks)
    w1, b1 = _init_linear(keys[1], track_dim, tr_dim)
    w2, b2 = _init_linear(keys[2], tr_dim, tr_dim)
    cond_mlp = {"w1": _block_diag(w1, Tc), "b1": jnp.tile(b1, Tc)[None, :],
                "w2": _block_diag(w2, Tc), "b2": jnp.tile(b2, Tc)[None, :]}

    # motion encoder
    me_keys = jax.random.split(keys[3], n_downs + 1)
    me_layers = [_init_conv_taps(me_keys[0], model_ch, tr_dim)]
    ch = model_ch
    for d in range(n_downs):
        me_layers.append(_init_conv_taps(me_keys[d + 1], 2 * ch, ch))
        ch *= 2

    # conv GRU
    kx_, kh_ = jax.random.split(keys[4])
    wx, bx = _init_conv_taps(kx_, 3 * motion_dim, motion_dim)
    wh, bh = _init_conv_taps(kh_, 3 * motion_dim, motion_dim)
    conv_gru = {"wx": wx, "bx": bx, "wh": wh, "bh": bh}

    return {
        "cond_attn": cond_attn,
        "cond_mlp": cond_mlp,
        "motion_encoder": me_layers,
        "conv_gru": conv_gru,
        "sde_f": init_ode_func_net(keys[5], motion_dim, motion_dim, motion_dim, n_layers),
        "sde_g": init_ode_func_net(keys[6], motion_dim, motion_dim, motion_dim, n_layers),
    }


# ---------------------------------------------------------------------------
# TrackMotionModel forward (jit'ted; 4 pallas_calls total)
# ---------------------------------------------------------------------------
def make_forward(cfg):
    Tc, tp, pn_prime = cfg["tc"], cfg["tp"], cfg["pn_prime"]
    track_dim, model_ch, n_downs = cfg["track_dim"], cfg["model_ch"], cfg["n_downs"]
    use_sde = cfg["use_sde"]
    Cm = model_ch * 2 ** n_downs
    PNm = pn_prime // 2 ** n_downs
    C2 = 2 * track_dim

    # Per-layer routing tensors for the motion encoder (halo shift + fused stride-2).
    routes_enc = []
    n, seg = Tc * pn_prime, pn_prime
    for i in range(n_downs + 1):
        sub = i > 0
        routes_enc.append(_make_routing(n, seg, sub))
        if sub:
            n //= 2
            seg //= 2

    @jax.jit
    def forward(params, track_motion, frame_idx, noise_key):
        B, C, _, PN = track_motion.shape
        D = Tc * C
        route_gru = _make_routing(B * PNm, PNm, False)       # trace-time constant

        # ---- track_representation : [B, pn', Tc*2C] (attn x4 + cond_mlp fused) ----
        feats = jnp.transpose(track_motion, (0, 3, 2, 1)).reshape(B, PN, D)
        rep = track_representation(params, feats, pn_prime)

        # 'B PN (T C)' -> channel-major, lane-flattened (B, 2C, Tc*pn') for the encoder
        x_enc = rep.reshape(B, pn_prime, Tc, C2).transpose(0, 3, 2, 1)
        x_enc = x_enc.reshape(B, C2, Tc * pn_prime)

        # ---- track_context_encode ----
        enc = motion_encoder(params, x_enc, routes_enc)       # (B, Cm, Tc*PNm)
        enc4 = enc.reshape(B, Cm, Tc, PNm)
        motion_feature = enc4.transpose(0, 2, 1, 3)           # (B, Tc, Cm, PNm)

        # ---- context_representation (ConvGRU rollout, zero initial state) ----
        x_gru = enc4.transpose(2, 1, 0, 3).reshape(Tc, Cm, B * PNm)
        mctx_flat = conv_gru_rollout(params, x_gru, route_gru)   # (Cm, B*PNm)

        # ---- future_predict ----
        if use_sde:
            ts = frame_idx[0, -(tp + 1):]
            dt = ts[1:] - ts[:-1]
            sqdt = jnp.sqrt(jnp.abs(dt))
            eps = jax.random.normal(noise_key, (tp, Cm, B * PNm), jnp.float32)
            traj = sde_rollout(params, mctx_flat, dt, sqdt, eps, route_gru)  # (tp, Cm, B*PNm)
            motion_pred = traj.reshape(tp, Cm, B, PNm).transpose(2, 0, 1, 3)
        else:
            mctx = mctx_flat.reshape(Cm, B, PNm).transpose(1, 0, 2)
            motion_pred = jnp.broadcast_to(mctx[:, None], (B, tp, Cm, PNm))

        mc = jnp.concatenate([motion_feature, motion_pred], axis=1)   # (B, Tc+tp, Cm, PNm)
        return jnp.transpose(mc, (0, 1, 3, 2))                        # 'B T C PN -> B T PN C'

    return forward


# ---------------------------------------------------------------------------
if __name__ == "__main__":
    # Small, self-consistent config.
    B = 2
    track_dim = 4          # C
    Tc = 2                 # cond_num
    Tp = 2                 # pred_num
    PN = 16                # track points
    pn_prime = 16
    model_ch = 4
    n_downs = 2
    sde_n_layers = 1

    motion_dim = model_ch * (2 ** n_downs)      # 16
    selected_pn = pn_prime // (2 ** n_downs)    # 4

    cfg = dict(tc=Tc, tp=Tp, pn_prime=pn_prime, track_dim=track_dim,
               model_ch=model_ch, n_downs=n_downs, sde_n_layers=sde_n_layers,
               use_sde=True)

    key = jax.random.PRNGKey(0)
    k_params, k_x, k_noise = jax.random.split(key, 3)
    params = init_params(k_params, cfg)

    track_motion = jax.random.normal(k_x, (B, track_dim, Tc, PN), jnp.float32)
    frame_idx = jnp.broadcast_to(
        jnp.arange(Tc + Tp, dtype=jnp.float32)[None, :], (B, Tc + Tp)) * 0.1

    forward = make_forward(cfg)
    out = forward(params, track_motion, frame_idx, k_noise)
    out = jax.block_until_ready(out)

    assert out.shape == (B, Tc + Tp, selected_pn, motion_dim), out.shape
    assert bool(jnp.all(jnp.isfinite(out)))
    print("KERNEL_OK")
</pallas_src>

<mosaic_0001>
module attributes {stable_mosaic.version = 11 : i64} {
  func.func @_conv_gru_kernel(%arg0: i32, %arg1: memref<1x16x8xf32, #tpu.memory_space<vmem>>, %arg2: memref<3x48x16xf32, #tpu.memory_space<vmem>>, %arg3: memref<48x1xf32, #tpu.memory_space<vmem>>, %arg4: memref<3x48x16xf32, #tpu.memory_space<vmem>>, %arg5: memref<48x1xf32, #tpu.memory_space<vmem>>, %arg6: memref<3x8x8xf32, #tpu.memory_space<vmem>>, %arg7: memref<16x8xf32, #tpu.memory_space<vmem>>) attributes {dimension_semantics = [#tpu.dimension_semantics<arbitrary>], iteration_bounds = array<i64: 2>, scalar_prefetch = 0 : i64, scratch_operands = 0 : i64, tpu.core_type = #tpu.core_type<tc>, window_params = [{transform_indices = @transform_0, window_bounds = array<i64: 1, 16, 8>}, {pipeline_mode = #tpu.pipeline_mode<synchronous>, transform_indices = @transform_1, window_bounds = array<i64: 3, 48, 16>}, {pipeline_mode = #tpu.pipeline_mode<synchronous>, transform_indices = @transform_2, window_bounds = array<i64: 48, 1>}, {pipeline_mode = #tpu.pipeline_mode<synchronous>, transform_indices = @transform_3, window_bounds = array<i64: 3, 48, 16>}, {pipeline_mode = #tpu.pipeline_mode<synchronous>, transform_indices = @transform_4, window_bounds = array<i64: 48, 1>}, {pipeline_mode = #tpu.pipeline_mode<synchronous>, transform_indices = @transform_5, window_bounds = array<i64: 3, 8, 8>}, {pipeline_mode = #tpu.pipeline_mode<synchronous>, transform_indices = @transform_6, window_bounds = array<i64: 16, 8>}]} {
    %c0_i32 = arith.constant 0 : i32
    %0 = arith.cmpi eq, %arg0, %c0_i32 : i32
    %1 = arith.extui %0 : i1 to i32
    %c0_i32_0 = arith.constant 0 : i32
    %2 = arith.cmpi ne, %1, %c0_i32_0 : i32
    scf.if %2 {
      %cst_59 = arith.constant 0.000000e+00 : f32
      %79 = vector.broadcast %cst_59 : f32 to vector<16x8xf32>
      %c0_60 = arith.constant 0 : index
      %c0_61 = arith.constant 0 : index
      %80 = vector.load %arg7[%c0_60, %c0_61] : memref<16x8xf32, #tpu.memory_space<vmem>>, vector<16x8xf32>
      tpu.vector_store %arg7[%c0_60, %c0_61], %79 {strides = array<i32>} : memref<16x8xf32, #tpu.memory_space<vmem>>, vector<16x8xf32>,
    } else {
    }
    %c0 = arith.constant 0 : index
    %c0_1 = arith.constant 0 : index
    %3 = vector.load %arg7[%c0, %c0_1] : memref<16x8xf32, #tpu.memory_space<vmem>>, vector<16x8xf32>
    %c0_2 = arith.constant 0 : index
    %c0_3 = arith.constant 0 : index
    %c0_4 = arith.constant 0 : index
    %4 = vector.load %arg1[%c0_2, %c0_3, %c0_4] : memref<1x16x8xf32, #tpu.memory_space<vmem>>, vector<1x16x8xf32>
    %5 = vector.shape_cast %4 : vector<1x16x8xf32> to vector<16x8xf32>
    %c0_5 = arith.constant 0 : index
    %c0_6 = arith.constant 0 : index
    %6 = vector.load %arg3[%c0_5, %c0_6] : memref<48x1xf32, #tpu.memory_space<vmem>>, vector<48x1xf32>
    %c0_7 = arith.constant 0 : index
    %c0_8 = arith.constant 0 : index
    %c0_9 = arith.constant 0 : index
    %7 = vector.load %arg6[%c0_7, %c0_8, %c0_9] : memref<3x8x8xf32, #tpu.memory_space<vmem>>, vector<1x8x8xf32>
    %8 = vector.shape_cast %7 : vector<1x8x8xf32> to vector<8x8xf32>
    %cst = arith.constant dense<0.000000e+00> : vector<16x8xf32>
    %9 = tpu.matmul %5, %8, %cst {dimension_numbers = #tpu.dot_dimension_numbers<[1], [0], [0], [1], [0, 0, 1, 1], [], []>} : vector<16x8xf32>, vector<8x8xf32>, vector<16x8xf32> -> vector<16x8xf32>
    %c0_10 = arith.constant 0 : index
    %c0_11 = arith.constant 0 : index
    %c0_12 = arith.constant 0 : index
    %10 = vector.load %arg2[%c0_10, %c0_11, %c0_12] : memref<3x48x16xf32, #tpu.memory_space<vmem>>, vector<1x48x16xf32>
    %11 = vector.shape_cast %10 : vector<1x48x16xf32> to vector<48x16xf32>
    %cst_13 = arith.constant dense<0.000000e+00> : vector<48x8xf32>
    %12 = tpu.matmul %11, %9, %cst_13 {dimension_numbers = #tpu.dot_dimension_numbers<[1], [0], [0], [1], [0, 0, 1, 1], [], []>} : vector<48x16xf32>, vector<16x8xf32>, vector<48x8xf32> -> vector<48x8xf32>
    %13 = vector.broadcast %6 : vector<48x1xf32> to vector<48x8xf32>
    %14 = arith.addf %13, %12 : vector<48x8xf32>
    %c1 = arith.constant 1 : index
    %c0_14 = arith.constant 0 : index
    %c0_15 = arith.constant 0 : index
    %15 = vector.load %arg6[%c1, %c0_14, %c0_15] : memref<3x8x8xf32, #tpu.memory_space<vmem>>, vector<1x8x8xf32>
    %16 = vector.shape_cast %15 : vector<1x8x8xf32> to vector<8x8xf32>
    %cst_16 = arith.constant dense<0.000000e+00> : vector<16x8xf32>
    %17 = tpu.matmul %5, %16, %cst_16 {dimension_numbers = #tpu.dot_dimension_numbers<[1], [0], [0], [1], [0, 0, 1, 1], [], []>} : vector<16x8xf32>, vector<8x8xf32>, vector<16x8xf32> -> vector<16x8xf32>
    %c1_17 = arith.constant 1 : index
    %c0_18 = arith.constant 0 : index
    %c0_19 = arith.constant 0 : index
    %18 = vector.load %arg2[%c1_17, %c0_18, %c0_19] : memref<3x48x16xf32, #tpu.memory_space<vmem>>, vector<1x48x16xf32>
    %19 = vector.shape_cast %18 : vector<1x48x16xf32> to vector<48x16xf32>
    %cst_20 = arith.constant dense<0.000000e+00> : vector<48x8xf32>
    %20 = tpu.matmul %19, %17, %cst_20 {dimension_numbers = #tpu.dot_dimension_numbers<[1], [0], [0], [1], [0, 0, 1, 1], [], []>} : vector<48x16xf32>, vector<16x8xf32>, vector<48x8xf32> -> vector<48x8xf32>
    %21 = arith.addf %14, %20 : vector<48x8xf32>
    %c2 = arith.constant 2 : index
    %c0_21 = arith.constant 0 : index
    %c0_22 = arith.constant 0 : index
    %22 = vector.load %arg6[%c2, %c0_21, %c0_22] : memref<3x8x8xf32, #tpu.memory_space<vmem>>, vector<1x8x8xf32>
    %23 = vector.shape_cast %22 : vector<1x8x8xf32> to vector<8x8xf32>
    %cst_23 = arith.constant dense<0.000000e+00> : vector<16x8xf32>
    %24 = tpu.matmul %5, %23, %cst_23 {dimension_numbers = #tpu.dot_dimension_numbers<[1], [0], [0], [1], [0, 0, 1, 1], [], []>} : vector<16x8xf32>, vector<8x8xf32>, vector<16x8xf32> -> vector<16x8xf32>
    %c2_24 = arith.constant 2 : index
    %c0_25 = arith.constant 0 : index
    %c0_26 = arith.constant 0 : index
    %25 = vector.load %arg2[%c2_24, %c0_25, %c0_26] : memref<3x48x16xf32, #tpu.memory_space<vmem>>, vector<1x48x16xf32>
    %26 = vector.shape_cast %25 : vector<1x48x16xf32> to vector<48x16xf32>
    %cst_27 = arith.constant dense<0.000000e+00> : vector<48x8xf32>
    %27 = tpu.matmul %26, %24, %cst_27 {dimension_numbers = #tpu.dot_dimension_numbers<[1], [0], [0], [1], [0, 0, 1, 1], [], []>} : vector<48x16xf32>, vector<16x8xf32>, vector<48x8xf32> -> vector<48x8xf32>
    %28 = arith.addf %21, %27 : vector<48x8xf32>
    %c0_28 = arith.constant 0 : index
    %c0_29 = arith.constant 0 : index
    %29 = vector.load %arg5[%c0_28, %c0_29] : memref<48x1xf32, #tpu.memory_space<vmem>>, vector<48x1xf32>
    %c0_30 = arith.constant 0 : index
    %c0_31 = arith.constant 0 : index
    %c0_32 = arith.constant 0 : index
    %30 = vector.load %arg6[%c0_30, %c0_31, %c0_32] : memref<3x8x8xf32, #tpu.memory_space<vmem>>, vector<1x8x8xf32>
    %31 = vector.shape_cast %30 : vector<1x8x8xf32> to vector<8x8xf32>
    %cst_33 = arith.constant dense<0.000000e+00> : vector<16x8xf32>
    %32 = tpu.matmul %3, %31, %cst_33 {dimension_numbers = #tpu.dot_dimension_numbers<[1], [0], [0], [1], [0, 0, 1, 1], [], []>} : vector<16x8xf32>, vector<8x8xf32>, vector<16x8xf32> -> vector<16x8xf32>
    %c0_34 = arith.constant 0 : index
    %c0_35 = arith.constant 0 : index
    %c0_36 = arith.constant 0 : index
    %33 = vector.load %arg4[%c0_34, %c0_35, %c0_36] : memref<3x48x16xf32, #tpu.memory_space<vmem>>, vector<1x48x16xf32>
    %34 = vector.shape_cast %33 : vector<1x48x16xf32> to vector<48x16xf32>
    %cst_37 = arith.constant dense<0.000000e+00> : vector<48x8xf32>
    %35 = tpu.matmul %34, %32, %cst_37 {dimension_numbers = #tpu.dot_dimension_numbers<[1], [0], [0], [1], [0, 0, 1, 1], [], []>} : vector<48x16xf32>, vector<16x8xf32>, vector<48x8xf32> -> vector<48x8xf32>
    %36 = vector.broadcast %29 : vector<48x1xf32> to vector<48x8xf32>
    %37 = arith.addf %36, %35 : vector<48x8xf32>
    %c1_38 = arith.constant 1 : index
    %c0_39 = arith.constant 0 : index
    %c0_40 = arith.constant 0 : index
    %38 = vector.load %arg6[%c1_38, %c0_39, %c0_40] : memref<3x8x8xf32, #tpu.memory_space<vmem>>, vector<1x8x8xf32>
    %39 = vector.shape_cast %38 : vector<1x8x8xf32> to vector<8x8xf32>
    %cst_41 = arith.constant dense<0.000000e+00> : vector<16x8xf32>
    %40 = tpu.matmul %3, %39, %cst_41 {dimension_numbers = #tpu.dot_dimension_numbers<[1], [0], [0], [1], [0, 0, 1, 1], [], []>} : vector<16x8xf32>, vector<8x8xf32>, vector<16x8xf32> -> vector<16x8xf32>
    %c1_42 = arith.constant 1 : index
    %c0_43 = arith.constant 0 : index
    %c0_44 = arith.constant 0 : index
    %41 = vector.load %arg4[%c1_42, %c0_43, %c0_44] : memref<3x48x16xf32, #tpu.memory_space<vmem>>, vector<1x48x16xf32>
    %42 = vector.shape_cast %41 : vector<1x48x16xf32> to vector<48x16xf32>
    %cst_45 = arith.constant dense<0.000000e+00> : vector<48x8xf32>
    %43 = tpu.matmul %42, %40, %cst_45 {dimension_numbers = #tpu.dot_dimension_numbers<[1], [0], [0], [1], [0, 0, 1, 1], [], []>} : vector<48x16xf32>, vector<16x8xf32>, vector<48x8xf32> -> vector<48x8xf32>
    %44 = arith.addf %37, %43 : vector<48x8xf32>
    %c2_46 = arith.constant 2 : index
    %c0_47 = arith.constant 0 : index
    %c0_48 = arith.constant 0 : index
    %45 = vector.load %arg6[%c2_46, %c0_47, %c0_48] : memref<3x8x8xf32, #tpu.memory_space<vmem>>, vector<1x8x8xf32>
    %46 = vector.shape_cast %45 : vector<1x8x8xf32> to vector<8x8xf32>
    %cst_49 = arith.constant dense<0.000000e+00> : vector<16x8xf32>
    %47 = tpu.matmul %3, %46, %cst_49 {dimension_numbers = #tpu.dot_dimension_numbers<[1], [0], [0], [1], [0, 0, 1, 1], [], []>} : vector<16x8xf32>, vector<8x8xf32>, vector<16x8xf32> -> vector<16x8xf32>
    %c2_50 = arith.constant 2 : index
    %c0_51 = arith.constant 0 : index
    %c0_52 = arith.constant 0 : index
    %48 = vector.load %arg4[%c2_50, %c0_51, %c0_52] : memref<3x48x16xf32, #tpu.memory_space<vmem>>, vector<1x48x16xf32>
    %49 = vector.shape_cast %48 : vector<1x48x16xf32> to vector<48x16xf32>
    %cst_53 = arith.constant dense<0.000000e+00> : vector<48x8xf32>
    %50 = tpu.matmul %49, %47, %cst_53 {dimension_numbers = #tpu.dot_dimension_numbers<[1], [0], [0], [1], [0, 0, 1, 1], [], []>} : vector<48x16xf32>, vector<16x8xf32>, vector<48x8xf32> -> vector<48x8xf32>
    %51 = arith.addf %44, %50 : vector<48x8xf32>
    %52 = vector.extract_strided_slice %28 {offsets = [0, 0], sizes = [16, 8], strides = [1, 1]} : vector<48x8xf32> to vector<16x8xf32>
    %53 = vector.extract_strided_slice %51 {offsets = [0, 0], sizes = [16, 8], strides = [1, 1]} : vector<48x8xf32> to vector<16x8xf32>
    %54 = arith.addf %52, %53 : vector<16x8xf32>
    %55 = arith.negf %54 : vector<16x8xf32>
    %56 = math.exp %55 : vector<16x8xf32>
    %cst_54 = arith.constant 1.000000e+00 : f32
    %57 = vector.broadcast %cst_54 : f32 to vector<16x8xf32>
    %58 = arith.addf %57, %56 : vector<16x8xf32>
    %59 = arith.divf %57, %58 : vector<16x8xf32>
    %60 = vector.extract_strided_slice %28 {offsets = [16, 0], sizes = [16, 8], strides = [1, 1]} : vector<48x8xf32> to vector<16x8xf32>
    %61 = vector.extract_strided_slice %51 {offsets = [16, 0], sizes = [16, 8], strides = [1, 1]} : vector<48x8xf32> to vector<16x8xf32>
    %62 = arith.addf %60, %61 : vector<16x8xf32>
    %63 = arith.negf %62 : vector<16x8xf32>
    %64 = math.exp %63 : vector<16x8xf32>
    %cst_55 = arith.constant 1.000000e+00 : f32
    %65 = vector.broadcast %cst_55 : f32 to vector<16x8xf32>
    %66 = arith.addf %65, %64 : vector<16x8xf32>
    %67 = arith.divf %65, %66 : vector<16x8xf32>
    %68 = vector.extract_strided_slice %28 {offsets = [32, 0], sizes = [16, 8], strides = [1, 1]} : vector<48x8xf32> to vector<16x8xf32>
    %69 = vector.extract_strided_slice %51 {offsets = [32, 0], sizes = [16, 8], strides = [1, 1]} : vector<48x8xf32> to vector<16x8xf32>
    %70 = arith.mulf %67, %69 : vector<16x8xf32>
    %71 = arith.addf %68, %70 : vector<16x8xf32>
    %72 = math.tanh %71 : vector<16x8xf32>
    %cst_56 = arith.constant 1.000000e+00 : f32
    %73 = vector.broadcast %cst_56 : f32 to vector<16x8xf32>
    %74 = arith.subf %73, %59 : vector<16x8xf32>
    %75 = arith.mulf %74, %72 : vector<16x8xf32>
    %76 = arith.mulf %59, %3 : vector<16x8xf32>
    %77 = arith.addf %75, %76 : vector<16x8xf32>
    %c0_57 = arith.constant 0 : index
    %c0_58 = arith.constant 0 : index
    %78 = vector.load %arg7[%c0_57, %c0_58] : memref<16x8xf32, #tpu.memory_space<vmem>>, vector<16x8xf32>
    tpu.vector_store %arg7[%c0_57, %c0_58], %77 {strides = array<i32>} : memref<16x8xf32, #tpu.memory_space<vmem>>, vector<16x8xf32>,
    return
  }
  func.func @transform_0(%arg0: i32) -> (i32, i32, i32) {
    %c0_i32 = arith.constant 0 : i32
    %c0_i32_0 = arith.constant 0 : i32
    %c0_i32_1 = arith.constant 0 : i32
    return %arg0, %c0_i32, %c0_i32_0 : i32, i32, i32
  }
  func.func @transform_1(%arg0: i32) -> (i32, i32, i32) {
    %c0_i32 = arith.constant 0 : i32
    %c0_i32_0 = arith.constant 0 : i32
    %c0_i32_1 = arith.constant 0 : i32
    %c0_i32_2 = arith.constant 0 : i32
    return %c0_i32, %c0_i32_0, %c0_i32_1 : i32, i32, i32
  }
  func.func @transform_2(%arg0: i32) -> (i32, i32) {
    %c0_i32 = arith.constant 0 : i32
    %c0_i32_0 = arith.constant 0 : i32
    %c0_i32_1 = arith.constant 0 : i32
    return %c0_i32, %c0_i32_0 : i32, i32
  }
  func.func @transform_3(%arg0: i32) -> (i32, i32, i32) {
    %c0_i32 = arith.constant 0 : i32
    %c0_i32_0 = arith.constant 0 : i32
    %c0_i32_1 = arith.constant 0 : i32
    %c0_i32_2 = arith.constant 0 : i32
    return %c0_i32, %c0_i32_0, %c0_i32_1 : i32, i32, i32
  }
  func.func @transform_4(%arg0: i32) -> (i32, i32) {
    %c0_i32 = arith.constant 0 : i32
    %c0_i32_0 = arith.constant 0 : i32
    %c0_i32_1 = arith.constant 0 : i32
    return %c0_i32, %c0_i32_0 : i32, i32
  }
  func.func @transform_5(%arg0: i32) -> (i32, i32, i32) {
    %c0_i32 = arith.constant 0 : i32
    %c0_i32_0 = arith.constant 0 : i32
    %c0_i32_1 = arith.constant 0 : i32
    %c0_i32_2 = arith.constant 0 : i32
    return %c0_i32, %c0_i32_0, %c0_i32_1 : i32, i32, i32
  }
  func.func @transform_6(%arg0: i32) -> (i32, i32) {
    %c0_i32 = arith.constant 0 : i32
    %c0_i32_0 = arith.constant 0 : i32
    %c0_i32_1 = arith.constant 0 : i32
    return %c0_i32, %c0_i32_0 : i32, i32
  }
}

module attributes {stable_mosaic.version = 11 : i64} {
  func.func @_track_repr_kernel(%arg0: i32, %arg1: memref<1x16x8xf32, #tpu.memory_space<vmem>>, %arg2: memref<16x8xf32, #tpu.memory_space<vmem>>, %arg3: memref<3x8x8xf32, #tpu.memory_space<vmem>>, %arg4: memref<3x1x8xf32, #tpu.memory_space<vmem>>, %arg5: memref<8x16xf32, #tpu.memory_space<vmem>>, %arg6: memref<1x16xf32, #tpu.memory_space<vmem>>, %arg7: memref<16x16xf32, #tpu.memory_space<vmem>>, %arg8: memref<1x16xf32, #tpu.memory_space<vmem>>, %arg9: memref<1x16x16xf32, #tpu.memory_space<vmem>>) attributes {dimension_semantics = [#tpu.dimension_semantics<parallel>], iteration_bounds = array<i64: 2>, scalar_prefetch = 0 : i64, scratch_operands = 0 : i64, tpu.core_type = #tpu.core_type<tc>, window_params = [{transform_indices = @transform_0, window_bounds = array<i64: 1, 16, 8>}, {pipeline_mode = #tpu.pipeline_mode<synchronous>, transform_indices = @transform_1, window_bounds = array<i64: 16, 8>}, {pipeline_mode = #tpu.pipeline_mode<synchronous>, transform_indices = @transform_2, window_bounds = array<i64: 3, 8, 8>}, {pipeline_mode = #tpu.pipeline_mode<synchronous>, transform_indices = @transform_3, window_bounds = array<i64: 3, 1, 8>}, {pipeline_mode = #tpu.pipeline_mode<synchronous>, transform_indices = @transform_4, window_bounds = array<i64: 8, 16>}, {pipeline_mode = #tpu.pipeline_mode<synchronous>, transform_indices = @transform_5, window_bounds = array<i64: 1, 16>}, {pipeline_mode = #tpu.pipeline_mode<synchronous>, transform_indices = @transform_6, window_bounds = array<i64: 16, 16>}, {pipeline_mode = #tpu.pipeline_mode<synchronous>, transform_indices = @transform_7, window_bounds = array<i64: 1, 16>}, {transform_indices = @transform_8, window_bounds = array<i64: 1, 16, 16>}]} {
    %c0 = arith.constant 0 : index
    %c0_0 = arith.constant 0 : index
    %c0_1 = arith.constant 0 : index
    %0 = vector.load %arg1[%c0, %c0_0, %c0_1] : memref<1x16x8xf32, #tpu.memory_space<vmem>>, vector<1x16x8xf32>
    %1 = vector.shape_cast %0 : vector<1x16x8xf32> to vector<16x8xf32>
    %2 = tpu.transpose %1, [1, 0] : vector<16x8xf32> -> vector<8x16xf32>
    %c0_2 = arith.constant 0 : index
    %c0_3 = arith.constant 0 : index
    %3 = vector.load %arg2[%c0_2, %c0_3] : memref<16x8xf32, #tpu.memory_space<vmem>>, vector<16x8xf32>
    %cst = arith.constant dense<0.000000e+00> : vector<16x16xf32>
    %4 = tpu.matmul %3, %2, %cst {dimension_numbers = #tpu.dot_dimension_numbers<[1], [0], [0], [1], [0, 0, 1, 1], [], []>} : vector<16x8xf32>, vector<8x16xf32>, vector<16x16xf32> -> vector<16x16xf32>
    %cst_4 = arith.constant 0.353553385 : f32
    %5 = vector.broadcast %cst_4 : f32 to vector<16x16xf32>
    %6 = arith.mulf %4, %5 : vector<16x16xf32>
    %cst_5 = arith.constant dense<0xFF800000> : vector<16xf32>
    %7 = vector.multi_reduction <maximumf>, %6, %cst_5 [1] : vector<16x16xf32> to vector<16xf32>
    %8 = vector.shape_cast %7 : vector<16xf32> to vector<16x1xf32>
    %9 = vector.broadcast %8 : vector<16x1xf32> to vector<16x16xf32>
    %10 = arith.subf %6, %9 : vector<16x16xf32>
    %11 = math.exp %10 : vector<16x16xf32>
    %cst_6 = arith.constant dense<0.000000e+00> : vector<16xf32>
    %12 = vector.multi_reduction <add>, %11, %cst_6 [1] : vector<16x16xf32> to vector<16xf32>
    %13 = vector.shape_cast %12 : vector<16xf32> to vector<16x1xf32>
    %14 = tpu.reciprocal %13 {approx = true} : vector<16x1xf32> -> vector<16x1xf32>
    %15 = vector.broadcast %14 : vector<16x1xf32> to vector<16x16xf32>
    %16 = arith.mulf %11, %15 : vector<16x16xf32>
    %cst_7 = arith.constant dense<0.000000e+00> : vector<16x8xf32>
    %17 = tpu.matmul %16, %1, %cst_7 {dimension_numbers = #tpu.dot_dimension_numbers<[1], [0], [0], [1], [0, 0, 1, 1], [], []>} : vector<16x16xf32>, vector<16x8xf32>, vector<16x8xf32> -> vector<16x8xf32>
    %c0_8 = arith.constant 0 : index
    %c0_9 = arith.constant 0 : index
    %c0_10 = arith.constant 0 : index
    %18 = vector.load %arg3[%c0_8, %c0_9, %c0_10] : memref<3x8x8xf32, #tpu.memory_space<vmem>>, vector<1x8x8xf32>
    %19 = vector.shape_cast %18 : vector<1x8x8xf32> to vector<8x8xf32>
    %cst_11 = arith.constant dense<0.000000e+00> : vector<16x8xf32>
    %20 = tpu.matmul %17, %19, %cst_11 {dimension_numbers = #tpu.dot_dimension_numbers<[1], [0], [0], [1], [0, 0, 1, 1], [], []>} : vector<16x8xf32>, vector<8x8xf32>, vector<16x8xf32> -> vector<16x8xf32>
    %c0_12 = arith.constant 0 : index
    %c0_13 = arith.constant 0 : index
    %c0_14 = arith.constant 0 : index
    %21 = vector.load %arg4[%c0_12, %c0_13, %c0_14] : memref<3x1x8xf32, #tpu.memory_space<vmem>>, vector<1x1x8xf32>
    %22 = vector.shape_cast %21 : vector<1x1x8xf32> to vector<1x8xf32>
    %23 = vector.broadcast %22 : vector<1x8xf32> to vector<16x8xf32>
    %24 = arith.addf %20, %23 : vector<16x8xf32>
    %cst_15 = arith.constant dense<0.000000e+00> : vector<16x16xf32>
    %25 = tpu.matmul %24, %2, %cst_15 {dimension_numbers = #tpu.dot_dimension_numbers<[1], [0], [0], [1], [0, 0, 1, 1], [], []>} : vector<16x8xf32>, vector<8x16xf32>, vector<16x16xf32> -> vector<16x16xf32>
    %cst_16 = arith.constant 0.353553385 : f32
    %26 = vector.broadcast %cst_16 : f32 to vector<16x16xf32>
    %27 = arith.mulf %25, %26 : vector<16x16xf32>
    %cst_17 = arith.constant dense<0xFF800000> : vector<16xf32>
    %28 = vector.multi_reduction <maximumf>, %27, %cst_17 [1] : vector<16x16xf32> to vector<16xf32>
    %29 = vector.shape_cast %28 : vector<16xf32> to vector<16x1xf32>
    %30 = vector.broadcast %29 : vector<16x1xf32> to vector<16x16xf32>
    %31 = arith.subf %27, %30 : vector<16x16xf32>
    %32 = math.exp %31 : vector<16x16xf32>
    %cst_18 = arith.constant dense<0.000000e+00> : vector<16xf32>
    %33 = vector.multi_reduction <add>, %32, %cst_18 [1] : vector<16x16xf32> to vector<16xf32>
    %34 = vector.shape_cast %33 : vector<16xf32> to vector<16x1xf32>
    %35 = tpu.reciprocal %34 {approx = true} : vector<16x1xf32> -> vector<16x1xf32>
    %36 = vector.broadcast %35 : vector<16x1xf32> to vector<16x16xf32>
    %37 = arith.mulf %32, %36 : vector<16x16xf32>
    %cst_19 = arith.constant dense<0.000000e+00> : vector<16x8xf32>
    %38 = tpu.matmul %37, %1, %cst_19 {dimension_numbers = #tpu.dot_dimension_numbers<[1], [0], [0], [1], [0, 0, 1, 1], [], []>} : vector<16x16xf32>, vector<16x8xf32>, vector<16x8xf32> -> vector<16x8xf32>
    %39 = arith.addf %17, %38 : vector<16x8xf32>
    %c1 = arith.constant 1 : index
    %c0_20 = arith.constant 0 : index
    %c0_21 = arith.constant 0 : index
    %40 = vector.load %arg3[%c1, %c0_20, %c0_21] : memref<3x8x8xf32, #tpu.memory_space<vmem>>, vector<1x8x8xf32>
    %41 = vector.shape_cast %40 : vector<1x8x8xf32> to vector<8x8xf32>
    %cst_22 = arith.constant dense<0.000000e+00> : vector<16x8xf32>
    %42 = tpu.matmul %39, %41, %cst_22 {dimension_numbers = #tpu.dot_dimension_numbers<[1], [0], [0], [1], [0, 0, 1, 1], [], []>} : vector<16x8xf32>, vector<8x8xf32>, vector<16x8xf32> -> vector<16x8xf32>
    %c1_23 = arith.constant 1 : index
    %c0_24 = arith.constant 0 : index
    %c0_25 = arith.constant 0 : index
    %43 = vector.load %arg4[%c1_23, %c0_24, %c0_25] : memref<3x1x8xf32, #tpu.memory_space<vmem>>, vector<1x1x8xf32>
    %44 = vector.shape_cast %43 : vector<1x1x8xf32> to vector<1x8xf32>
    %45 = vector.broadcast %44 : vector<1x8xf32> to vector<16x8xf32>
    %46 = arith.addf %42, %45 : vector<16x8xf32>
    %cst_26 = arith.constant dense<0.000000e+00> : vector<16x16xf32>
    %47 = tpu.matmul %46, %2, %cst_26 {dimension_numbers = #tpu.dot_dimension_numbers<[1], [0], [0], [1], [0, 0, 1, 1], [], []>} : vector<16x8xf32>, vector<8x16xf32>, vector<16x16xf32> -> vector<16x16xf32>
    %cst_27 = arith.constant 0.353553385 : f32
    %48 = vector.broadcast %cst_27 : f32 to vector<16x16xf32>
    %49 = arith.mulf %47, %48 : vector<16x16xf32>
    %cst_28 = arith.constant dense<0xFF800000> : vector<16xf32>
    %50 = vector.multi_reduction <maximumf>, %49, %cst_28 [1] : vector<16x16xf32> to vector<16xf32>
    %51 = vector.shape_cast %50 : vector<16xf32> to vector<16x1xf32>
    %52 = vector.broadcast %51 : vector<16x1xf32> to vector<16x16xf32>
    %53 = arith.subf %49, %52 : vector<16x16xf32>
    %54 = math.exp %53 : vector<16x16xf32>
    %cst_29 = arith.constant dense<0.000000e+00> : vector<16xf32>
    %55 = vector.multi_reduction <add>, %54, %cst_29 [1] : vector<16x16xf32> to vector<16xf32>
    %56 = vector.shape_cast %55 : vector<16xf32> to vector<16x1xf32>
    %57 = tpu.reciprocal %56 {approx = true} : vector<16x1xf32> -> vector<16x1xf32>
    %58 = vector.broadcast %57 : vector<16x1xf32> to vector<16x16xf32>
    %59 = arith.mulf %54, %58 : vector<16x16xf32>
    %cst_30 = arith.constant dense<0.000000e+00> : vector<16x8xf32>
    %60 = tpu.matmul %59, %1, %cst_30 {dimension_numbers = #tpu.dot_dimension_numbers<[1], [0], [0], [1], [0, 0, 1, 1], [], []>} : vector<16x16xf32>, vector<16x8xf32>, vector<16x8xf32> -> vector<16x8xf32>
    %61 = arith.addf %39, %60 : vector<16x8xf32>
    %c2 = arith.constant 2 : index
    %c0_31 = arith.constant 0 : index
    %c0_32 = arith.constant 0 : index
    %62 = vector.load %arg3[%c2, %c0_31, %c0_32] : memref<3x8x8xf32, #tpu.memory_space<vmem>>, vector<1x8x8xf32>
    %63 = vector.shape_cast %62 : vector<1x8x8xf32> to vector<8x8xf32>
    %cst_33 = arith.constant dense<0.000000e+00> : vector<16x8xf32>
    %64 = tpu.matmul %61, %63, %cst_33 {dimension_numbers = #tpu.dot_dimension_numbers<[1], [0], [0], [1], [0, 0, 1, 1], [], []>} : vector<16x8xf32>, vector<8x8xf32>, vector<16x8xf32> -> vector<16x8xf32>
    %c2_34 = arith.constant 2 : index
    %c0_35 = arith.constant 0 : index
    %c0_36 = arith.constant 0 : index
    %65 = vector.load %arg4[%c2_34, %c0_35, %c0_36] : memref<3x1x8xf32, #tpu.memory_space<vmem>>, vector<1x1x8xf32>
    %66 = vector.shape_cast %65 : vector<1x1x8xf32> to vector<1x8xf32>
    %67 = vector.broadcast %66 : vector<1x8xf32> to vector<16x8xf32>
    %68 = arith.addf %64, %67 : vector<16x8xf32>
    %cst_37 = arith.constant dense<0.000000e+00> : vector<16x16xf32>
    %69 = tpu.matmul %68, %2, %cst_37 {dimension_numbers = #tpu.dot_dimension_numbers<[1], [0], [0], [1], [0, 0, 1, 1], [], []>} : vector<16x8xf32>, vector<8x16xf32>, vector<16x16xf32> -> vector<16x16xf32>
    %cst_38 = arith.constant 0.353553385 : f32
    %70 = vector.broadcast %cst_38 : f32 to vector<16x16xf32>
    %71 = arith.mulf %69, %70 : vector<16x16xf32>
    %cst_39 = arith.constant dense<0xFF800000> : vector<16xf32>
    %72 = vector.multi_reduction <maximumf>, %71, %cst_39 [1] : vector<16x16xf32> to vector<16xf32>
    %73 = vector.shape_cast %72 : vector<16xf32> to vector<16x1xf32>
    %74 = vector.broadcast %73 : vector<16x1xf32> to vector<16x16xf32>
    %75 = arith.subf %71, %74 : vector<16x16xf32>
    %76 = math.exp %75 : vector<16x16xf32>
    %cst_40 = arith.constant dense<0.000000e+00> : vector<16xf32>
    %77 = vector.multi_reduction <add>, %76, %cst_40 [1] : vector<16x16xf32> to vector<16xf32>
    %78 = vector.shape_cast %77 : vector<16xf32> to vector<16x1xf32>
    %79 = tpu.reciprocal %78 {approx = true} : vector<16x1xf32> -> vector<16x1xf32>
    %80 = vector.broadcast %79 : vector<16x1xf32> to vector<16x16xf32>
    %81 = arith.mulf %76, %80 : vector<16x16xf32>
    %cst_41 = arith.constant dense<0.000000e+00> : vector<16x8xf32>
    %82 = tpu.matmul %81, %1, %cst_41 {dimension_numbers = #tpu.dot_dimension_numbers<[1], [0], [0], [1], [0, 0, 1, 1], [], []>} : vector<16x16xf32>, vector<16x8xf32>, vector<16x8xf32> -> vector<16x8xf32>
    %83 = arith.addf %61, %82 : vector<16x8xf32>
    %c0_42 = arith.constant 0 : index
    %c0_43 = arith.constant 0 : index
    %84 = vector.load %arg5[%c0_42, %c0_43] : memref<8x16xf32, #tpu.memory_space<vmem>>, vector<8x16xf32>
    %cst_44 = arith.constant dense<0.000000e+00> : vector<16x16xf32>
    %85 = tpu.matmul %83, %84, %cst_44 {dimension_numbers = #tpu.dot_dimension_numbers<[1], [0], [0], [1], [0, 0, 1, 1], [], []>} : vector<16x8xf32>, vector<8x16xf32>, vector<16x16xf32> -> vector<16x16xf32>
    %c0_45 = arith.constant 0 : index
    %c0_46 = arith.constant 0 : index
    %86 = vector.load %arg6[%c0_45, %c0_46] : memref<1x16xf32, #tpu.memory_space<vmem>>, vector<1x16xf32>
    %87 = vector.broadcast %86 : vector<1x16xf32> to vector<16x16xf32>
    %88 = arith.addf %85, %87 : vector<16x16xf32>
    %89 = arith.mulf %88, %88 : vector<16x16xf32>
    %90 = arith.mulf %88, %89 : vector<16x16xf32>
    %cst_47 = arith.constant 4.471500e-02 : f32
    %91 = vector.broadcast %cst_47 : f32 to vector<16x16xf32>
    %92 = arith.mulf %91, %90 : vector<16x16xf32>
    %93 = arith.addf %88, %92 : vector<16x16xf32>
    %cst_48 = arith.constant 0.797884583 : f32
    %94 = vector.broadcast %cst_48 : f32 to vector<16x16xf32>
    %95 = arith.mulf %94, %93 : vector<16x16xf32>
    %96 = math.tanh %95 : vector<16x16xf32>
    %cst_49 = arith.constant 1.000000e+00 : f32
    %97 = vector.broadcast %cst_49 : f32 to vector<16x16xf32>
    %98 = arith.addf %97, %96 : vector<16x16xf32>
    %cst_50 = arith.constant 5.000000e-01 : f32
    %99 = vector.broadcast %cst_50 : f32 to vector<16x16xf32>
    %100 = arith.mulf %99, %98 : vector<16x16xf32>
    %101 = arith.mulf %88, %100 : vector<16x16xf32>
    %c0_51 = arith.constant 0 : index
    %c0_52 = arith.constant 0 : index
    %102 = vector.load %arg7[%c0_51, %c0_52] : memref<16x16xf32, #tpu.memory_space<vmem>>, vector<16x16xf32>
    %cst_53 = arith.constant dense<0.000000e+00> : vector<16x16xf32>
    %103 = tpu.matmul %101, %102, %cst_53 {dimension_numbers = #tpu.dot_dimension_numbers<[1], [0], [0], [1], [0, 0, 1, 1], [], []>} : vector<16x16xf32>, vector<16x16xf32>, vector<16x16xf32> -> vector<16x16xf32>
    %c0_54 = arith.constant 0 : index
    %c0_55 = arith.constant 0 : index
    %104 = vector.load %arg8[%c0_54, %c0_55] : memref<1x16xf32, #tpu.memory_space<vmem>>, vector<1x16xf32>
    %105 = vector.broadcast %104 : vector<1x16xf32> to vector<16x16xf32>
    %106 = arith.addf %103, %105 : vector<16x16xf32>
    %c0_56 = arith.constant 0 : index
    %c0_57 = arith.constant 0 : index
    %c0_58 = arith.constant 0 : index
    %107 = vector.load %arg9[%c0_56, %c0_57, %c0_58] : memref<1x16x16xf32, #tpu.memory_space<vmem>>, vector<1x16x16xf32>
    %108 = vector.shape_cast %107 : vector<1x16x16xf32> to vector<16x16xf32>
    %109 = vector.shape_cast %106 : vector<16x16xf32> to vector<1x16x16xf32>
    tpu.vector_store %arg9[%c0_56, %c0_57, %c0_58], %109 {strides = array<i32>} : memref<1x16x16xf32, #tpu.memory_space<vmem>>, vector<1x16x16xf32>,
    return
  }
  func.func @transform_0(%arg0: i32) -> (i32, i32, i32) {
    %c0_i32 = arith.constant 0 : i32
    %c0_i32_0 = arith.constant 0 : i32
    %c0_i32_1 = arith.constant 0 : i32
    return %arg0, %c0_i32, %c0_i32_0 : i32, i32, i32
  }
  func.func @transform_1(%arg0: i32) -> (i32, i32) {
    %c0_i32 = arith.constant 0 : i32
    %c0_i32_0 = arith.constant 0 : i32
    %c0_i32_1 = arith.constant 0 : i32
    return %c0_i32, %c0_i32_0 : i32, i32
  }
  func.func @transform_2(%arg0: i32) -> (i32, i32, i32) {
    %c0_i32 = arith.constant 0 : i32
    %c0_i32_0 = arith.constant 0 : i32
    %c0_i32_1 = arith.constant 0 : i32
    %c0_i32_2 = arith.constant 0 : i32
    return %c0_i32, %c0_i32_0, %c0_i32_1 : i32, i32, i32
  }
  func.func @transform_3(%arg0: i32) -> (i32, i32, i32) {
    %c0_i32 = arith.constant 0 : i32
    %c0_i32_0 = arith.constant 0 : i32
    %c0_i32_1 = arith.constant 0 : i32
    %c0_i32_2 = arith.constant 0 : i32
    return %c0_i32, %c0_i32_0, %c0_i32_1 : i32, i32, i32
  }
  func.func @transform_4(%arg0: i32) -> (i32, i32) {
    %c0_i32 = arith.constant 0 : i32
    %c0_i32_0 = arith.constant 0 : i32
    %c0_i32_1 = arith.constant 0 : i32
    return %c0_i32, %c0_i32_0 : i32, i32
  }
  func.func @transform_5(%arg0: i32) -> (i32, i32) {
    %c0_i32 = arith.constant 0 : i32
    %c0_i32_0 = arith.constant 0 : i32
    %c0_i32_1 = arith.constant 0 : i32
    return %c0_i32, %c0_i32_0 : i32, i32
  }
  func.func @transform_6(%arg0: i32) -> (i32, i32) {
    %c0_i32 = arith.constant 0 : i32
    %c0_i32_0 = arith.constant 0 : i32
    %c0_i32_1 = arith.constant 0 : i32
    return %c0_i32, %c0_i32_0 : i32, i32
  }
  func.func @transform_7(%arg0: i32) -> (i32, i32) {
    %c0_i32 = arith.constant 0 : i32
    %c0_i32_0 = arith.constant 0 : i32
    %c0_i32_1 = arith.constant 0 : i32
    return %c0_i32, %c0_i32_0 : i32, i32
  }
  func.func @transform_8(%arg0: i32) -> (i32, i32, i32) {
    %c0_i32 = arith.constant 0 : i32
    %c0_i32_0 = arith.constant 0 : i32
    %c0_i32_1 = arith.constant 0 : i32
    return %arg0, %c0_i32, %c0_i32_0 : i32, i32, i32
  }
}

module attributes {stable_mosaic.version = 11 : i64} {
  func.func @_motion_encoder_kernel(%arg0: i32, %arg1: memref<1x8x32xf32, #tpu.memory_space<vmem>>, %arg2: memref<3x4x8xf32, #tpu.memory_space<vmem>>, %arg3: memref<4x1xf32, #tpu.memory_space<vmem>>, %arg4: memref<3x32x32xf32, #tpu.memory_space<vmem>>, %arg5: memref<3x8x4xf32, #tpu.memory_space<vmem>>, %arg6: memref<8x1xf32, #tpu.memory_space<vmem>>, %arg7: memref<3x32x16xf32, #tpu.memory_space<vmem>>, %arg8: memref<3x16x8xf32, #tpu.memory_space<vmem>>, %arg9: memref<16x1xf32, #tpu.memory_space<vmem>>, %arg10: memref<3x16x8xf32, #tpu.memory_space<vmem>>, %arg11: memref<1x16x8xf32, #tpu.memory_space<vmem>>) attributes {dimension_semantics = [#tpu.dimension_semantics<parallel>], iteration_bounds = array<i64: 2>, scalar_prefetch = 0 : i64, scratch_operands = 0 : i64, tpu.core_type = #tpu.core_type<tc>, window_params = [{transform_indices = @transform_0, window_bounds = array<i64: 1, 8, 32>}, {pipeline_mode = #tpu.pipeline_mode<synchronous>, transform_indices = @transform_1, window_bounds = array<i64: 3, 4, 8>}, {pipeline_mode = #tpu.pipeline_mode<synchronous>, transform_indices = @transform_2, window_bounds = array<i64: 4, 1>}, {pipeline_mode = #tpu.pipeline_mode<synchronous>, transform_indices = @transform_3, window_bounds = array<i64: 3, 32, 32>}, {pipeline_mode = #tpu.pipeline_mode<synchronous>, transform_indices = @transform_4, window_bounds = array<i64: 3, 8, 4>}, {pipeline_mode = #tpu.pipeline_mode<synchronous>, transform_indices = @transform_5, window_bounds = array<i64: 8, 1>}, {pipeline_mode = #tpu.pipeline_mode<synchronous>, transform_indices = @transform_6, window_bounds = array<i64: 3, 32, 16>}, {pipeline_mode = #tpu.pipeline_mode<synchronous>, transform_indices = @transform_7, window_bounds = array<i64: 3, 16, 8>}, {pipeline_mode = #tpu.pipeline_mode<synchronous>, transform_indices = @transform_8, window_bounds = array<i64: 16, 1>}, {pipeline_mode = #tpu.pipeline_mode<synchronous>, transform_indices = @transform_9, window_bounds = array<i64: 3, 16, 8>}, {transform_indices = @transform_10, window_bounds = array<i64: 1, 16, 8>}]} {
    %c0 = arith.constant 0 : index
    %c0_0 = arith.constant 0 : index
    %c0_1 = arith.constant 0 : index
    %0 = vector.load %arg1[%c0, %c0_0, %c0_1] : memref<1x8x32xf32, #tpu.memory_space<vmem>>, vector<1x8x32xf32>
    %1 = vector.shape_cast %0 : vector<1x8x32xf32> to vector<8x32xf32>
    %c0_2 = arith.constant 0 : index
    %c0_3 = arith.constant 0 : index
    %2 = vector.load %arg3[%c0_2, %c0_3] : memref<4x1xf32, #tpu.memory_space<vmem>>, vector<4x1xf32>
    %c0_4 = arith.constant 0 : index
    %c0_5 = arith.constant 0 : index
    %c0_6 = arith.constant 0 : index
    %3 = vector.load %arg4[%c0_4, %c0_5, %c0_6] : memref<3x32x32xf32, #tpu.memory_space<vmem>>, vector<1x32x32xf32>
    %4 = vector.shape_cast %3 : vector<1x32x32xf32> to vector<32x32xf32>
    %cst = arith.constant dense<0.000000e+00> : vector<8x32xf32>
    %5 = tpu.matmul %1, %4, %cst {dimension_numbers = #tpu.dot_dimension_numbers<[1], [0], [0], [1], [0, 0, 1, 1], [], []>} : vector<8x32xf32>, vector<32x32xf32>, vector<8x32xf32> -> vector<8x32xf32>
    %c0_7 = arith.constant 0 : index
    %c0_8 = arith.constant 0 : index
    %c0_9 = arith.constant 0 : index
    %6 = vector.load %arg2[%c0_7, %c0_8, %c0_9] : memref<3x4x8xf32, #tpu.memory_space<vmem>>, vector<1x4x8xf32>
    %7 = vector.shape_cast %6 : vector<1x4x8xf32> to vector<4x8xf32>
    %cst_10 = arith.constant dense<0.000000e+00> : vector<4x32xf32>
    %8 = tpu.matmul %7, %5, %cst_10 {dimension_numbers = #tpu.dot_dimension_numbers<[1], [0], [0], [1], [0, 0, 1, 1], [], []>} : vector<4x8xf32>, vector<8x32xf32>, vector<4x32xf32> -> vector<4x32xf32>
    %9 = vector.broadcast %2 : vector<4x1xf32> to vector<4x32xf32>
    %10 = arith.addf %9, %8 : vector<4x32xf32>
    %c1 = arith.constant 1 : index
    %c0_11 = arith.constant 0 : index
    %c0_12 = arith.constant 0 : index
    %11 = vector.load %arg4[%c1, %c0_11, %c0_12] : memref<3x32x32xf32, #tpu.memory_space<vmem>>, vector<1x32x32xf32>
    %12 = vector.shape_cast %11 : vector<1x32x32xf32> to vector<32x32xf32>
    %cst_13 = arith.constant dense<0.000000e+00> : vector<8x32xf32>
    %13 = tpu.matmul %1, %12, %cst_13 {dimension_numbers = #tpu.dot_dimension_numbers<[1], [0], [0], [1], [0, 0, 1, 1], [], []>} : vector<8x32xf32>, vector<32x32xf32>, vector<8x32xf32> -> vector<8x32xf32>
    %c1_14 = arith.constant 1 : index
    %c0_15 = arith.constant 0 : index
    %c0_16 = arith.constant 0 : index
    %14 = vector.load %arg2[%c1_14, %c0_15, %c0_16] : memref<3x4x8xf32, #tpu.memory_space<vmem>>, vector<1x4x8xf32>
    %15 = vector.shape_cast %14 : vector<1x4x8xf32> to vector<4x8xf32>
    %cst_17 = arith.constant dense<0.000000e+00> : vector<4x32xf32>
    %16 = tpu.matmul %15, %13, %cst_17 {dimension_numbers = #tpu.dot_dimension_numbers<[1], [0], [0], [1], [0, 0, 1, 1], [], []>} : vector<4x8xf32>, vector<8x32xf32>, vector<4x32xf32> -> vector<4x32xf32>
    %17 = arith.addf %10, %16 : vector<4x32xf32>
    %c2 = arith.constant 2 : index
    %c0_18 = arith.constant 0 : index
    %c0_19 = arith.constant 0 : index
    %18 = vector.load %arg4[%c2, %c0_18, %c0_19] : memref<3x32x32xf32, #tpu.memory_space<vmem>>, vector<1x32x32xf32>
    %19 = vector.shape_cast %18 : vector<1x32x32xf32> to vector<32x32xf32>
    %cst_20 = arith.constant dense<0.000000e+00> : vector<8x32xf32>
    %20 = tpu.matmul %1, %19, %cst_20 {dimension_numbers = #tpu.dot_dimension_numbers<[1], [0], [0], [1], [0, 0, 1, 1], [], []>} : vector<8x32xf32>, vector<32x32xf32>, vector<8x32xf32> -> vector<8x32xf32>
    %c2_21 = arith.constant 2 : index
    %c0_22 = arith.constant 0 : index
    %c0_23 = arith.constant 0 : index
    %21 = vector.load %arg2[%c2_21, %c0_22, %c0_23] : memref<3x4x8xf32, #tpu.memory_space<vmem>>, vector<1x4x8xf32>
    %22 = vector.shape_cast %21 : vector<1x4x8xf32> to vector<4x8xf32>
    %cst_24 = arith.constant dense<0.000000e+00> : vector<4x32xf32>
    %23 = tpu.matmul %22, %20, %cst_24 {dimension_numbers = #tpu.dot_dimension_numbers<[1], [0], [0], [1], [0, 0, 1, 1], [], []>} : vector<4x8xf32>, vector<8x32xf32>, vector<4x32xf32> -> vector<4x32xf32>
    %24 = arith.addf %17, %23 : vector<4x32xf32>
    %25 = math.tanh %24 : vector<4x32xf32>
    %c0_25 = arith.constant 0 : index
    %c0_26 = arith.constant 0 : index
    %26 = vector.load %arg6[%c0_25, %c0_26] : memref<8x1xf32, #tpu.memory_space<vmem>>, vector<8x1xf32>
    %c0_27 = arith.constant 0 : index
    %c0_28 = arith.constant 0 : index
    %c0_29 = arith.constant 0 : index
    %27 = vector.load %arg7[%c0_27, %c0_28, %c0_29] : memref<3x32x16xf32, #tpu.memory_space<vmem>>, vector<1x32x16xf32>
    %28 = vector.shape_cast %27 : vector<1x32x16xf32> to vector<32x16xf32>
    %cst_30 = arith.constant dense<0.000000e+00> : vector<4x16xf32>
    %29 = tpu.matmul %25, %28, %cst_30 {dimension_numbers = #tpu.dot_dimension_numbers<[1], [0], [0], [1], [0, 0, 1, 1], [], []>} : vector<4x32xf32>, vector<32x16xf32>, vector<4x16xf32> -> vector<4x16xf32>
    %c0_31 = arith.constant 0 : index
    %c0_32 = arith.constant 0 : index
    %c0_33 = arith.constant 0 : index
    %30 = vector.load %arg5[%c0_31, %c0_32, %c0_33] : memref<3x8x4xf32, #tpu.memory_space<vmem>>, vector<1x8x4xf32>
    %31 = vector.shape_cast %30 : vector<1x8x4xf32> to vector<8x4xf32>
    %cst_34 = arith.constant dense<0.000000e+00> : vector<8x16xf32>
    %32 = tpu.matmul %31, %29, %cst_34 {dimension_numbers = #tpu.dot_dimension_numbers<[1], [0], [0], [1], [0, 0, 1, 1], [], []>} : vector<8x4xf32>, vector<4x16xf32>, vector<8x16xf32> -> vector<8x16xf32>
    %33 = vector.broadcast %26 : vector<8x1xf32> to vector<8x16xf32>
    %34 = arith.addf %33, %32 : vector<8x16xf32>
    %c1_35 = arith.constant 1 : index
    %c0_36 = arith.constant 0 : index
    %c0_37 = arith.constant 0 : index
    %35 = vector.load %arg7[%c1_35, %c0_36, %c0_37] : memref<3x32x16xf32, #tpu.memory_space<vmem>>, vector<1x32x16xf32>
    %36 = vector.shape_cast %35 : vector<1x32x16xf32> to vector<32x16xf32>
    %cst_38 = arith.constant dense<0.000000e+00> : vector<4x16xf32>
    %37 = tpu.matmul %25, %36, %cst_38 {dimension_numbers = #tpu.dot_dimension_numbers<[1], [0], [0], [1], [0, 0, 1, 1], [], []>} : vector<4x32xf32>, vector<32x16xf32>, vector<4x16xf32> -> vector<4x16xf32>
    %c1_39 = arith.constant 1 : index
    %c0_40 = arith.constant 0 : index
    %c0_41 = arith.constant 0 : index
    %38 = vector.load %arg5[%c1_39, %c0_40, %c0_41] : memref<3x8x4xf32, #tpu.memory_space<vmem>>, vector<1x8x4xf32>
    %39 = vector.shape_cast %38 : vector<1x8x4xf32> to vector<8x4xf32>
    %cst_42 = arith.constant dense<0.000000e+00> : vector<8x16xf32>
    %40 = tpu.matmul %39, %37, %cst_42 {dimension_numbers = #tpu.dot_dimension_numbers<[1], [0], [0], [1], [0, 0, 1, 1], [], []>} : vector<8x4xf32>, vector<4x16xf32>, vector<8x16xf32> -> vector<8x16xf32>
    %41 = arith.addf %34, %40 : vector<8x16xf32>
    %c2_43 = arith.constant 2 : index
    %c0_44 = arith.constant 0 : index
    %c0_45 = arith.constant 0 : index
    %42 = vector.load %arg7[%c2_43, %c0_44, %c0_45] : memref<3x32x16xf32, #tpu.memory_space<vmem>>, vector<1x32x16xf32>
    %43 = vector.shape_cast %42 : vector<1x32x16xf32> to vector<32x16xf32>
    %cst_46 = arith.constant dense<0.000000e+00> : vector<4x16xf32>
    %44 = tpu.matmul %25, %43, %cst_46 {dimension_numbers = #tpu.dot_dimension_numbers<[1], [0], [0], [1], [0, 0, 1, 1], [], []>} : vector<4x32xf32>, vector<32x16xf32>, vector<4x16xf32> -> vector<4x16xf32>
    %c2_47 = arith.constant 2 : index
    %c0_48 = arith.constant 0 : index
    %c0_49 = arith.constant 0 : index
    %45 = vector.load %arg5[%c2_47, %c0_48, %c0_49] : memref<3x8x4xf32, #tpu.memory_space<vmem>>, vector<1x8x4xf32>
    %46 = vector.shape_cast %45 : vector<1x8x4xf32> to vector<8x4xf32>
    %cst_50 = arith.constant dense<0.000000e+00> : vector<8x16xf32>
    %47 = tpu.matmul %46, %44, %cst_50 {dimension_numbers = #tpu.dot_dimension_numbers<[1], [0], [0], [1], [0, 0, 1, 1], [], []>} : vector<8x4xf32>, vector<4x16xf32>, vector<8x16xf32> -> vector<8x16xf32>
    %48 = arith.addf %41, %47 : vector<8x16xf32>
    %49 = math.tanh %48 : vector<8x16xf32>
    %c0_51 = arith.constant 0 : index
    %c0_52 = arith.constant 0 : index
    %50 = vector.load %arg9[%c0_51, %c0_52] : memref<16x1xf32, #tpu.memory_space<vmem>>, vector<16x1xf32>
    %c0_53 = arith.constant 0 : index
    %c0_54 = arith.constant 0 : index
    %c0_55 = arith.constant 0 : index
    %51 = vector.load %arg10[%c0_53, %c0_54, %c0_55] : memref<3x16x8xf32, #tpu.memory_space<vmem>>, vector<1x16x8xf32>
    %52 = vector.shape_cast %51 : vector<1x16x8xf32> to vector<16x8xf32>
    %cst_56 = arith.constant dense<0.000000e+00> : vector<8x8xf32>
    %53 = tpu.matmul %49, %52, %cst_56 {dimension_numbers = #tpu.dot_dimension_numbers<[1], [0], [0], [1], [0, 0, 1, 1], [], []>} : vector<8x16xf32>, vector<16x8xf32>, vector<8x8xf32> -> vector<8x8xf32>
    %c0_57 = arith.constant 0 : index
    %c0_58 = arith.constant 0 : index
    %c0_59 = arith.constant 0 : index
    %54 = vector.load %arg8[%c0_57, %c0_58, %c0_59] : memref<3x16x8xf32, #tpu.memory_space<vmem>>, vector<1x16x8xf32>
    %55 = vector.shape_cast %54 : vector<1x16x8xf32> to vector<16x8xf32>
    %cst_60 = arith.constant dense<0.000000e+00> : vector<16x8xf32>
    %56 = tpu.matmul %55, %53, %cst_60 {dimension_numbers = #tpu.dot_dimension_numbers<[1], [0], [0], [1], [0, 0, 1, 1], [], []>} : vector<16x8xf32>, vector<8x8xf32>, vector<16x8xf32> -> vector<16x8xf32>
    %57 = vector.broadcast %50 : vector<16x1xf32> to vector<16x8xf32>
    %58 = arith.addf %57, %56 : vector<16x8xf32>
    %c1_61 = arith.constant 1 : index
    %c0_62 = arith.constant 0 : index
    %c0_63 = arith.constant 0 : index
    %59 = vector.load %arg10[%c1_61, %c0_62, %c0_63] : memref<3x16x8xf32, #tpu.memory_space<vmem>>, vector<1x16x8xf32>
    %60 = vector.shape_cast %59 : vector<1x16x8xf32> to vector<16x8xf32>
    %cst_64 = arith.constant dense<0.000000e+00> : vector<8x8xf32>
    %61 = tpu.matmul %49, %60, %cst_64 {dimension_numbers = #tpu.dot_dimension_numbers<[1], [0], [0], [1], [0, 0, 1, 1], [], []>} : vector<8x16xf32>, vector<16x8xf32>, vector<8x8xf32> -> vector<8x8xf32>
    %c1_65 = arith.constant 1 : index
    %c0_66 = arith.constant 0 : index
    %c0_67 = arith.constant 0 : index
    %62 = vector.load %arg8[%c1_65, %c0_66, %c0_67] : memref<3x16x8xf32, #tpu.memory_space<vmem>>, vector<1x16x8xf32>
    %63 = vector.shape_cast %62 : vector<1x16x8xf32> to vector<16x8xf32>
    %cst_68 = arith.constant dense<0.000000e+00> : vector<16x8xf32>
    %64 = tpu.matmul %63, %61, %cst_68 {dimension_numbers = #tpu.dot_dimension_numbers<[1], [0], [0], [1], [0, 0, 1, 1], [], []>} : vector<16x8xf32>, vector<8x8xf32>, vector<16x8xf32> -> vector<16x8xf32>
    %65 = arith.addf %58, %64 : vector<16x8xf32>
    %c2_69 = arith.constant 2 : index
    %c0_70 = arith.constant 0 : index
    %c0_71 = arith.constant 0 : index
    %66 = vector.load %arg10[%c2_69, %c0_70, %c0_71] : memref<3x16x8xf32, #tpu.memory_space<vmem>>, vector<1x16x8xf32>
    %67 = vector.shape_cast %66 : vector<1x16x8xf32> to vector<16x8xf32>
    %cst_72 = arith.constant dense<0.000000e+00> : vector<8x8xf32>
    %68 = tpu.matmul %49, %67, %cst_72 {dimension_numbers = #tpu.dot_dimension_numbers<[1], [0], [0], [1], [0, 0, 1, 1], [], []>} : vector<8x16xf32>, vector<16x8xf32>, vector<8x8xf32> -> vector<8x8xf32>
    %c2_73 = arith.constant 2 : index
    %c0_74 = arith.constant 0 : index
    %c0_75 = arith.constant 0 : index
    %69 = vector.load %arg8[%c2_73, %c0_74, %c0_75] : memref<3x16x8xf32, #tpu.memory_space<vmem>>, vector<1x16x8xf32>
    %70 = vector.shape_cast %69 : vector<1x16x8xf32> to vector<16x8xf32>
    %cst_76 = arith.constant dense<0.000000e+00> : vector<16x8xf32>
    %71 = tpu.matmul %70, %68, %cst_76 {dimension_numbers = #tpu.dot_dimension_numbers<[1], [0], [0], [1], [0, 0, 1, 1], [], []>} : vector<16x8xf32>, vector<8x8xf32>, vector<16x8xf32> -> vector<16x8xf32>
    %72 = arith.addf %65, %71 : vector<16x8xf32>
    %c0_77 = arith.constant 0 : index
    %c0_78 = arith.constant 0 : index
    %c0_79 = arith.constant 0 : index
    %73 = vector.load %arg11[%c0_77, %c0_78, %c0_79] : memref<1x16x8xf32, #tpu.memory_space<vmem>>, vector<1x16x8xf32>
    %74 = vector.shape_cast %73 : vector<1x16x8xf32> to vector<16x8xf32>
    %75 = vector.shape_cast %72 : vector<16x8xf32> to vector<1x16x8xf32>
    tpu.vector_store %arg11[%c0_77, %c0_78, %c0_79], %75 {strides = array<i32>} : memref<1x16x8xf32, #tpu.memory_space<vmem>>, vector<1x16x8xf32>,
    return
  }
  func.func @transform_0(%arg0: i32) -> (i32, i32, i32) {
    %c0_i32 = arith.constant 0 : i32
    %c0_i32_0 = arith.constant 0 : i32
    %c0_i32_1 = arith.constant 0 : i32
    return %arg0, %c0_i32, %c0_i32_0 : i32, i32, i32
  }
  func.func @transform_1(%arg0: i32) -> (i32, i32, i32) {
    %c0_i32 = arith.constant 0 : i32
    %c0_i32_0 = arith.constant 0 : i32
    %c0_i32_1 = arith.constant 0 : i32
    %c0_i32_2 = arith.constant 0 : i32
    return %c0_i32, %c0_i32_0, %c0_i32_1 : i32, i32, i32
  }
  func.func @transform_2(%arg0: i32) -> (i32, i32) {
    %c0_i32 = arith.constant 0 : i32
    %c0_i32_0 = arith.constant 0 : i32
    %c0_i32_1 = arith.constant 0 : i32
    return %c0_i32, %c0_i32_0 : i32, i32
  }
  func.func @transform_3(%arg0: i32) -> (i32, i32, i32) {
    %c0_i32 = arith.constant 0 : i32
    %c0_i32_0 = arith.constant 0 : i32
    %c0_i32_1 = arith.constant 0 : i32
    %c0_i32_2 = arith.constant 0 : i32
    return %c0_i32, %c0_i32_0, %c0_i32_1 : i32, i32, i32
  }
  func.func @transform_4(%arg0: i32) -> (i32, i32, i32) {
    %c0_i32 = arith.constant 0 : i32
    %c0_i32_0 = arith.constant 0 : i32
    %c0_i32_1 = arith.constant 0 : i32
    %c0_i32_2 = arith.constant 0 : i32
    return %c0_i32, %c0_i32_0, %c0_i32_1 : i32, i32, i32
  }
  func.func @transform_5(%arg0: i32) -> (i32, i32) {
    %c0_i32 = arith.constant 0 : i32
    %c0_i32_0 = arith.constant 0 : i32
    %c0_i32_1 = arith.constant 0 : i32
    return %c0_i32, %c0_i32_0 : i32, i32
  }
  func.func @transform_6(%arg0: i32) -> (i32, i32, i32) {
    %c0_i32 = arith.constant 0 : i32
    %c0_i32_0 = arith.constant 0 : i32
    %c0_i32_1 = arith.constant 0 : i32
    %c0_i32_2 = arith.constant 0 : i32
    return %c0_i32, %c0_i32_0, %c0_i32_1 : i32, i32, i32
  }
  func.func @transform_7(%arg0: i32) -> (i32, i32, i32) {
    %c0_i32 = arith.constant 0 : i32
    %c0_i32_0 = arith.constant 0 : i32
    %c0_i32_1 = arith.constant 0 : i32
    %c0_i32_2 = arith.constant 0 : i32
    return %c0_i32, %c0_i32_0, %c0_i32_1 : i32, i32, i32
  }
  func.func @transform_8(%arg0: i32) -> (i32, i32) {
    %c0_i32 = arith.constant 0 : i32
    %c0_i32_0 = arith.constant 0 : i32
    %c0_i32_1 = arith.constant 0 : i32
    return %c0_i32, %c0_i32_0 : i32, i32
  }
  func.func @transform_9(%arg0: i32) -> (i32, i32, i32) {
    %c0_i32 = arith.constant 0 : i32
    %c0_i32_0 = arith.constant 0 : i32
    %c0_i32_1 = arith.constant 0 : i32
    %c0_i32_2 = arith.constant 0 : i32
    return %c0_i32, %c0_i32_0, %c0_i32_1 : i32, i32, i32
  }
  func.func @transform_10(%arg0: i32) -> (i32, i32, i32) {
    %c0_i32 = arith.constant 0 : i32
    %c0_i32_0 = arith.constant 0 : i32
    %c0_i32_1 = arith.constant 0 : i32
    return %arg0, %c0_i32, %c0_i32_0 : i32, i32, i32
  }
}

module attributes {stable_mosaic.version = 11 : i64} {
  func.func @_sde_rollout_kernel(%arg0: i32, %arg1: memref<2xf32, #tpu.memory_space<smem>>, %arg2: memref<2xf32, #tpu.memory_space<smem>>, %arg3: memref<16x8xf32, #tpu.memory_space<vmem>>, %arg4: memref<1x16x8xf32, #tpu.memory_space<vmem>>, %arg5: memref<3x3x16x16xf32, #tpu.memory_space<vmem>>, %arg6: memref<3x16x1xf32, #tpu.memory_space<vmem>>, %arg7: memref<3x3x16x16xf32, #tpu.memory_space<vmem>>, %arg8: memref<3x16x1xf32, #tpu.memory_space<vmem>>, %arg9: memref<3x8x8xf32, #tpu.memory_space<vmem>>, %arg10: memref<1x16x8xf32, #tpu.memory_space<vmem>>, %arg11: memref<16x8xf32, #tpu.memory_space<vmem>>) attributes {dimension_semantics = [#tpu.dimension_semantics<arbitrary>], iteration_bounds = array<i64: 2>, scalar_prefetch = 0 : i64, scratch_operands = 1 : i64, tpu.core_type = #tpu.core_type<tc>, window_params = [{transform_indices = @transform_0, window_bounds = array<i64: 2>}, {transform_indices = @transform_1, window_bounds = array<i64: 2>}, {pipeline_mode = #tpu.pipeline_mode<synchronous>, transform_indices = @transform_2, window_bounds = array<i64: 16, 8>}, {transform_indices = @transform_3, window_bounds = array<i64: 1, 16, 8>}, {pipeline_mode = #tpu.pipeline_mode<synchronous>, transform_indices = @transform_4, window_bounds = array<i64: 3, 3, 16, 16>}, {pipeline_mode = #tpu.pipeline_mode<synchronous>, transform_indices = @transform_5, window_bounds = array<i64: 3, 16, 1>}, {pipeline_mode = #tpu.pipeline_mode<synchronous>, transform_indices = @transform_6, window_bounds = array<i64: 3, 3, 16, 16>}, {pipeline_mode = #tpu.pipeline_mode<synchronous>, transform_indices = @transform_7, window_bounds = array<i64: 3, 16, 1>}, {pipeline_mode = #tpu.pipeline_mode<synchronous>, transform_indices = @transform_8, window_bounds = array<i64: 3, 8, 8>}, {transform_indices = @transform_9, window_bounds = array<i64: 1, 16, 8>}]} {
    %c0_i32 = arith.constant 0 : i32
    %0 = arith.cmpi eq, %arg0, %c0_i32 : i32
    %1 = arith.extui %0 : i1 to i32
    %c0_i32_0 = arith.constant 0 : i32
    %2 = arith.cmpi ne, %1, %c0_i32_0 : i32
    scf.if %2 {
      %c0_139 = arith.constant 0 : index
      %c0_140 = arith.constant 0 : index
      %182 = vector.load %arg3[%c0_139, %c0_140] : memref<16x8xf32, #tpu.memory_space<vmem>>, vector<16x8xf32>
      %c0_141 = arith.constant 0 : index
      %c0_142 = arith.constant 0 : index
      %183 = vector.load %arg11[%c0_141, %c0_142] : memref<16x8xf32, #tpu.memory_space<vmem>>, vector<16x8xf32>
      tpu.vector_store %arg11[%c0_141, %c0_142], %182 {strides = array<i32>} : memref<16x8xf32, #tpu.memory_space<vmem>>, vector<16x8xf32>,
    } else {
    }
    %c0 = arith.constant 0 : index
    %c0_1 = arith.constant 0 : index
    %3 = vector.load %arg11[%c0, %c0_1] : memref<16x8xf32, #tpu.memory_space<vmem>>, vector<16x8xf32>
    %c0_2 = arith.constant 0 : index
    %c0_3 = arith.constant 0 : index
    %c0_4 = arith.constant 0 : index
    %c0_5 = arith.constant 0 : index
    %4 = vector.load %arg5[%c0_2, %c0_3, %c0_4, %c0_5] : memref<3x3x16x16xf32, #tpu.memory_space<vmem>>, vector<1x3x16x16xf32>
    %5 = vector.shape_cast %4 : vector<1x3x16x16xf32> to vector<3x16x16xf32>
    %c0_6 = arith.constant 0 : index
    %c0_7 = arith.constant 0 : index
    %c0_8 = arith.constant 0 : index
    %6 = vector.load %arg6[%c0_6, %c0_7, %c0_8] : memref<3x16x1xf32, #tpu.memory_space<vmem>>, vector<1x16x1xf32>
    %7 = vector.shape_cast %6 : vector<1x16x1xf32> to vector<16x1xf32>
    %c0_9 = arith.constant 0 : index
    %c0_10 = arith.constant 0 : index
    %c0_11 = arith.constant 0 : index
    %8 = vector.load %arg9[%c0_9, %c0_10, %c0_11] : memref<3x8x8xf32, #tpu.memory_space<vmem>>, vector<1x8x8xf32>
    %9 = vector.shape_cast %8 : vector<1x8x8xf32> to vector<8x8xf32>
    %cst = arith.constant dense<0.000000e+00> : vector<16x8xf32>
    %10 = tpu.matmul %3, %9, %cst {dimension_numbers = #tpu.dot_dimension_numbers<[1], [0], [0], [1], [0, 0, 1, 1], [], []>} : vector<16x8xf32>, vector<8x8xf32>, vector<16x8xf32> -> vector<16x8xf32>
    %11 = vector.extract_strided_slice %5 {offsets = [0, 0, 0], sizes = [1, 16, 16], strides = [1, 1, 1]} : vector<3x16x16xf32> to vector<1x16x16xf32>
    %12 = vector.shape_cast %11 : vector<1x16x16xf32> to vector<16x16xf32>
    %cst_12 = arith.constant dense<0.000000e+00> : vector<16x8xf32>
    %13 = tpu.matmul %12, %10, %cst_12 {dimension_numbers = #tpu.dot_dimension_numbers<[1], [0], [0], [1], [0, 0, 1, 1], [], []>} : vector<16x16xf32>, vector<16x8xf32>, vector<16x8xf32> -> vector<16x8xf32>
    %14 = vector.broadcast %7 : vector<16x1xf32> to vector<16x8xf32>
    %15 = arith.addf %14, %13 : vector<16x8xf32>
    %c1 = arith.constant 1 : index
    %c0_13 = arith.constant 0 : index
    %c0_14 = arith.constant 0 : index
    %16 = vector.load %arg9[%c1, %c0_13, %c0_14] : memref<3x8x8xf32, #tpu.memory_space<vmem>>, vector<1x8x8xf32>
    %17 = vector.shape_cast %16 : vector<1x8x8xf32> to vector<8x8xf32>
    %cst_15 = arith.constant dense<0.000000e+00> : vector<16x8xf32>
    %18 = tpu.matmul %3, %17, %cst_15 {dimension_numbers = #tpu.dot_dimension_numbers<[1], [0], [0], [1], [0, 0, 1, 1], [], []>} : vector<16x8xf32>, vector<8x8xf32>, vector<16x8xf32> -> vector<16x8xf32>
    %19 = vector.extract_strided_slice %5 {offsets = [1, 0, 0], sizes = [1, 16, 16], strides = [1, 1, 1]} : vector<3x16x16xf32> to vector<1x16x16xf32>
    %20 = vector.shape_cast %19 : vector<1x16x16xf32> to vector<16x16xf32>
    %cst_16 = arith.constant dense<0.000000e+00> : vector<16x8xf32>
    %21 = tpu.matmul %20, %18, %cst_16 {dimension_numbers = #tpu.dot_dimension_numbers<[1], [0], [0], [1], [0, 0, 1, 1], [], []>} : vector<16x16xf32>, vector<16x8xf32>, vector<16x8xf32> -> vector<16x8xf32>
    %22 = arith.addf %15, %21 : vector<16x8xf32>
    %c2 = arith.constant 2 : index
    %c0_17 = arith.constant 0 : index
    %c0_18 = arith.constant 0 : index
    %23 = vector.load %arg9[%c2, %c0_17, %c0_18] : memref<3x8x8xf32, #tpu.memory_space<vmem>>, vector<1x8x8xf32>
    %24 = vector.shape_cast %23 : vector<1x8x8xf32> to vector<8x8xf32>
    %cst_19 = arith.constant dense<0.000000e+00> : vector<16x8xf32>
    %25 = tpu.matmul %3, %24, %cst_19 {dimension_numbers = #tpu.dot_dimension_numbers<[1], [0], [0], [1], [0, 0, 1, 1], [], []>} : vector<16x8xf32>, vector<8x8xf32>, vector<16x8xf32> -> vector<16x8xf32>
    %26 = vector.extract_strided_slice %5 {offsets = [2, 0, 0], sizes = [1, 16, 16], strides = [1, 1, 1]} : vector<3x16x16xf32> to vector<1x16x16xf32>
    %27 = vector.shape_cast %26 : vector<1x16x16xf32> to vector<16x16xf32>
    %cst_20 = arith.constant dense<0.000000e+00> : vector<16x8xf32>
    %28 = tpu.matmul %27, %25, %cst_20 {dimension_numbers = #tpu.dot_dimension_numbers<[1], [0], [0], [1], [0, 0, 1, 1], [], []>} : vector<16x16xf32>, vector<16x8xf32>, vector<16x8xf32> -> vector<16x8xf32>
    %29 = arith.addf %22, %28 : vector<16x8xf32>
    %30 = math.tanh %29 : vector<16x8xf32>
    %c1_21 = arith.constant 1 : index
    %c0_22 = arith.constant 0 : index
    %c0_23 = arith.constant 0 : index
    %c0_24 = arith.constant 0 : index
    %31 = vector.load %arg5[%c1_21, %c0_22, %c0_23, %c0_24] : memref<3x3x16x16xf32, #tpu.memory_space<vmem>>, vector<1x3x16x16xf32>
    %32 = vector.shape_cast %31 : vector<1x3x16x16xf32> to vector<3x16x16xf32>
    %c1_25 = arith.constant 1 : index
    %c0_26 = arith.constant 0 : index
    %c0_27 = arith.constant 0 : index
    %33 = vector.load %arg6[%c1_25, %c0_26, %c0_27] : memref<3x16x1xf32, #tpu.memory_space<vmem>>, vector<1x16x1xf32>
    %34 = vector.shape_cast %33 : vector<1x16x1xf32> to vector<16x1xf32>
    %c0_28 = arith.constant 0 : index
    %c0_29 = arith.constant 0 : index
    %c0_30 = arith.constant 0 : index
    %35 = vector.load %arg9[%c0_28, %c0_29, %c0_30] : memref<3x8x8xf32, #tpu.memory_space<vmem>>, vector<1x8x8xf32>
    %36 = vector.shape_cast %35 : vector<1x8x8xf32> to vector<8x8xf32>
    %cst_31 = arith.constant dense<0.000000e+00> : vector<16x8xf32>
    %37 = tpu.matmul %30, %36, %cst_31 {dimension_numbers = #tpu.dot_dimension_numbers<[1], [0], [0], [1], [0, 0, 1, 1], [], []>} : vector<16x8xf32>, vector<8x8xf32>, vector<16x8xf32> -> vector<16x8xf32>
    %38 = vector.extract_strided_slice %32 {offsets = [0, 0, 0], sizes = [1, 16, 16], strides = [1, 1, 1]} : vector<3x16x16xf32> to vector<1x16x16xf32>
    %39 = vector.shape_cast %38 : vector<1x16x16xf32> to vector<16x16xf32>
    %cst_32 = arith.constant dense<0.000000e+00> : vector<16x8xf32>
    %40 = tpu.matmul %39, %37, %cst_32 {dimension_numbers = #tpu.dot_dimension_numbers<[1], [0], [0], [1], [0, 0, 1, 1], [], []>} : vector<16x16xf32>, vector<16x8xf32>, vector<16x8xf32> -> vector<16x8xf32>
    %41 = vector.broadcast %34 : vector<16x1xf32> to vector<16x8xf32>
    %42 = arith.addf %41, %40 : vector<16x8xf32>
    %c1_33 = arith.constant 1 : index
    %c0_34 = arith.constant 0 : index
    %c0_35 = arith.constant 0 : index
    %43 = vector.load %arg9[%c1_33, %c0_34, %c0_35] : memref<3x8x8xf32, #tpu.memory_space<vmem>>, vector<1x8x8xf32>
    %44 = vector.shape_cast %43 : vector<1x8x8xf32> to vector<8x8xf32>
    %cst_36 = arith.constant dense<0.000000e+00> : vector<16x8xf32>
    %45 = tpu.matmul %30, %44, %cst_36 {dimension_numbers = #tpu.dot_dimension_numbers<[1], [0], [0], [1], [0, 0, 1, 1], [], []>} : vector<16x8xf32>, vector<8x8xf32>, vector<16x8xf32> -> vector<16x8xf32>
    %46 = vector.extract_strided_slice %32 {offsets = [1, 0, 0], sizes = [1, 16, 16], strides = [1, 1, 1]} : vector<3x16x16xf32> to vector<1x16x16xf32>
    %47 = vector.shape_cast %46 : vector<1x16x16xf32> to vector<16x16xf32>
    %cst_37 = arith.constant dense<0.000000e+00> : vector<16x8xf32>
    %48 = tpu.matmul %47, %45, %cst_37 {dimension_numbers = #tpu.dot_dimension_numbers<[1], [0], [0], [1], [0, 0, 1, 1], [], []>} : vector<16x16xf32>, vector<16x8xf32>, vector<16x8xf32> -> vector<16x8xf32>
    %49 = arith.addf %42, %48 : vector<16x8xf32>
    %c2_38 = arith.constant 2 : index
    %c0_39 = arith.constant 0 : index
    %c0_40 = arith.constant 0 : index
    %50 = vector.load %arg9[%c2_38, %c0_39, %c0_40] : memref<3x8x8xf32, #tpu.memory_space<vmem>>, vector<1x8x8xf32>
    %51 = vector.shape_cast %50 : vector<1x8x8xf32> to vector<8x8xf32>
    %cst_41 = arith.constant dense<0.000000e+00> : vector<16x8xf32>
    %52 = tpu.matmul %30, %51, %cst_41 {dimension_numbers = #tpu.dot_dimension_numbers<[1], [0], [0], [1], [0, 0, 1, 1], [], []>} : vector<16x8xf32>, vector<8x8xf32>, vector<16x8xf32> -> vector<16x8xf32>
    %53 = vector.extract_strided_slice %32 {offsets = [2, 0, 0], sizes = [1, 16, 16], strides = [1, 1, 1]} : vector<3x16x16xf32> to vector<1x16x16xf32>
    %54 = vector.shape_cast %53 : vector<1x16x16xf32> to vector<16x16xf32>
    %cst_42 = arith.constant dense<0.000000e+00> : vector<16x8xf32>
    %55 = tpu.matmul %54, %52, %cst_42 {dimension_numbers = #tpu.dot_dimension_numbers<[1], [0], [0], [1], [0, 0, 1, 1], [], []>} : vector<16x16xf32>, vector<16x8xf32>, vector<16x8xf32> -> vector<16x8xf32>
    %56 = arith.addf %49, %55 : vector<16x8xf32>
    %57 = math.tanh %56 : vector<16x8xf32>
    %c2_43 = arith.constant 2 : index
    %c0_44 = arith.constant 0 : index
    %c0_45 = arith.constant 0 : index
    %c0_46 = arith.constant 0 : index
    %58 = vector.load %arg5[%c2_43, %c0_44, %c0_45, %c0_46] : memref<3x3x16x16xf32, #tpu.memory_space<vmem>>, vector<1x3x16x16xf32>
    %59 = vector.shape_cast %58 : vector<1x3x16x16xf32> to vector<3x16x16xf32>
    %c2_47 = arith.constant 2 : index
    %c0_48 = arith.constant 0 : index
    %c0_49 = arith.constant 0 : index
    %60 = vector.load %arg6[%c2_47, %c0_48, %c0_49] : memref<3x16x1xf32, #tpu.memory_space<vmem>>, vector<1x16x1xf32>
    %61 = vector.shape_cast %60 : vector<1x16x1xf32> to vector<16x1xf32>
    %c0_50 = arith.constant 0 : index
    %c0_51 = arith.constant 0 : index
    %c0_52 = arith.constant 0 : index
    %62 = vector.load %arg9[%c0_50, %c0_51, %c0_52] : memref<3x8x8xf32, #tpu.memory_space<vmem>>, vector<1x8x8xf32>
    %63 = vector.shape_cast %62 : vector<1x8x8xf32> to vector<8x8xf32>
    %cst_53 = arith.constant dense<0.000000e+00> : vector<16x8xf32>
    %64 = tpu.matmul %57, %63, %cst_53 {dimension_numbers = #tpu.dot_dimension_numbers<[1], [0], [0], [1], [0, 0, 1, 1], [], []>} : vector<16x8xf32>, vector<8x8xf32>, vector<16x8xf32> -> vector<16x8xf32>
    %65 = vector.extract_strided_slice %59 {offsets = [0, 0, 0], sizes = [1, 16, 16], strides = [1, 1, 1]} : vector<3x16x16xf32> to vector<1x16x16xf32>
    %66 = vector.shape_cast %65 : vector<1x16x16xf32> to vector<16x16xf32>
    %cst_54 = arith.constant dense<0.000000e+00> : vector<16x8xf32>
    %67 = tpu.matmul %66, %64, %cst_54 {dimension_numbers = #tpu.dot_dimension_numbers<[1], [0], [0], [1], [0, 0, 1, 1], [], []>} : vector<16x16xf32>, vector<16x8xf32>, vector<16x8xf32> -> vector<16x8xf32>
    %68 = vector.broadcast %61 : vector<16x1xf32> to vector<16x8xf32>
    %69 = arith.addf %68, %67 : vector<16x8xf32>
    %c1_55 = arith.constant 1 : index
    %c0_56 = arith.constant 0 : index
    %c0_57 = arith.constant 0 : index
    %70 = vector.load %arg9[%c1_55, %c0_56, %c0_57] : memref<3x8x8xf32, #tpu.memory_space<vmem>>, vector<1x8x8xf32>
    %71 = vector.shape_cast %70 : vector<1x8x8xf32> to vector<8x8xf32>
    %cst_58 = arith.constant dense<0.000000e+00> : vector<16x8xf32>
    %72 = tpu.matmul %57, %71, %cst_58 {dimension_numbers = #tpu.dot_dimension_numbers<[1], [0], [0], [1], [0, 0, 1, 1], [], []>} : vector<16x8xf32>, vector<8x8xf32>, vector<16x8xf32> -> vector<16x8xf32>
    %73 = vector.extract_strided_slice %59 {offsets = [1, 0, 0], sizes = [1, 16, 16], strides = [1, 1, 1]} : vector<3x16x16xf32> to vector<1x16x16xf32>
    %74 = vector.shape_cast %73 : vector<1x16x16xf32> to vector<16x16xf32>
    %cst_59 = arith.constant dense<0.000000e+00> : vector<16x8xf32>
    %75 = tpu.matmul %74, %72, %cst_59 {dimension_numbers = #tpu.dot_dimension_numbers<[1], [0], [0], [1], [0, 0, 1, 1], [], []>} : vector<16x16xf32>, vector<16x8xf32>, vector<16x8xf32> -> vector<16x8xf32>
    %76 = arith.addf %69, %75 : vector<16x8xf32>
    %c2_60 = arith.constant 2 : index
    %c0_61 = arith.constant 0 : index
    %c0_62 = arith.constant 0 : index
    %77 = vector.load %arg9[%c2_60, %c0_61, %c0_62] : memref<3x8x8xf32, #tpu.memory_space<vmem>>, vector<1x8x8xf32>
    %78 = vector.shape_cast %77 : vector<1x8x8xf32> to vector<8x8xf32>
    %cst_63 = arith.constant dense<0.000000e+00> : vector<16x8xf32>
    %79 = tpu.matmul %57, %78, %cst_63 {dimension_numbers = #tpu.dot_dimension_numbers<[1], [0], [0], [1], [0, 0, 1, 1], [], []>} : vector<16x8xf32>, vector<8x8xf32>, vector<16x8xf32> -> vector<16x8xf32>
    %80 = vector.extract_strided_slice %59 {offsets = [2, 0, 0], sizes = [1, 16, 16], strides = [1, 1, 1]} : vector<3x16x16xf32> to vector<1x16x16xf32>
    %81 = vector.shape_cast %80 : vector<1x16x16xf32> to vector<16x16xf32>
    %cst_64 = arith.constant dense<0.000000e+00> : vector<16x8xf32>
    %82 = tpu.matmul %81, %79, %cst_64 {dimension_numbers = #tpu.dot_dimension_numbers<[1], [0], [0], [1], [0, 0, 1, 1], [], []>} : vector<16x16xf32>, vector<16x8xf32>, vector<16x8xf32> -> vector<16x8xf32>
    %83 = arith.addf %76, %82 : vector<16x8xf32>
    %c0_65 = arith.constant 0 : index
    %c0_66 = arith.constant 0 : index
    %c0_67 = arith.constant 0 : index
    %c0_68 = arith.constant 0 : index
    %84 = vector.load %arg7[%c0_65, %c0_66, %c0_67, %c0_68] : memref<3x3x16x16xf32, #tpu.memory_space<vmem>>, vector<1x3x16x16xf32>
    %85 = vector.shape_cast %84 : vector<1x3x16x16xf32> to vector<3x16x16xf32>
    %c0_69 = arith.constant 0 : index
    %c0_70 = arith.constant 0 : index
    %c0_71 = arith.constant 0 : index
    %86 = vector.load %arg8[%c0_69, %c0_70, %c0_71] : memref<3x16x1xf32, #tpu.memory_space<vmem>>, vector<1x16x1xf32>
    %87 = vector.shape_cast %86 : vector<1x16x1xf32> to vector<16x1xf32>
    %c0_72 = arith.constant 0 : index
    %c0_73 = arith.constant 0 : index
    %c0_74 = arith.constant 0 : index
    %88 = vector.load %arg9[%c0_72, %c0_73, %c0_74] : memref<3x8x8xf32, #tpu.memory_space<vmem>>, vector<1x8x8xf32>
    %89 = vector.shape_cast %88 : vector<1x8x8xf32> to vector<8x8xf32>
    %cst_75 = arith.constant dense<0.000000e+00> : vector<16x8xf32>
    %90 = tpu.matmul %3, %89, %cst_75 {dimension_numbers = #tpu.dot_dimension_numbers<[1], [0], [0], [1], [0, 0, 1, 1], [], []>} : vector<16x8xf32>, vector<8x8xf32>, vector<16x8xf32> -> vector<16x8xf32>
    %91 = vector.extract_strided_slice %85 {offsets = [0, 0, 0], sizes = [1, 16, 16], strides = [1, 1, 1]} : vector<3x16x16xf32> to vector<1x16x16xf32>
    %92 = vector.shape_cast %91 : vector<1x16x16xf32> to vector<16x16xf32>
    %cst_76 = arith.constant dense<0.000000e+00> : vector<16x8xf32>
    %93 = tpu.matmul %92, %90, %cst_76 {dimension_numbers = #tpu.dot_dimension_numbers<[1], [0], [0], [1], [0, 0, 1, 1], [], []>} : vector<16x16xf32>, vector<16x8xf32>, vector<16x8xf32> -> vector<16x8xf32>
    %94 = vector.broadcast %87 : vector<16x1xf32> to vector<16x8xf32>
    %95 = arith.addf %94, %93 : vector<16x8xf32>
    %c1_77 = arith.constant 1 : index
    %c0_78 = arith.constant 0 : index
    %c0_79 = arith.constant 0 : index
    %96 = vector.load %arg9[%c1_77, %c0_78, %c0_79] : memref<3x8x8xf32, #tpu.memory_space<vmem>>, vector<1x8x8xf32>
    %97 = vector.shape_cast %96 : vector<1x8x8xf32> to vector<8x8xf32>
    %cst_80 = arith.constant dense<0.000000e+00> : vector<16x8xf32>
    %98 = tpu.matmul %3, %97, %cst_80 {dimension_numbers = #tpu.dot_dimension_numbers<[1], [0], [0], [1], [0, 0, 1, 1], [], []>} : vector<16x8xf32>, vector<8x8xf32>, vector<16x8xf32> -> vector<16x8xf32>
    %99 = vector.extract_strided_slice %85 {offsets = [1, 0, 0], sizes = [1, 16, 16], strides = [1, 1, 1]} : vector<3x16x16xf32> to vector<1x16x16xf32>
    %100 = vector.shape_cast %99 : vector<1x16x16xf32> to vector<16x16xf32>
    %cst_81 = arith.constant dense<0.000000e+00> : vector<16x8xf32>
    %101 = tpu.matmul %100, %98, %cst_81 {dimension_numbers = #tpu.dot_dimension_numbers<[1], [0], [0], [1], [0, 0, 1, 1], [], []>} : vector<16x16xf32>, vector<16x8xf32>, vector<16x8xf32> -> vector<16x8xf32>
    %102 = arith.addf %95, %101 : vector<16x8xf32>
    %c2_82 = arith.constant 2 : index
    %c0_83 = arith.constant 0 : index
    %c0_84 = arith.constant 0 : index
    %103 = vector.load %arg9[%c2_82, %c0_83, %c0_84] : memref<3x8x8xf32, #tpu.memory_space<vmem>>, vector<1x8x8xf32>
    %104 = vector.shape_cast %103 : vector<1x8x8xf32> to vector<8x8xf32>
    %cst_85 = arith.constant dense<0.000000e+00> : vector<16x8xf32>
    %105 = tpu.matmul %3, %104, %cst_85 {dimension_numbers = #tpu.dot_dimension_numbers<[1], [0], [0], [1], [0, 0, 1, 1], [], []>} : vector<16x8xf32>, vector<8x8xf32>, vector<16x8xf32> -> vector<16x8xf32>
    %106 = vector.extract_strided_slice %85 {offsets = [2, 0, 0], sizes = [1, 16, 16], strides = [1, 1, 1]} : vector<3x16x16xf32> to vector<1x16x16xf32>
    %107 = vector.shape_cast %106 : vector<1x16x16xf32> to vector<16x16xf32>
    %cst_86 = arith.constant dense<0.000000e+00> : vector<16x8xf32>
    %108 = tpu.matmul %107, %105, %cst_86 {dimension_numbers = #tpu.dot_dimension_numbers<[1], [0], [0], [1], [0, 0, 1, 1], [], []>} : vector<16x16xf32>, vector<16x8xf32>, vector<16x8xf32> -> vector<16x8xf32>
    %109 = arith.addf %102, %108 : vector<16x8xf32>
    %110 = math.tanh %109 : vector<16x8xf32>
    %c1_87 = arith.constant 1 : index
    %c0_88 = arith.constant 0 : index
    %c0_89 = arith.constant 0 : index
    %c0_90 = arith.constant 0 : index
    %111 = vector.load %arg7[%c1_87, %c0_88, %c0_89, %c0_90] : memref<3x3x16x16xf32, #tpu.memory_space<vmem>>, vector<1x3x16x16xf32>
    %112 = vector.shape_cast %111 : vector<1x3x16x16xf32> to vector<3x16x16xf32>
    %c1_91 = arith.constant 1 : index
    %c0_92 = arith.constant 0 : index
    %c0_93 = arith.constant 0 : index
    %113 = vector.load %arg8[%c1_91, %c0_92, %c0_93] : memref<3x16x1xf32, #tpu.memory_space<vmem>>, vector<1x16x1xf32>
    %114 = vector.shape_cast %113 : vector<1x16x1xf32> to vector<16x1xf32>
    %c0_94 = arith.constant 0 : index
    %c0_95 = arith.constant 0 : index
    %c0_96 = arith.constant 0 : index
    %115 = vector.load %arg9[%c0_94, %c0_95, %c0_96] : memref<3x8x8xf32, #tpu.memory_space<vmem>>, vector<1x8x8xf32>
    %116 = vector.shape_cast %115 : vector<1x8x8xf32> to vector<8x8xf32>
    %cst_97 = arith.constant dense<0.000000e+00> : vector<16x8xf32>
    %117 = tpu.matmul %110, %116, %cst_97 {dimension_numbers = #tpu.dot_dimension_numbers<[1], [0], [0], [1], [0, 0, 1, 1], [], []>} : vector<16x8xf32>, vector<8x8xf32>, vector<16x8xf32> -> vector<16x8xf32>
    %118 = vector.extract_strided_slice %112 {offsets = [0, 0, 0], sizes = [1, 16, 16], strides = [1, 1, 1]} : vector<3x16x16xf32> to vector<1x16x16xf32>
    %119 = vector.shape_cast %118 : vector<1x16x16xf32> to vector<16x16xf32>
    %cst_98 = arith.constant dense<0.000000e+00> : vector<16x8xf32>
    %120 = tpu.matmul %119, %117, %cst_98 {dimension_numbers = #tpu.dot_dimension_numbers<[1], [0], [0], [1], [0, 0, 1, 1], [], []>} : vector<16x16xf32>, vector<16x8xf32>, vector<16x8xf32> -> vector<16x8xf32>
    %121 = vector.broadcast %114 : vector<16x1xf32> to vector<16x8xf32>
    %122 = arith.addf %121, %120 : vector<16x8xf32>
    %c1_99 = arith.constant 1 : index
    %c0_100 = arith.constant 0 : index
    %c0_101 = arith.constant 0 : index
    %123 = vector.load %arg9[%c1_99, %c0_100, %c0_101] : memref<3x8x8xf32, #tpu.memory_space<vmem>>, vector<1x8x8xf32>
    %124 = vector.shape_cast %123 : vector<1x8x8xf32> to vector<8x8xf32>
    %cst_102 = arith.constant dense<0.000000e+00> : vector<16x8xf32>
    %125 = tpu.matmul %110, %124, %cst_102 {dimension_numbers = #tpu.dot_dimension_numbers<[1], [0], [0], [1], [0, 0, 1, 1], [], []>} : vector<16x8xf32>, vector<8x8xf32>, vector<16x8xf32> -> vector<16x8xf32>
    %126 = vector.extract_strided_slice %112 {offsets = [1, 0, 0], sizes = [1, 16, 16], strides = [1, 1, 1]} : vector<3x16x16xf32> to vector<1x16x16xf32>
    %127 = vector.shape_cast %126 : vector<1x16x16xf32> to vector<16x16xf32>
    %cst_103 = arith.constant dense<0.000000e+00> : vector<16x8xf32>
    %128 = tpu.matmul %127, %125, %cst_103 {dimension_numbers = #tpu.dot_dimension_numbers<[1], [0], [0], [1], [0, 0, 1, 1], [], []>} : vector<16x16xf32>, vector<16x8xf32>, vector<16x8xf32> -> vector<16x8xf32>
    %129 = arith.addf %122, %128 : vector<16x8xf32>
    %c2_104 = arith.constant 2 : index
    %c0_105 = arith.constant 0 : index
    %c0_106 = arith.constant 0 : index
    %130 = vector.load %arg9[%c2_104, %c0_105, %c0_106] : memref<3x8x8xf32, #tpu.memory_space<vmem>>, vector<1x8x8xf32>
    %131 = vector.shape_cast %130 : vector<1x8x8xf32> to vector<8x8xf32>
    %cst_107 = arith.constant dense<0.000000e+00> : vector<16x8xf32>
    %132 = tpu.matmul %110, %131, %cst_107 {dimension_numbers = #tpu.dot_dimension_numbers<[1], [0], [0], [1], [0, 0, 1, 1], [], []>} : vector<16x8xf32>, vector<8x8xf32>, vector<16x8xf32> -> vector<16x8xf32>
    %133 = vector.extract_strided_slice %112 {offsets = [2, 0, 0], sizes = [1, 16, 16], strides = [1, 1, 1]} : vector<3x16x16xf32> to vector<1x16x16xf32>
    %134 = vector.shape_cast %133 : vector<1x16x16xf32> to vector<16x16xf32>
    %cst_108 = arith.constant dense<0.000000e+00> : vector<16x8xf32>
    %135 = tpu.matmul %134, %132, %cst_108 {dimension_numbers = #tpu.dot_dimension_numbers<[1], [0], [0], [1], [0, 0, 1, 1], [], []>} : vector<16x16xf32>, vector<16x8xf32>, vector<16x8xf32> -> vector<16x8xf32>
    %136 = arith.addf %129, %135 : vector<16x8xf32>
    %137 = math.tanh %136 : vector<16x8xf32>
    %c2_109 = arith.constant 2 : index
    %c0_110 = arith.constant 0 : index
    %c0_111 = arith.constant 0 : index
    %c0_112 = arith.constant 0 : index
    %138 = vector.load %arg7[%c2_109, %c0_110, %c0_111, %c0_112] : memref<3x3x16x16xf32, #tpu.memory_space<vmem>>, vector<1x3x16x16xf32>
    %139 = vector.shape_cast %138 : vector<1x3x16x16xf32> to vector<3x16x16xf32>
    %c2_113 = arith.constant 2 : index
    %c0_114 = arith.constant 0 : index
    %c0_115 = arith.constant 0 : index
    %140 = vector.load %arg8[%c2_113, %c0_114, %c0_115] : memref<3x16x1xf32, #tpu.memory_space<vmem>>, vector<1x16x1xf32>
    %141 = vector.shape_cast %140 : vector<1x16x1xf32> to vector<16x1xf32>
    %c0_116 = arith.constant 0 : index
    %c0_117 = arith.constant 0 : index
    %c0_118 = arith.constant 0 : index
    %142 = vector.load %arg9[%c0_116, %c0_117, %c0_118] : memref<3x8x8xf32, #tpu.memory_space<vmem>>, vector<1x8x8xf32>
    %143 = vector.shape_cast %142 : vector<1x8x8xf32> to vector<8x8xf32>
    %cst_119 = arith.constant dense<0.000000e+00> : vector<16x8xf32>
    %144 = tpu.matmul %137, %143, %cst_119 {dimension_numbers = #tpu.dot_dimension_numbers<[1], [0], [0], [1], [0, 0, 1, 1], [], []>} : vector<16x8xf32>, vector<8x8xf32>, vector<16x8xf32> -> vector<16x8xf32>
    %145 = vector.extract_strided_slice %139 {offsets = [0, 0, 0], sizes = [1, 16, 16], strides = [1, 1, 1]} : vector<3x16x16xf32> to vector<1x16x16xf32>
    %146 = vector.shape_cast %145 : vector<1x16x16xf32> to vector<16x16xf32>
    %cst_120 = arith.constant dense<0.000000e+00> : vector<16x8xf32>
    %147 = tpu.matmul %146, %144, %cst_120 {dimension_numbers = #tpu.dot_dimension_numbers<[1], [0], [0], [1], [0, 0, 1, 1], [], []>} : vector<16x16xf32>, vector<16x8xf32>, vector<16x8xf32> -> vector<16x8xf32>
    %148 = vector.broadcast %141 : vector<16x1xf32> to vector<16x8xf32>
    %149 = arith.addf %148, %147 : vector<16x8xf32>
    %c1_121 = arith.constant 1 : index
    %c0_122 = arith.constant 0 : index
    %c0_123 = arith.constant 0 : index
    %150 = vector.load %arg9[%c1_121, %c0_122, %c0_123] : memref<3x8x8xf32, #tpu.memory_space<vmem>>, vector<1x8x8xf32>
    %151 = vector.shape_cast %150 : vector<1x8x8xf32> to vector<8x8xf32>
    %cst_124 = arith.constant dense<0.000000e+00> : vector<16x8xf32>
    %152 = tpu.matmul %137, %151, %cst_124 {dimension_numbers = #tpu.dot_dimension_numbers<[1], [0], [0], [1], [0, 0, 1, 1], [], []>} : vector<16x8xf32>, vector<8x8xf32>, vector<16x8xf32> -> vector<16x8xf32>
    %153 = vector.extract_strided_slice %139 {offsets = [1, 0, 0], sizes = [1, 16, 16], strides = [1, 1, 1]} : vector<3x16x16xf32> to vector<1x16x16xf32>
    %154 = vector.shape_cast %153 : vector<1x16x16xf32> to vector<16x16xf32>
    %cst_125 = arith.constant dense<0.000000e+00> : vector<16x8xf32>
    %155 = tpu.matmul %154, %152, %cst_125 {dimension_numbers = #tpu.dot_dimension_numbers<[1], [0], [0], [1], [0, 0, 1, 1], [], []>} : vector<16x16xf32>, vector<16x8xf32>, vector<16x8xf32> -> vector<16x8xf32>
    %156 = arith.addf %149, %155 : vector<16x8xf32>
    %c2_126 = arith.constant 2 : index
    %c0_127 = arith.constant 0 : index
    %c0_128 = arith.constant 0 : index
    %157 = vector.load %arg9[%c2_126, %c0_127, %c0_128] : memref<3x8x8xf32, #tpu.memory_space<vmem>>, vector<1x8x8xf32>
    %158 = vector.shape_cast %157 : vector<1x8x8xf32> to vector<8x8xf32>
    %cst_129 = arith.constant dense<0.000000e+00> : vector<16x8xf32>
    %159 = tpu.matmul %137, %158, %cst_129 {dimension_numbers = #tpu.dot_dimension_numbers<[1], [0], [0], [1], [0, 0, 1, 1], [], []>} : vector<16x8xf32>, vector<8x8xf32>, vector<16x8xf32> -> vector<16x8xf32>
    %160 = vector.extract_strided_slice %139 {offsets = [2, 0, 0], sizes = [1, 16, 16], strides = [1, 1, 1]} : vector<3x16x16xf32> to vector<1x16x16xf32>
    %161 = vector.shape_cast %160 : vector<1x16x16xf32> to vector<16x16xf32>
    %cst_130 = arith.constant dense<0.000000e+00> : vector<16x8xf32>
    %162 = tpu.matmul %161, %159, %cst_130 {dimension_numbers = #tpu.dot_dimension_numbers<[1], [0], [0], [1], [0, 0, 1, 1], [], []>} : vector<16x16xf32>, vector<16x8xf32>, vector<16x8xf32> -> vector<16x8xf32>
    %163 = arith.addf %156, %162 : vector<16x8xf32>
    %164 = math.tanh %163 : vector<16x8xf32>
    %165 = arith.index_cast %arg0 : i32 to index
    %166 = memref.load %arg1[%165] : memref<2xf32, #tpu.memory_space<smem>>
    %167 = arith.index_cast %arg0 : i32 to index
    %168 = memref.load %arg2[%167] : memref<2xf32, #tpu.memory_space<smem>>
    %169 = vector.broadcast %166 : f32 to vector<16x8xf32>
    %170 = arith.mulf %83, %169 : vector<16x8xf32>
    %171 = arith.addf %3, %170 : vector<16x8xf32>
    %c0_131 = arith.constant 0 : index
    %c0_132 = arith.constant 0 : index
    %c0_133 = arith.constant 0 : index
    %172 = vector.load %arg4[%c0_131, %c0_132, %c0_133] : memref<1x16x8xf32, #tpu.memory_space<vmem>>, vector<1x16x8xf32>
    %173 = vector.shape_cast %172 : vector<1x16x8xf32> to vector<16x8xf32>
    %174 = vector.broadcast %168 : f32 to vector<16x8xf32>
    %175 = arith.mulf %174, %173 : vector<16x8xf32>
    %176 = arith.mulf %164, %175 : vector<16x8xf32>
    %177 = arith.addf %171, %176 : vector<16x8xf32>
    %c0_134 = arith.constant 0 : index
    %c0_135 = arith.constant 0 : index
    %178 = vector.load %arg11[%c0_134, %c0_135] : memref<16x8xf32, #tpu.memory_space<vmem>>, vector<16x8xf32>
    tpu.vector_store %arg11[%c0_134, %c0_135], %177 {strides = array<i32>} : memref<16x8xf32, #tpu.memory_space<vmem>>, vector<16x8xf32>,
    %c0_136 = arith.constant 0 : index
    %c0_137 = arith.constant 0 : index
    %c0_138 = arith.constant 0 : index
    %179 = vector.load %arg10[%c0_136, %c0_137, %c0_138] : memref<1x16x8xf32, #tpu.memory_space<vmem>>, vector<1x16x8xf32>
    %180 = vector.shape_cast %179 : vector<1x16x8xf32> to vector<16x8xf32>
    %181 = vector.shape_cast %177 : vector<16x8xf32> to vector<1x16x8xf32>
    tpu.vector_store %arg10[%c0_136, %c0_137, %c0_138], %181 {strides = array<i32>} : memref<1x16x8xf32, #tpu.memory_space<vmem>>, vector<1x16x8xf32>,
    return
  }
  func.func @transform_0(%arg0: i32) -> i32 {
    %c0_i32 = arith.constant 0 : i32
    %c0_i32_0 = arith.constant 0 : i32
    return %c0_i32 : i32
  }
  func.func @transform_1(%arg0: i32) -> i32 {
    %c0_i32 = arith.constant 0 : i32
    %c0_i32_0 = arith.constant 0 : i32
    return %c0_i32 : i32
  }
  func.func @transform_2(%arg0: i32) -> (i32, i32) {
    %c0_i32 = arith.constant 0 : i32
    %c0_i32_0 = arith.constant 0 : i32
    %c0_i32_1 = arith.constant 0 : i32
    return %c0_i32, %c0_i32_0 : i32, i32
  }
  func.func @transform_3(%arg0: i32) -> (i32, i32, i32) {
    %c0_i32 = arith.constant 0 : i32
    %c0_i32_0 = arith.constant 0 : i32
    %c0_i32_1 = arith.constant 0 : i32
    return %arg0, %c0_i32, %c0_i32_0 : i32, i32, i32
  }
  func.func @transform_4(%arg0: i32) -> (i32, i32, i32, i32) {
    %c0_i32 = arith.constant 0 : i32
    %c0_i32_0 = arith.constant 0 : i32
    %c0_i32_1 = arith.constant 0 : i32
    %c0_i32_2 = arith.constant 0 : i32
    %c0_i32_3 = arith.constant 0 : i32
    return %c0_i32, %c0_i32_0, %c0_i32_1, %c0_i32_2 : i32, i32, i32, i32
  }
  func.func @transform_5(%arg0: i32) -> (i32, i32, i32) {
    %c0_i32 = arith.constant 0 : i32
    %c0_i32_0 = arith.constant 0 : i32
    %c0_i32_1 = arith.constant 0 : i32
    %c0_i32_2 = arith.constant 0 : i32
    return %c0_i32, %c0_i32_0, %c0_i32_1 : i32, i32, i32
  }
  func.func @transform_6(%arg0: i32) -> (i32, i32, i32, i32) {
    %c0_i32 = arith.constant 0 : i32
    %c0_i32_0 = arith.constant 0 : i32
    %c0_i32_1 = arith.constant 0 : i32
    %c0_i32_2 = arith.constant 0 : i32
    %c0_i32_3 = arith.constant 0 : i32
    return %c0_i32, %c0_i32_0, %c0_i32_1, %c0_i32_2 : i32, i32, i32, i32
  }
  func.func @transform_7(%arg0: i32) -> (i32, i32, i32) {
    %c0_i32 = arith.constant 0 : i32
    %c0_i32_0 = arith.constant 0 : i32
    %c0_i32_1 = arith.constant 0 : i32
    %c0_i32_2 = arith.constant 0 : i32
    return %c0_i32, %c0_i32_0, %c0_i32_1 : i32, i32, i32
  }
  func.func @transform_8(%arg0: i32) -> (i32, i32, i32) {
    %c0_i32 = arith.constant 0 : i32
    %c0_i32_0 = arith.constant 0 : i32
    %c0_i32_1 = arith.constant 0 : i32
    %c0_i32_2 = arith.constant 0 : i32
    return %c0_i32, %c0_i32_0, %c0_i32_1 : i32, i32, i32
  }
  func.func @transform_9(%arg0: i32) -> (i32, i32, i32) {
    %c0_i32 = arith.constant 0 : i32
    %c0_i32_0 = arith.constant 0 : i32
    %c0_i32_1 = arith.constant 0 : i32
    return %arg0, %c0_i32, %c0_i32_0 : i32, i32, i32
  }
}

</mosaic_0001>

<bundles_post_ra>
// kernel: forward.4
= control target key start
LH: loop header
LB: loop body
LE: loop exit
PB: predicated region body
PF: predicated region fallthrough
CT: control target
= control target key end

     0   :  { %s1921_s27 = smov 0   ;;  %s2068_s0 = inlined_call_operand.vmem [shape: f32[2,16,8], index: 0, kind: input, shape index: {}]   ;;  %s2069_s1 = inlined_call_operand.vmem [shape: f32[16,8], index: 1, kind: input, shape index: {}]   ;;  %s2070_s2 = inlined_call_operand.vmem [shape: f32[3,8,8], index: 2, kind: input, shape index: {}]   ;;  %s2071_s3 = inlined_call_operand.vmem [shape: f32[3,1,8], index: 3, kind: input, shape index: {}]   ;;  %s2072_s4 = inlined_call_operand.vmem [shape: f32[8,16], index: 4, kind: input, shape index: {}]   ;;  %s2073_s5 = inlined_call_operand.vmem [shape: f32[1,16], index: 5, kind: input, shape index: {}]   ;;  %s2074_s6 = inlined_call_operand.vmem [shape: f32[16,16], index: 6, kind: input, shape index: {}]   ;;  %s2075_s7 = inlined_call_operand.vmem [shape: f32[1,16], index: 7, kind: input, shape index: {}]   ;;  %s2076_s8 = inlined_call_operand.vmem [shape: f32[2,16,16], index: 8, kind: output, shape index: {}]  }
   0x1 LB: > { %s1593_s28 = sadd.s32 4294967295, %s1874_s27   ;;  %p1597_p0 = scmp.ge.s32.totalorder %s1874_s27, 1  ;;  %s1874_s27 = sphi %s1921_s27, %s18_s27  }
   0x2   : > { %p262_p1 = scmp.lt.s32.totalorder %s1874_s27, 3 }
   0x4   : > { %p263_p2 = pnand %p1597_p0, %p262_p1 }
   0x5   : > { %p296_p3 = scmp.lt.s32.totalorder (!%p263_p2), %s1593_s28, 1  ;;  %vm310_vm0 = vcmask (!%p263_p2), 64512   ;;  %v308_v0 = vld [vmem:[%s2069_s1] sm:$0xff] (!%p263_p2)  ;;  %v309_v5 = vld [vmem:[%s2069_s1 + $0x8] sm:$0xff] (!%p263_p2)  ;;  %vm400_vm2 = vcmask (!%p263_p2), 130048  }
   0x6   : > { %266 = sbr.rel (%p263_p2) target bundleno = 4119 (0x1017), region = 52  ;;  %1701 = vmatprep.mubr.msk.f32.mxu0 (!%p263_p2), %vm310_vm0, %v308_v0  ;;  %vm1943_vm1 = vmpackc.low (!%p263_p2), %vm310_vm0, %vm310_vm0  ;;  %v504_v22 = vld [vmem:[%s2070_s2] sm:$0xff] (!%p263_p2)  ;;  %v1617_v58 = vld [vmem:[%s2070_s2 + $0x8] sm:$0xff] (!%p263_p2) }
   0x7   : > { %v1608_v31 = vld [vmem:[%s2071_s3] ss:$0 sm:$0xff] (!%p263_p2)  ;;  %v1619_v63 = vld [vmem:[%s2071_s3 + $0x1] ss:$0 sm:$0xff] (!%p263_p2) }
   0xd   : > { %s2080_s28 = smov (!%p296_p3, %s1593_s28), 1 }
   0xe   : > { %s1647_s9 = sshll.u32 %s2080_s28, 4 }
   0xf   : > { %s300_s12 = scalar_lea.vmem %s2068_s0, %s1647_s9  ;;  %s305_s20 = scalar_lea.vmem %s2076_s8, %s1647_s9 }
  0x10   : > { %v306_v1 = vld [vmem:[%s300_s12] sm:$0xff]  ;;  %v307_v2 = vld [vmem:[%s300_s12 + $0x8] sm:$0xff] }
  0x11   : > { %v1947_v4 = vpack.c.bf16 %v307_v2, %v306_v1 }
  0x13   : > { %1782 = vmatprep.subr.msk.bf16.mxu0 %vm1943_vm1, %v1947_v4  ;;  %1787 = vmatprep.subr.bf16.mxu1 %v1947_v4 }
  0x14   : > { %1785 = vmatpush3.bf16.xpose.msk.msra.mxu0 %vm1943_vm1, %v1947_v4  ;;  %1789 = vmatpush3.bf16.msra.mxu1 %v1947_v4 }
  0x15   : > { %1792 = vmatprep.subr.msk.bf16.mxu0 %vm1943_vm1, %v1947_v4  ;;  %1711 = vmatprep.subr.mxu1 %v504_v22 }
  0x1b   : > { %1702 = vmatmul.mubr.msk.f32.vlgmr.msra.gmra.mrb[0].mxu0 %vm310_vm0, %v309_v5 }
  0x1c   : > { %1795 = vmatpush3.bf16.xpose.msk.msra.mxu0 %vm1943_vm1, %v1947_v4 }
  0x1d   : > { %1802 = vmatprep.subr.msk.bf16.mxu0 %vm1943_vm1, %v1947_v4 }
  0xee   : > { %v1703_v6 = vpop.f32.mrb[0].mxu0 }
  0xef   : > { %v389_v7 = vpop.f32.mrb[1].mxu0  ;;  %v399_v9 = vmul.f32 0.35355338, %v1703_v6 }
  0xf0   : > { %v398_v8 = vmul.f32 0.35355338, %v389_v7 }
  0xf1   : > { %v404_v11 = vsel %vm400_vm2, %v399_v9, -inf }
  0xf2   : > { %v401_v10 = vsel %vm400_vm2, %v398_v8, -inf }
  0xf3   : > { %402 = vmax.xlane.f32.xlu0 %v401_v10 }
  0xf7   : > { %405 = vmax.xlane.f32.xlu0 %v404_v11 }
 0x180   : > { %v403_v12 = vpop.xlane.xlu0 %402 }
 0x181   : > { %v407_v13 = vsub.f32 %v398_v8, %v403_v12 }
 0x183   : > { %v409_v14 = vmul.f32 1.442695, %v407_v13 }
 0x184   : > { %v406_v15 = vpop.xlane.xlu0 %405 }
 0x185   : > { %1832 = vpow2.f32 %v409_v14  ;;  %v408_v16 = vsub.f32 %v399_v9, %v406_v15 }
 0x187   : > { %v411_v17 = vmul.f32 1.442695, %v408_v16 }
 0x189   : > { %1834 = vpow2.f32 %v411_v17 }
 0x18f   : > { %v1833_v18 = vpop.eup %1832 }
 0x190   : > { %v413_v19 = vsel %vm400_vm2, %v1833_v18, 0.0 }
 0x191   : > { %414 = vadd.xlane.f32.xlu1 %v413_v19 }
 0x193   : > { %v1835_v20 = vpop.eup %1834 }
 0x194   : > { %v416_v21 = vsel %vm400_vm2, %v1835_v20, 0.0 }
 0x195   : > { %417 = vadd.xlane.f32.xlu1 %v416_v21 }
 0x21e   : > { %v415_v23 = vpop.xlane.xlu1 %414 }
 0x21f   : > { %1836 = vrcp.f32 %v415_v23 }
 0x222   : > { %v418_v24 = vpop.xlane.xlu1 %417 }
 0x223   : > { %1838 = vrcp.f32 %v418_v24 }
 0x229   : > { %v1837_v25 = vpop.eup %1836 }
 0x22a   : > { %v421_v26 = vmul.f32 %v1837_v25, %v1833_v18 }
 0x22c   : > { %1708 = vmatprep.mubr.msk.f32.mxu1 %vm400_vm2, %v421_v26 }
 0x22d   : > { %v1839_v27 = vpop.eup %1838 }
 0x22e   : > { %v422_v28 = vmul.f32 %v1839_v27, %v1835_v20  ;;  %v1628_v27 = vld [vmem:[%s2070_s2 + $0x10] sm:$0xff] }
 0x230   : > { %1709 = vmatmul.mubr.msk.f32.vlgmr.msra.gmra.mrb[0].mxu1 %vm400_vm2, %v422_v28 }
 0x231   : > { %1712 = vmatpush3.msra.mxu1 %v504_v22 }
 0x232   : > { %1797 = vmatprep.subr.bf16.mxu1 %v1947_v4 }
 0x303   : > { %v1710_v29 = vpop.f32.mrb[0].mxu1 }
 0x304   : > { %v495_v30 = vpop.f32.mrb[1].mxu1 }
 0x305   : > { %1713 = vmatprep.mubr.msk.f32.mxu1 %vm310_vm0, %v495_v30 }
 0x306   : > { %1714 = vmatmul.mubr.msk.f32.vlgmr.msra.gmra.mrb[2].mxu1 %vm310_vm0, %v1710_v29 }
 0x307   : > { %1799 = vmatpush3.bf16.msra.mxu1 %v1947_v4 }
 0x308   : > { %1730 = vmatprep.subr.mxu1 %v1617_v58 }
 0x3d9   : > { %v1715_v32 = vpop.f32.mrb[2].mxu1 }
 0x3da   : > { %v584_v33 = vpop.f32.mrb[3].mxu1  ;;  %v590_v35 = vadd.f32 %v1715_v32, %v1608_v31  ;;  %v1630_v32 = vld [vmem:[%s2071_s3 + $0x2] ss:$0 sm:$0xff] }
 0x3db   : > { %v585_v34 = vadd.f32 %v1608_v31, %v584_v33 }
 0x3dd   : > { %1720 = vmatprep.mubr.msk.f32.mxu0 %vm310_vm0, %v585_v34 }
 0x3de   : > { %1721 = vmatmul.mubr.msk.f32.vlgmr.msra.gmra.mrb[2].mxu0 %vm310_vm0, %v590_v35 }
 0x3df   : > { %1805 = vmatpush3.bf16.xpose.msk.msra.mxu0 %vm1943_vm1, %v1947_v4 }
 0x3e0   : > { %1812 = vmatprep.subr.msk.bf16.mxu0 %vm1943_vm1, %v1947_v4 }
 0x4b1   : > { %v1722_v36 = vpop.f32.mrb[2].mxu0 }
 0x4b2   : > { %v675_v37 = vmul.f32 0.35355338, %v1722_v36  ;;  %v665_v38 = vpop.f32.mrb[3].mxu0 }
 0x4b3   : > { %v674_v39 = vmul.f32 0.35355338, %v665_v38 }
 0x4b4   : > { %v679_v40 = vsel %vm400_vm2, %v675_v37, -inf }
 0x4b5   : > { %680 = vmax.xlane.f32.xlu1 %v679_v40  ;;  %v676_v41 = vsel %vm400_vm2, %v674_v39, -inf }
 0x4b6   : > { %677 = vmax.xlane.f32.xlu0 %v676_v41 }
 0x542   : > { %v681_v42 = vpop.xlane.xlu1 %680 }
 0x543   : > { %v683_v43 = vsub.f32 %v675_v37, %v681_v42  ;;  %v678_v44 = vpop.xlane.xlu0 %677 }
 0x544   : > { %v682_v45 = vsub.f32 %v674_v39, %v678_v44 }
 0x545   : > { %v686_v46 = vmul.f32 1.442695, %v683_v43 }
 0x546   : > { %v684_v47 = vmul.f32 1.442695, %v682_v45 }
 0x547   : > { %1840 = vpow2.f32 %v686_v46 }
 0x548   : > { %1842 = vpow2.f32 %v684_v47 }
 0x551   : > { %v1841_v48 = vpop.eup %1840 }
 0x552   : > { %v1843_v49 = vpop.eup %1842  ;;  %v691_v50 = vsel %vm400_vm2, %v1841_v48, 0.0 }
 0x553   : > { %692 = vadd.xlane.f32.xlu1 %v691_v50  ;;  %v688_v51 = vsel %vm400_vm2, %v1843_v49, 0.0 }
 0x554   : > { %689 = vadd.xlane.f32.xlu0 %v688_v51 }
 0x5e0   : > { %v693_v52 = vpop.xlane.xlu1 %692 }
 0x5e1   : > { %1844 = vrcp.f32 %v693_v52  ;;  %v690_v53 = vpop.xlane.xlu0 %689 }
 0x5e2   : > { %1846 = vrcp.f32 %v690_v53 }
 0x5eb   : > { %v1845_v54 = vpop.eup %1844 }
 0x5ec   : > { %v1847_v55 = vpop.eup %1846  ;;  %v697_v57 = vmul.f32 %v1845_v54, %v1841_v48 }
 0x5ed   : > { %v696_v56 = vmul.f32 %v1847_v55, %v1843_v49 }
 0x5ef   : > { %1727 = vmatprep.mubr.msk.f32.mxu1 %vm400_vm2, %v696_v56 }
 0x5f0   : > { %1728 = vmatmul.mubr.msk.f32.vlgmr.msra.gmra.mrb[4].mxu1 %vm400_vm2, %v697_v57 }
 0x5f1   : > { %1731 = vmatpush3.msra.mxu1 %v1617_v58  ;;  %v1339_v58 = vld [vmem:[%s2072_s4] sm:$0xff] }
 0x5f2   : > { %1807 = vmatprep.subr.bf16.mxu1 %v1947_v4 }
 0x6c3   : > { %v1729_v59 = vpop.f32.mrb[4].mxu1 }
 0x6c4   : > { %v780_v60 = vadd.f32 %v1729_v59, %v1710_v29  ;;  %v770_v61 = vpop.f32.mrb[5].mxu1 }
 0x6c5   : > { %v779_v62 = vadd.f32 %v770_v61, %v495_v30 }
 0x6c7   : > { %1732 = vmatprep.mubr.msk.f32.mxu1 %vm310_vm0, %v779_v62 }
 0x6c8   : > { %1733 = vmatmul.mubr.msk.f32.vlgmr.msra.gmra.mrb[6].mxu1 %vm310_vm0, %v780_v60 }
 0x6c9   : > { %1809 = vmatpush3.bf16.msra.mxu1 %v1947_v4 }
 0x6ca   : > { %1749 = vmatprep.subr.mxu1 %v1628_v27 }
 0x79b   : > { %v1734_v0 = vpop.f32.mrb[6].mxu1 }
 0x79c   : > { %v863_v1 = vpop.f32.mrb[7].mxu1  ;;  %v869_v5 = vadd.f32 %v1734_v0, %v1619_v63  ;;  %v1447_v0 = vld [vmem:[%s2074_s6 + $0x8] sm:$0xff] }
 0x79d   : > { %v864_v2 = vadd.f32 %v1619_v63, %v863_v1  ;;  %v1446_v63 = vld [vmem:[%s2074_s6] sm:$0xff] }
 0x79e   : > { %v1820_v1 = vpack.c.bf16 %v1447_v0, %v1446_v63 }
 0x79f   : > { %1739 = vmatprep.mubr.msk.f32.mxu0 %vm310_vm0, %v864_v2  ;;  %v1639_v2 = vld [vmem:[%s2073_s5] ss:$0 sm:$0xff] }
 0x7a0   : > { %1740 = vmatmul.mubr.msk.f32.vlgmr.msra.gmra.mrb[4].mxu0 %vm310_vm0, %v869_v5 }
 0x7a1   : > { %1815 = vmatpush3.bf16.xpose.msk.msra.mxu0 %vm1943_vm1, %v1947_v4 }
 0x7a2   : > { %1821 = vmatprep.subr.bf16.mxu0 %v1820_v1 }
 0x873   : > { %v1741_v6 = vpop.f32.mrb[4].mxu0 }
 0x874   : > { %v954_v7 = vmul.f32 0.35355338, %v1741_v6  ;;  %v944_v8 = vpop.f32.mrb[5].mxu0 }
 0x875   : > { %v953_v9 = vmul.f32 0.35355338, %v944_v8 }
 0x876   : > { %v958_v10 = vsel %vm400_vm2, %v954_v7, -inf }
 0x877   : > { %959 = vmax.xlane.f32.xlu1 %v958_v10  ;;  %v955_v11 = vsel %vm400_vm2, %v953_v9, -inf }
 0x878   : > { %956 = vmax.xlane.f32.xlu0 %v955_v11 }
 0x904   : > { %v960_v12 = vpop.xlane.xlu1 %959 }
 0x905   : > { %v962_v13 = vsub.f32 %v954_v7, %v960_v12  ;;  %v957_v14 = vpop.xlane.xlu0 %956 }
 0x906   : > { %v961_v15 = vsub.f32 %v953_v9, %v957_v14 }
 0x907   : > { %v965_v16 = vmul.f32 1.442695, %v962_v13 }
 0x908   : > { %v963_v17 = vmul.f32 1.442695, %v961_v15 }
 0x909   : > { %1848 = vpow2.f32 %v965_v16 }
 0x90a   : > { %1850 = vpow2.f32 %v963_v17 }
 0x913   : > { %v1849_v3 = vpop.eup %1848 }
 0x914   : > { %v1851_v18 = vpop.eup %1850  ;;  %v970_v19 = vsel %vm400_vm2, %v1849_v3, 0.0 }
 0x915   : > { %971 = vadd.xlane.f32.xlu1 %v970_v19  ;;  %v967_v20 = vsel %vm400_vm2, %v1851_v18, 0.0 }
 0x916   : > { %968 = vadd.xlane.f32.xlu0 %v967_v20 }
 0x9a2   : > { %v972_v21 = vpop.xlane.xlu1 %971 }
 0x9a3   : > { %1852 = vrcp.f32 %v972_v21  ;;  %v969_v22 = vpop.xlane.xlu0 %968 }
 0x9a4   : > { %1854 = vrcp.f32 %v969_v22 }
 0x9ad   : > { %v1853_v23 = vpop.eup %1852 }
 0x9ae   : > { %v1855_v24 = vpop.eup %1854  ;;  %v976_v26 = vmul.f32 %v1853_v23, %v1849_v3 }
 0x9af   : > { %v975_v25 = vmul.f32 %v1855_v24, %v1851_v18 }
 0x9b1   : > { %1746 = vmatprep.mubr.msk.f32.mxu1 %vm400_vm2, %v975_v25 }
 0x9b2   : > { %1747 = vmatmul.mubr.msk.f32.vlgmr.msra.gmra.mrb[8].mxu1 %vm400_vm2, %v976_v26  ;;  %v1642_v26 = vld [vmem:[%s2075_s7] ss:$0 sm:$0xff] }
 0x9b3   : > { %1750 = vmatpush3.msra.mxu1 %v1628_v27 }
 0x9b4   : > { %1817 = vmatprep.subr.bf16.mxu1 %v1947_v4 }
 0xa85   : > { %v1748_v28 = vpop.f32.mrb[8].mxu1 }
 0xa86   : > { %v1049_v29 = vpop.f32.mrb[9].mxu1  ;;  %v1059_v31 = vadd.f32 %v1748_v28, %v780_v60 }
 0xa87   : > { %v1058_v30 = vadd.f32 %v1049_v29, %v779_v62 }
 0xa89   : > { %1751 = vmatprep.mubr.msk.f32.mxu1 %vm310_vm0, %v1058_v30 }
 0xa8a   : > { %1752 = vmatmul.mubr.msk.f32.vlgmr.msra.gmra.mrb[10].mxu1 %vm310_vm0, %v1059_v31 }
 0xa8b   : > { %1819 = vmatpush3.bf16.msra.mxu1 %v1947_v4 }
 0xa8c   : > { %1768 = vmatprep.subr.mxu1 %v1339_v58 }
 0xb5d   : > { %v1753_v33 = vpop.f32.mrb[10].mxu1 }
 0xb5e   : > { %v1142_v34 = vpop.f32.mrb[11].mxu1  ;;  %v1148_v36 = vadd.f32 %v1753_v33, %v1630_v32 }
 0xb5f   : > { %v1143_v35 = vadd.f32 %v1630_v32, %v1142_v34 }
 0xb61   : > { %1758 = vmatprep.mubr.msk.f32.mxu0 %vm310_vm0, %v1143_v35 }
 0xb62   : > { %1759 = vmatmul.mubr.msk.f32.vlgmr.msra.gmra.mrb[6].mxu0 %vm310_vm0, %v1148_v36 }
 0xb63   : > { %1823 = vmatpush3.bf16.msra.mxu0 %v1820_v1 }
 0xc35   : > { %v1760_v37 = vpop.f32.mrb[6].mxu0 }
 0xc36   : > { %v1233_v38 = vmul.f32 0.35355338, %v1760_v37  ;;  %v1223_v39 = vpop.f32.mrb[7].mxu0 }
 0xc37   : > { %v1232_v40 = vmul.f32 0.35355338, %v1223_v39 }
 0xc38   : > { %v1237_v41 = vsel %vm400_vm2, %v1233_v38, -inf }
 0xc39   : > { %1238 = vmax.xlane.f32.xlu1 %v1237_v41  ;;  %v1234_v4 = vsel %vm400_vm2, %v1232_v40, -inf }
 0xc3a   : > { %1235 = vmax.xlane.f32.xlu0 %v1234_v4 }
 0xcc6   : > { %v1239_v42 = vpop.xlane.xlu1 %1238 }
 0xcc7   : > { %v1241_v43 = vsub.f32 %v1233_v38, %v1239_v42  ;;  %v1236_v44 = vpop.xlane.xlu0 %1235 }
 0xcc8   : > { %v1240_v45 = vsub.f32 %v1232_v40, %v1236_v44 }
 0xcc9   : > { %v1244_v46 = vmul.f32 1.442695, %v1241_v43 }
 0xcca   : > { %v1242_v47 = vmul.f32 1.442695, %v1240_v45 }
 0xccb   : > { %1856 = vpow2.f32 %v1244_v46 }
 0xccc   : > { %1858 = vpow2.f32 %v1242_v47 }
 0xcd5   : > { %v1857_v48 = vpop.eup %1856 }
 0xcd6   : > { %v1859_v49 = vpop.eup %1858  ;;  %v1249_v50 = vsel %vm400_vm2, %v1857_v48, 0.0 }
 0xcd7   : > { %1250 = vadd.xlane.f32.xlu1 %v1249_v50  ;;  %v1246_v51 = vsel %vm400_vm2, %v1859_v49, 0.0 }
 0xcd8   : > { %1247 = vadd.xlane.f32.xlu0 %v1246_v51 }
 0xd64   : > { %v1251_v52 = vpop.xlane.xlu1 %1250 }
 0xd65   : > { %1860 = vrcp.f32 %v1251_v52  ;;  %v1248_v53 = vpop.xlane.xlu0 %1247 }
 0xd66   : > { %1862 = vrcp.f32 %v1248_v53 }
 0xd6f   : > { %v1861_v54 = vpop.eup %1860 }
 0xd70   : > { %v1863_v55 = vpop.eup %1862  ;;  %v1255_v57 = vmul.f32 %v1861_v54, %v1857_v48 }
 0xd71   : > { %v1254_v56 = vmul.f32 %v1863_v55, %v1859_v49 }
 0xd73   : > { %1765 = vmatprep.mubr.msk.f32.mxu1 %vm400_vm2, %v1254_v56 }
 0xd74   : > { %1766 = vmatmul.mubr.msk.f32.vlgmr.msra.gmra.mrb[12].mxu1 %vm400_vm2, %v1255_v57 }
 0xd75   : > { %1769 = vmatpush3.msra.mxu1 %v1339_v58 }
 0xe47   : > { %v1767_v59 = vpop.f32.mrb[12].mxu1 }
 0xe48   : > { %v1328_v60 = vpop.f32.mrb[13].mxu1  ;;  %v1338_v62 = vadd.f32 %v1767_v59, %v1059_v31 }
 0xe49   : > { %v1337_v61 = vadd.f32 %v1328_v60, %v1058_v30 }
 0xe4b   : > { %1770 = vmatprep.mubr.msk.f32.mxu1 %vm310_vm0, %v1337_v61 }
 0xe4c   : > { %1771 = vmatmul.mubr.msk.f32.vlgmr.msra.gmra.mrb[14].mxu1 %vm310_vm0, %v1338_v62 }
 0xf1f   : > { %v1772_v5 = vpop.f32.mrb[14].mxu1 }
 0xf20   : > { %v1425_v6 = vadd.f32 %v1772_v5, %v1639_v2  ;;  %v1419_v7 = vpop.f32.mrb[15].mxu1 }
 0xf21   : > { %v1420_v8 = vadd.f32 %v1639_v2, %v1419_v7 }
 0xf22   : > { %v1429_v9 = vmul.f32 %v1425_v6, %v1425_v6 }
 0xf23   : > { %v1428_v10 = vmul.f32 %v1420_v8, %v1420_v8 }
 0xf24   : > { %v1431_v11 = vmul.f32 %v1429_v9, %v1425_v6 }
 0xf25   : > { %v1430_v12 = vmul.f32 %v1428_v10, %v1420_v8 }
 0xf26   : > { %v1433_v13 = vmul.f32 0.044715, %v1431_v11 }
 0xf27   : > { %v1432_v14 = vmul.f32 0.044715, %v1430_v12 }
 0xf28   : > { %v1435_v15 = vadd.f32 %v1433_v13, %v1425_v6 }
 0xf29   : > { %v1434_v16 = vadd.f32 %v1432_v14, %v1420_v8 }
 0xf2a   : > { %v1437_v17 = vmul.f32 0.7978846, %v1435_v15 }
 0xf2b   : > { %v1436_v3 = vmul.f32 0.7978846, %v1434_v16 }
 0xf2c   : > { %1864 = vtanh.f32 %v1437_v17 }
 0xf2d   : > { %1866 = vtanh.f32 %v1436_v3 }
 0xf36   : > { %v1865_v18 = vpop.eup %1864 }
 0xf37   : > { %v1867_v19 = vpop.eup %1866  ;;  %v1441_v20 = vadd.f32 1.0, %v1865_v18 }
 0xf38   : > { %v1440_v21 = vadd.f32 1.0, %v1867_v19 }
 0xf39   : > { %v1443_v22 = vmul.f32 0.5, %v1441_v20 }
 0xf3a   : > { %v1442_v23 = vmul.f32 0.5, %v1440_v21 }
 0xf3b   : > { %v1445_v25 = vmul.f32 %v1443_v22, %v1425_v6 }
 0xf3c   : > { %v1444_v24 = vmul.f32 %v1442_v23, %v1420_v8 }
 0xf3e   : > { %1777 = vmatprep.mubr.msk.f32.mxu0 %vm400_vm2, %v1444_v24 }
 0xf3f   : > { %1778 = vmatmul.mubr.msk.f32.vlgmr.msra.gmra.mrb[8].mxu0 %vm400_vm2, %v1445_v25 }
0x1012   : > { %v1779_v27 = vpop.f32.mrb[8].mxu0 }
0x1013   : > { %v1533_v28 = vadd.f32 %v1779_v27, %v1642_v26  ;;  %v1527_v29 = vpop.f32.mrb[9].mxu0 }
0x1014   : > { %v1528_v30 = vadd.f32 %v1642_v26, %v1527_v29 }
0x1015   : > { %1537 = vst.msk [vmem:[%s305_s20 + $0x8] sm:$0xff] %vm400_vm2, %v1533_v28 }
0x1016   : > { %1536 = vst.msk [vmem:[%s305_s20] sm:$0xff] %vm400_vm2, %v1528_v30 }
0x1017 PF: > { %s18_s27 = sadd.s32 1, %s1874_s27  }
0x1018   : > { %p15_p4 = scmp.ge.s32.totalorder %s18_s27, 4  }
0x101a   :  { %17 = sbr.rel (!%p15_p4) target bundleno = 1 (0x1), region = 86 }

// kernel: forward.6
= control target key start
LH: loop header
LB: loop body
LE: loop exit
PB: predicated region body
PF: predicated region fallthrough
CT: control target
= control target key end

     0   :  { %s2018_s21 = smov 0   ;;  %s2305_s0 = inlined_call_operand.vmem [shape: f32[2,16,8], index: 0, kind: input, shape index: {}]   ;;  %s2306_s1 = inlined_call_operand.vmem [shape: f32[3,48,16], index: 1, kind: input, shape index: {}]   ;;  %s2307_s2 = inlined_call_operand.vmem [shape: f32[48,1], index: 2, kind: input, shape index: {}]   ;;  %s2308_s3 = inlined_call_operand.vmem [shape: f32[3,48,16], index: 3, kind: input, shape index: {}]   ;;  %s2309_s4 = inlined_call_operand.vmem [shape: f32[48,1], index: 4, kind: input, shape index: {}]   ;;  %s2310_s5 = inlined_call_operand.vmem [shape: f32[3,8,8], index: 5, kind: input, shape index: {}]   ;;  %s2311_s6 = inlined_call_operand.vmem [shape: f32[16,8], index: 6, kind: output, shape index: {}]  }
   0x1 LB: > { %s1615_s22 = sadd.s32 4294967295, %s1979_s21   ;;  %p1618_p0 = scmp.ge.s32.totalorder %s1979_s21, 1  ;;  %s1979_s21 = sphi %s2018_s21, %s16_s21  }
   0x2   : > { %p207_p1 = scmp.lt.s32.totalorder %s1979_s21, 3 }
   0x4   : > { %p208_p2 = pnand %p1618_p0, %p207_p1 }
   0x5   : > { %p232_p3 = scmp.lt.s32.totalorder (!%p208_p2), %s1615_s22, 1  ;;  %p1621_p4 = scmp.ne.s32.totalorder (!%p208_p2), %s1615_s22, 0 }
   0x6   : > { %211 = sbr.rel (%p208_p2) target bundleno = 1006 (0x3ee), region = 44 }
   0xd   : > { %s233_s23 = scalar_select %p232_p3, %s1615_s22, 1 }
   0xe   : > { %240 = sbr.rel (%p1621_p4) target bundleno = 21 (0x15), region = 48  ;;  %vm241_vm0 = vcmask (!%p1621_p4), 64512   ;;  %v1981_v0 = vmov (!%p1621_p4), 0.0  }
   0xf   : > { %s1702_s24 = sshll.u32 %s233_s23, 4  ;;  %242 = vst.msk [vmem:[%s2311_s6] sm:$0xff] (!%p1621_p4), %vm241_vm0, %v1981_v0  ;;  %243 = vst.msk [vmem:[%s2311_s6 + $0x8] sm:$0xff] (!%p1621_p4), %vm241_vm0, %v1981_v0 }
  0x10   : > { %s236_s27 = scalar_lea.vmem %s2305_s0, %s1702_s24 }
  0x15 PF: > { %v2038_v1 = vld [vmem:[%s2310_s5] sm:$0xff]  ;;  %vm255_vm1 = vcmask 64512   ;;  %v2042_v3 = vld [vmem:[%s236_s27 + $0x8] sm:$0xff]  ;;  %vm343_vm2 = vcmask 130048   ;;  %v339_v10 = vld [vmem:[%s2306_s1 + $0x10] sm:$0xff]  ;;  %v1982_v17 = vmov 0  }
  0x16   : > { %v2040_v2 = vld [vmem:[%s236_s27] sm:$0xff]  ;;  %1769 = vmatprep.subr.mxu0 %v2038_v1  ;;  %v2057_v8 = vld [vmem:[%s2310_s5 + $0x8] sm:$0xff]  ;;  %v340_v11 = vld [vmem:[%s2306_s1 + $0x18] sm:$0xff]  ;;  %1952 = vset.pattern.permute.xlu1 %v1982_v17 }
  0x17   : > { %1771 = vmatprep.mubr.msk.f32.mxu0 %vm255_vm1, %v2040_v2  ;;  %1770 = vmatpush3.msra.mxu0 %v2038_v1  ;;  %v337_v4 = vld [vmem:[%s2306_s1] sm:$0xff]  ;;  %v338_v9 = vld [vmem:[%s2306_s1 + $0x8] sm:$0xff]  ;;  %v1633_v14 = vld [vmem:[%s2306_s1 + $0x30] sm:$0xff] }
  0x18   : > { %1772 = vmatmul.mubr.msk.f32.vlgmr.msra.gmra.mrb[0].mxu0 %vm255_vm1, %v2042_v3  ;;  %v341_v12 = vld [vmem:[%s2306_s1 + $0x20] sm:$0xff]  ;;  %v342_v13 = vld [vmem:[%s2306_s1 + $0x28] sm:$0xff]  ;;  %v901_v15 = vld [vmem:[%s2309_s4 + $0x10] sm:$0xff]  ;;  %1951 = vset.pattern.permute.xlu0 %v1982_v17 }
  0x19   : > { %1778 = vmatprep.mubr.msk.f32.mxu0 %vm343_vm2, %v337_v4  ;;  %v250_v16 = vld [vmem:[%s2307_s2 + $0x10] sm:$0xff]  ;;  %1117 = vperm.xlu1 %1952, %v901_v15   ;;  %v902_v18 = vld [vmem:[%s2309_s4 + $0x18] sm:$0xff]  ;;  %v249_v20 = vld [vmem:[%s2307_s2 + $0x8] sm:$0xff] }
  0x1a   : > { %469 = vperm.xlu0 %1951, %v250_v16   ;;  %v251_v19 = vld [vmem:[%s2307_s2 + $0x18] sm:$0xff]  ;;  %v248_v21 = vld [vmem:[%s2307_s2] sm:$0xff]  ;;  %v900_v22 = vld [vmem:[%s2309_s4 + $0x8] sm:$0xff] }
  0x1b   : > { %v899_v23 = vld [vmem:[%s2309_s4] sm:$0xff]  ;;  %v253_v24 = vld [vmem:[%s2307_s2 + $0x28] sm:$0xff]  ;;  %v1645_v29 = vld [vmem:[%s2310_s5 + $0x10] sm:$0xff] }
  0x1c   : > { %v252_v25 = vld [vmem:[%s2307_s2 + $0x20] sm:$0xff]  ;;  %v1634_v30 = vld [vmem:[%s2306_s1 + $0x38] sm:$0xff]  ;;  %v1636_v32 = vld [vmem:[%s2306_s1 + $0x48] sm:$0xff] }
  0x1d   : > { %1122 = vperm.xlu1 %1952, %v902_v18   ;;  %v1635_v31 = vld [vmem:[%s2306_s1 + $0x40] sm:$0xff]  ;;  %v1637_v33 = vld [vmem:[%s2306_s1 + $0x50] sm:$0xff]  ;;  %v1638_v34 = vld [vmem:[%s2306_s1 + $0x58] sm:$0xff] }
  0x1e   : > { %474 = vperm.xlu0 %1951, %v251_v19   ;;  %v2148_v35 = vld [vmem:[%s2311_s6] sm:$0xff]  ;;  %v2158_v36 = vld [vmem:[%s2311_s6 + $0x8] sm:$0xff]  ;;  %v1650_v53 = vld [vmem:[%s2306_s1 + $0x70] sm:$0xff] }
  0x1f   : > { %v1648_v37 = vld [vmem:[%s2306_s1 + $0x60] sm:$0xff]  ;;  %v904_v39 = vld [vmem:[%s2309_s4 + $0x28] sm:$0xff]  ;;  %v1651_v55 = vld [vmem:[%s2306_s1 + $0x78] sm:$0xff] }
  0x20   : > { %1814 = vmatprep.mubr.msk.f32.mxu1 %vm343_vm2, %v1648_v37  ;;  %v903_v38 = vld [vmem:[%s2309_s4 + $0x20] sm:$0xff]  ;;  %v1649_v51 = vld [vmem:[%s2306_s1 + $0x68] sm:$0xff] }
  0x21   : > { %464 = vperm.xlu1 %1952, %v249_v20   ;;  %v1652_v57 = vld [vmem:[%s2306_s1 + $0x80] sm:$0xff]  ;;  %v1653_v60 = vld [vmem:[%s2306_s1 + $0x88] sm:$0xff] }
  0x22   : > { %459 = vperm.xlu0 %1951, %v248_v21   ;;  %v986_v62 = vld [vmem:[%s2308_s3] sm:$0xff]  ;;  %v987_v0 = vld [vmem:[%s2308_s3 + $0x8] sm:$0xff] }
  0x23   : > { %v991_v4 = vld [vmem:[%s2308_s3 + $0x28] sm:$0xff]  ;;  %v1688_v15 = vld [vmem:[%s2308_s3 + $0x80] sm:$0xff] }
  0x24   : > { %v1689_v16 = vld [vmem:[%s2308_s3 + $0x88] sm:$0xff] }
  0x25   : > { %1112 = vperm.xlu1 %1952, %v900_v22  }
  0x26   : > { %1107 = vperm.xlu0 %1951, %v899_v23  }
  0x29   : > { %484 = vperm.xlu1 %1952, %v253_v24  }
  0x2a   : > { %479 = vperm.xlu0 %1951, %v252_v25  }
  0x2d   : > { %1132 = vperm.xlu1 %1952, %v904_v39  }
  0x2e   : > { %1127 = vperm.xlu0 %1951, %v903_v38  }
  0x98   : > { %v1118_v17 = vpop.permute.xlu1 %1117 }
  0x99   : > { %v470_v18 = vpop.permute.xlu0 %469 }
  0x9c   : > { %v1123_v19 = vpop.permute.xlu1 %1122 }
  0x9d   : > { %v475_v20 = vpop.permute.xlu0 %474 }
  0xa0   : > { %v465_v21 = vpop.permute.xlu1 %464 }
  0xa1   : > { %v460_v22 = vpop.permute.xlu0 %459 }
  0xa4   : > { %v1113_v23 = vpop.permute.xlu1 %1112 }
  0xa5   : > { %v1108_v24 = vpop.permute.xlu0 %1107 }
  0xa8   : > { %v485_v25 = vpop.permute.xlu1 %484 }
  0xeb   : > { %v1773_v5 = vpop.f32.mrb[0].mxu0 }
  0xec   : > { %v328_v6 = vpop.f32.mrb[1].mxu0 }
  0xed   : > { %v1877_v7 = vpack.c.bf16 %v1773_v5, %v328_v6  ;;  %v1670_v5 = vld [vmem:[%s2308_s3 + $0x30] sm:$0xff]  ;;  %v1671_v6 = vld [vmem:[%s2308_s3 + $0x38] sm:$0xff] }
  0xef   : > { %1878 = vmatprep.subr.bf16.mxu0 %v1877_v7 }
  0xf0   : > { %1880 = vmatpush3.bf16.msra.mxu0 %v1877_v7  ;;  %v1672_v7 = vld [vmem:[%s2308_s3 + $0x40] sm:$0xff] }
  0xf1   : > { %1787 = vmatprep.subr.mxu0 %v2057_v8 }
  0xf3   : > { %1779 = vmatmul.mubr.msk.f32.vlgmr.msra.gmra.mrb[2].mxu0 %vm343_vm2, %v338_v9  ;;  %v1674_v9 = vld [vmem:[%s2308_s3 + $0x50] sm:$0xff] }
  0xf4   : > { %1788 = vmatpush3.msra.mxu0 %v2057_v8  ;;  %1781 = vmatprep.mubr.msk.f32.mxu0 %vm343_vm2, %v339_v10  ;;  %v1675_v10 = vld [vmem:[%s2308_s3 + $0x58] sm:$0xff] }
  0xf7   : > { %1782 = vmatmul.mubr.msk.f32.gmra.mrb[4].mxu0 %vm343_vm2, %v340_v11  ;;  %v1684_v11 = vld [vmem:[%s2308_s3 + $0x60] sm:$0xff] }
  0xf8   : > { %1784 = vmatprep.mubr.msk.f32.mxu0 %vm343_vm2, %v341_v12  ;;  %v1685_v12 = vld [vmem:[%s2308_s3 + $0x68] sm:$0xff] }
  0xfb   : > { %1785 = vmatmul.mubr.msk.f32.gmra.mrb[6].mxu0 %vm343_vm2, %v342_v13  ;;  %v1686_v13 = vld [vmem:[%s2308_s3 + $0x70] sm:$0xff] }
  0xfc   : > { %1789 = vmatprep.mubr.msk.f32.mxu0 %vm255_vm1, %v2040_v2 }
  0xff   : > { %1790 = vmatmul.mubr.msk.f32.vlgmr.msra.gmra.mrb[8].mxu0 %vm255_vm1, %v2042_v3 }
 0x100   : > { %1796 = vmatprep.mubr.msk.f32.mxu0 %vm343_vm2, %v1633_v14  ;;  %v1687_v14 = vld [vmem:[%s2308_s3 + $0x78] sm:$0xff] }
 0x1d2   : > { %v1791_v26 = vpop.f32.mrb[8].mxu0 }
 0x1d3   : > { %v561_v27 = vpop.f32.mrb[9].mxu0 }
 0x1d4   : > { %v1881_v28 = vpack.c.bf16 %v1791_v26, %v561_v27  ;;  %v480_v26 = vpop.permute.xlu0 %479 }
 0x1d6   : > { %1882 = vmatprep.subr.bf16.mxu0 %v1881_v28 }
 0x1d7   : > { %1884 = vmatpush3.bf16.msra.mxu0 %v1881_v28 }
 0x1d8   : > { %1805 = vmatprep.subr.mxu0 %v1645_v29 }
 0x1da   : > { %1797 = vmatmul.mubr.msk.f32.vlgmr.msra.gmra.mrb[2].mxu0 %vm343_vm2, %v1634_v30 }
 0x1db   : > { %1806 = vmatpush3.msra.mxu0 %v1645_v29  ;;  %1799 = vmatprep.mubr.msk.f32.mxu0 %vm343_vm2, %v1635_v31 }
 0x1dc   : > { %1823 = vmatprep.subr.mxu0 %v2038_v1 }
 0x1de   : > { %1800 = vmatmul.mubr.msk.f32.gmra.mrb[4].mxu0 %vm343_vm2, %v1636_v32 }
 0x1df   : > { %1802 = vmatprep.mubr.msk.f32.mxu0 %vm343_vm2, %v1637_v33 }
 0x1e2   : > { %1803 = vmatmul.mubr.msk.f32.gmra.mrb[6].mxu0 %vm343_vm2, %v1638_v34 }
 0x1e3   : > { %1807 = vmatprep.mubr.msk.f32.mxu0 %vm255_vm1, %v2040_v2  ;;  %v989_v2 = vld [vmem:[%s2308_s3 + $0x18] sm:$0xff] }
 0x1e6   : > { %1808 = vmatmul.mubr.msk.f32.vlgmr.msra.gmra.mrb[10].mxu0 %vm255_vm1, %v2042_v3  ;;  %v990_v3 = vld [vmem:[%s2308_s3 + $0x20] sm:$0xff] }
 0x1e7   : > { %1824 = vmatpush3.msra.mxu0 %v2038_v1  ;;  %1825 = vmatprep.mubr.msk.f32.mxu0 %vm255_vm1, %v2148_v35  ;;  %v988_v1 = vld [vmem:[%s2308_s3 + $0x10] sm:$0xff] }
 0x1e8   : > { %1841 = vmatprep.subr.mxu0 %v2057_v8 }
 0x1ea   : > { %1826 = vmatmul.mubr.msk.f32.vlgmr.msra.gmra.mrb[12].mxu0 %vm255_vm1, %v2158_v36 }
 0x1eb   : > { %1842 = vmatpush3.msra.mxu0 %v2057_v8  ;;  %1843 = vmatprep.mubr.msk.f32.mxu0 %vm255_vm1, %v2148_v35  ;;  %v1673_v8 = vld [vmem:[%s2308_s3 + $0x48] sm:$0xff] }
 0x1ec   : > { %1859 = vmatprep.subr.mxu0 %v1645_v29 }
 0x1ee   : > { %1844 = vmatmul.mubr.msk.f32.vlgmr.msra.gmra.mrb[14].mxu0 %vm255_vm1, %v2158_v36 }
 0x1ef   : > { %1860 = vmatpush3.msra.mxu0 %v1645_v29  ;;  %1861 = vmatprep.mubr.msk.f32.mxu0 %vm255_vm1, %v2148_v35 }
 0x1f2   : > { %1862 = vmatmul.mubr.msk.f32.vlgmr.msra.gmra.mrb[16].mxu0 %vm255_vm1, %v2158_v36 }
 0x2ad   : > { %v2182_v40 = vpop.f32.mrb[2].mxu0 }
 0x2ae   : > { %v2184_v41 = vpop.f32.mrb[3].mxu0  ;;  %v1901_v33 = vadd.f32 %v2182_v40, %v465_v21 }
 0x2af   : > { %v1904_v34 = vadd.f32 %v2184_v41, %v460_v22 }
 0x2b0   : > { %v1902_v37 = vadd.f32 %v1901_v33, %v1113_v23 }
 0x2b1   : > { %v2186_v42 = vpop.f32.mrb[4].mxu0  ;;  %v1905_v39 = vadd.f32 %v1904_v34, %v1108_v24 }
 0x2b2   : > { %v2188_v43 = vpop.f32.mrb[5].mxu0  ;;  %v1907_v38 = vadd.f32 %v2186_v42, %v475_v20 }
 0x2b5   : > { %v2190_v44 = vpop.f32.mrb[6].mxu0 }
 0x2b6   : > { %v2192_v45 = vpop.f32.mrb[7].mxu0  ;;  %v1913_v27 = vadd.f32 %v2190_v44, %v485_v25 }
 0x2b7   : > { %v1915_v28 = vadd.f32 %v2192_v45, %v480_v26 }
 0x2b9   : > { %v1809_v46 = vpop.f32.mrb[10].mxu0 }
 0x2ba   : > { %v764_v47 = vpop.f32.mrb[11].mxu0 }
 0x2bb   : > { %v1885_v48 = vpack.c.bf16 %v1809_v46, %v764_v47  ;;  %v1910_v46 = vadd.f32 %v2188_v43, %v470_v18 }
 0x2bd   : > { %1886 = vmatprep.subr.bf16.mxu1 %v1885_v48  ;;  %v1827_v49 = vpop.f32.mrb[12].mxu0 }
 0x2be   : > { %1888 = vmatpush3.bf16.msra.mxu1 %v1885_v48  ;;  %v977_v50 = vpop.f32.mrb[13].mxu0 }
 0x2bf   : > { %v1889_v52 = vpack.c.bf16 %v1827_v49, %v977_v50  ;;  %v1908_v50 = vadd.f32 %v1907_v38, %v1123_v19 }
 0x2c1   : > { %1815 = vmatmul.mubr.msk.f32.vlgmr.msra.gmra.mrb[0].mxu1 %vm343_vm2, %v1649_v51  ;;  %1890 = vmatprep.subr.bf16.mxu1 %v1889_v52  ;;  %v1845_v54 = vpop.f32.mrb[14].mxu0  ;;  %v1911_v51 = vadd.f32 %v1910_v46, %v1118_v17 }
 0x2c2   : > { %1892 = vmatpush3.bf16.msra.mxu1 %v1889_v52  ;;  %1817 = vmatprep.mubr.msk.f32.mxu1 %vm343_vm2, %v1650_v53  ;;  %v1207_v56 = vpop.f32.mrb[15].mxu0 }
 0x2c3   : > { %v1893_v58 = vpack.c.bf16 %v1845_v54, %v1207_v56 }
 0x2c5   : > { %1818 = vmatmul.mubr.msk.f32.gmra.mrb[2].mxu1 %vm343_vm2, %v1651_v55  ;;  %1894 = vmatprep.subr.bf16.mxu1 %v1893_v58  ;;  %v1863_v59 = vpop.f32.mrb[16].mxu0 }
 0x2c6   : > { %1820 = vmatprep.mubr.msk.f32.mxu1 %vm343_vm2, %v1652_v57  ;;  %v1408_v61 = vpop.f32.mrb[17].mxu0 }
 0x2c7   : > { %v1897_v63 = vpack.c.bf16 %v1863_v59, %v1408_v61 }
 0x2c9   : > { %1821 = vmatmul.mubr.msk.f32.gmra.mrb[4].mxu1 %vm343_vm2, %v1653_v60 }
 0x2ca   : > { %1832 = vmatprep.mubr.msk.f32.mxu1 %vm343_vm2, %v986_v62 }
 0x2cd   : > { %1833 = vmatmul.mubr.msk.f32.vlgmr.msra.gmra.mrb[0].mxu1 %vm343_vm2, %v987_v0  ;;  %v1133_v0 = vpop.permute.xlu1 %1132 }
 0x2ce   : > { %1896 = vmatpush3.bf16.msra.mxu1 %v1893_v58  ;;  %1835 = vmatprep.mubr.msk.f32.mxu1 %vm343_vm2, %v988_v1 }
 0x2cf   : > { %1898 = vmatprep.subr.bf16.mxu1 %v1897_v63 }
 0x2d1   : > { %1836 = vmatmul.mubr.msk.f32.gmra.mrb[2].mxu1 %vm343_vm2, %v989_v2  ;;  %v1128_v2 = vpop.permute.xlu0 %1127 }
 0x2d2   : > { %1838 = vmatprep.mubr.msk.f32.mxu1 %vm343_vm2, %v990_v3 }
 0x2d5   : > { %1839 = vmatmul.mubr.msk.f32.gmra.mrb[6].mxu1 %vm343_vm2, %v991_v4 }
 0x2d6   : > { %1850 = vmatprep.mubr.msk.f32.mxu1 %vm343_vm2, %v1670_v5 }
 0x2d9   : > { %1851 = vmatmul.mubr.msk.f32.vlgmr.msra.gmra.mrb[0].mxu1 %vm343_vm2, %v1671_v6 }
 0x2da   : > { %1900 = vmatpush3.bf16.msra.mxu1 %v1897_v63  ;;  %1853 = vmatprep.mubr.msk.f32.mxu1 %vm343_vm2, %v1672_v7 }
 0x2dd   : > { %1854 = vmatmul.mubr.msk.f32.gmra.mrb[2].mxu1 %vm343_vm2, %v1673_v8 }
 0x2de   : > { %1856 = vmatprep.mubr.msk.f32.mxu1 %vm343_vm2, %v1674_v9 }
 0x2e1   : > { %1857 = vmatmul.mubr.msk.f32.gmra.mrb[6].mxu1 %vm343_vm2, %v1675_v10 }
 0x2e2   : > { %1868 = vmatprep.mubr.msk.f32.mxu1 %vm343_vm2, %v1684_v11 }
 0x2e5   : > { %1869 = vmatmul.mubr.msk.f32.vlgmr.msra.gmra.mrb[0].mxu1 %vm343_vm2, %v1685_v12 }
 0x2e6   : > { %1871 = vmatprep.mubr.msk.f32.mxu1 %vm343_vm2, %v1686_v13 }
 0x2e9   : > { %1872 = vmatmul.mubr.msk.f32.gmra.mrb[2].mxu1 %vm343_vm2, %v1687_v14 }
 0x2ea   : > { %1874 = vmatprep.mubr.msk.f32.mxu1 %vm343_vm2, %v1688_v15 }
 0x2ed   : > { %1875 = vmatmul.mubr.msk.f32.gmra.mrb[6].mxu1 %vm343_vm2, %v1689_v16 }
 0x39c   : > { %v1822_v29 = vpop.f32.mrb[4].mxu1 }
 0x39d   : > { %v1914_v30 = vadd.f32 %v1913_v27, %v1822_v29  ;;  %v884_v31 = vpop.f32.mrb[5].mxu1 }
 0x39e   : > { %v1916_v32 = vadd.f32 %v1915_v28, %v884_v31 }
 0x3b8   : > { %v1870_v47 = vpop.f32.mrb[0].mxu1 }
 0x3b9   : > { %v1903_v48 = vadd.f32 %v1902_v37, %v1870_v47  ;;  %v1508_v49 = vpop.f32.mrb[1].mxu1 }
 0x3ba   : > { %v1906_v44 = vadd.f32 %v1905_v39, %v1508_v49 }
 0x3bb   : > { %v1697_v42 = vmul.f32 -1.442695, %v1903_v48 }
 0x3bc   : > { %v1873_v45 = vpop.f32.mrb[2].mxu1  ;;  %v1696_v57 = vmul.f32 -1.442695, %v1906_v44 }
 0x3bd   : > { %v1909_v52 = vadd.f32 %v1908_v50, %v1873_v45  ;;  %v1518_v53 = vpop.f32.mrb[3].mxu1 }
 0x3be   : > { %v1912_v54 = vadd.f32 %v1911_v51, %v1518_v53 }
 0x3bf   : > { %v1699_v55 = vmul.f32 -1.442695, %v1909_v52 }
 0x3c0   : > { %v1698_v40 = vmul.f32 -1.442695, %v1912_v54  ;;  %v1876_v56 = vpop.f32.mrb[6].mxu1 }
 0x3c1   : > { %1953 = vpow2.f32 %v1699_v55  ;;  %v1528_v41 = vpop.f32.mrb[7].mxu1  ;;  %v1917_v3 = vadd.f32 %v1876_v56, %v1133_v0 }
 0x3c2   : > { %1955 = vpow2.f32 %v1698_v40  ;;  %v1918_v5 = vadd.f32 %v1528_v41, %v1128_v2 }
 0x3c3   : > { %1957 = vpow2.f32 %v1697_v42 }
 0x3c4   : > { %1959 = vpow2.f32 %v1696_v57 }
 0x3cb   : > { %v1954_v43 = vpop.eup %1953 }
 0x3cc   : > { %v1956_v58 = vpop.eup %1955  ;;  %v1566_v59 = vadd.f32 1.0, %v1954_v43 }
 0x3cd   : > { %v1565_v60 = vadd.f32 1.0, %v1956_v58  ;;  %v1958_v61 = vpop.eup %1957 }
 0x3ce   : > { %1961 = vrcp.f32 %v1566_v59  ;;  %v1960_v62 = vpop.eup %1959  ;;  %v1552_v63 = vadd.f32 1.0, %v1958_v61 }
 0x3cf   : > { %1963 = vrcp.f32 %v1565_v60  ;;  %v1551_v1 = vadd.f32 1.0, %v1960_v62 }
 0x3d0   : > { %1965 = vrcp.f32 %v1552_v63 }
 0x3d1   : > { %1967 = vrcp.f32 %v1551_v1 }
 0x3d8   : > { %v1962_v4 = vpop.eup %1961 }
 0x3d9   : > { %v1964_v6 = vpop.eup %1963  ;;  %v1572_v7 = vmul.f32 %v1962_v4, %v1917_v3 }
 0x3da   : > { %v1571_v8 = vmul.f32 %v1964_v6, %v1918_v5  ;;  %v1966_v11 = vpop.eup %1965 }
 0x3db   : > { %v1574_v9 = vadd.f32 %v1914_v30, %v1572_v7  ;;  %v1968_v12 = vpop.eup %1967  ;;  %v1578_v13 = vsub.f32 1.0, %v1966_v11  ;;  %v1582_v17 = vmul.f32 %v1966_v11, %v2158_v36 }
 0x3dc   : > { %v1573_v10 = vadd.f32 %v1916_v32, %v1571_v8  ;;  %v1577_v15 = vsub.f32 1.0, %v1968_v12  ;;  %v1581_v19 = vmul.f32 %v1968_v12, %v2148_v35 }
 0x3dd   : > { %1969 = vtanh.f32 %v1574_v9 }
 0x3de   : > { %1971 = vtanh.f32 %v1573_v10 }
 0x3e7   : > { %v1970_v14 = vpop.eup %1969 }
 0x3e8   : > { %v1972_v16 = vpop.eup %1971  ;;  %v1580_v18 = vmul.f32 %v1970_v14, %v1578_v13 }
 0x3e9   : > { %v1579_v20 = vmul.f32 %v1972_v16, %v1577_v15 }
 0x3ea   : > { %v1584_v21 = vadd.f32 %v1582_v17, %v1580_v18 }
 0x3eb   : > { %v1583_v22 = vadd.f32 %v1581_v19, %v1579_v20 }
 0x3ec   : > { %1586 = vst.msk [vmem:[%s2311_s6 + $0x8] sm:$0xff] %vm255_vm1, %v1584_v21 }
 0x3ed   : > { %1585 = vst.msk [vmem:[%s2311_s6] sm:$0xff] %vm255_vm1, %v1583_v22 }
 0x3ee PF: > { %s16_s21 = sadd.s32 1, %s1979_s21  }
 0x3ef   : > { %p13_p5 = scmp.ge.s32.totalorder %s16_s21, 4  }
 0x3f1   :  { %15 = sbr.rel (!%p13_p5) target bundleno = 1 (0x1), region = 80 }

// kernel: forward.5
= control target key start
LH: loop header
LB: loop body
LE: loop exit
PB: predicated region body
PF: predicated region fallthrough
CT: control target
= control target key end

     0   :  { %s2242_s13 = smov 0   ;;  %s2475_s0 = inlined_call_operand.vmem [shape: f32[2,8,32], index: 0, kind: input, shape index: {}]   ;;  %s2476_s1 = inlined_call_operand.vmem [shape: f32[3,4,8], index: 1, kind: input, shape index: {}]   ;;  %s2477_s2 = inlined_call_operand.vmem [shape: f32[4,1], index: 2, kind: input, shape index: {}]   ;;  %s2478_s3 = inlined_call_operand.vmem [shape: f32[3,32,32], index: 3, kind: input, shape index: {}]   ;;  %s2479_s4 = inlined_call_operand.vmem [shape: f32[3,8,4], index: 4, kind: input, shape index: {}]   ;;  %s2480_s5 = inlined_call_operand.vmem [shape: f32[8,1], index: 5, kind: input, shape index: {}]   ;;  %s2481_s6 = inlined_call_operand.vmem [shape: f32[3,32,16], index: 6, kind: input, shape index: {}]   ;;  %s2482_s7 = inlined_call_operand.vmem [shape: f32[3,16,8], index: 7, kind: input, shape index: {}]   ;;  %s2483_s8 = inlined_call_operand.vmem [shape: f32[16,1], index: 8, kind: input, shape index: {}]   ;;  %s2484_s9 = inlined_call_operand.vmem [shape: f32[3,16,8], index: 9, kind: input, shape index: {}]   ;;  %s2485_s10 = inlined_call_operand.vmem [shape: f32[2,16,8], index: 10, kind: output, shape index: {}]  }
   0x1 LB: > { %s1841_s14 = sadd.s32 4294967295, %s2181_s13   ;;  %p1845_p0 = scmp.ge.s32.totalorder %s2181_s13, 1  ;;  %s2181_s13 = sphi %s2242_s13, %s20_s13  }
   0x2   : > { %p311_p1 = scmp.lt.s32.totalorder %s2181_s13, 3 }
   0x4   : > { %p312_p2 = pnand %p1845_p0, %p311_p1 }
   0x5   : > { %v359_v0 = vld [vmem:[%s2478_s3] sm:$0xff] (!%p312_p2)  ;;  %v360_v1 = vld [vmem:[%s2478_s3 + $0x8] sm:$0xff] (!%p312_p2)  ;;  %v361_v2 = vld [vmem:[%s2478_s3 + $0x10] sm:$0xff] (!%p312_p2)  ;;  %v2183_v3 = vmov (!%p312_p2), 0.0|0.0   ;;  %vm2184_vm0 = vmmov (!%p312_p2), 0   ;;  %v2185_v6 = vmov (!%p312_p2), 0.0  }
   0x6   : > { %315 = sbr.rel (%p312_p2) target bundleno = 1797 (0x705), region = 60  ;;  %2096 = vmatprep.subr.bf16.mxu0 (!%p312_p2), %v2183_v3  ;;  %v2097_v4 = vpack.c.bf16 (!%p312_p2), %v360_v1, %v359_v0  ;;  %v362_v5 = vld [vmem:[%s2478_s3 + $0x18] sm:$0xff] (!%p312_p2)  ;;  %1972 = vmatprep.mubr.msk.f32.mxu0 (!%p312_p2), %vm2184_vm0, %v2185_v6  ;;  %p348_p3 = scmp.lt.s32.totalorder (!%p312_p2), %s1841_s14, 1  ;;  %vm363_vm1 = vcmask (!%p312_p2), 261120   ;;  %v1858_v9 = vld [vmem:[%s2478_s3 + $0x40] sm:$0xff] (!%p312_p2)  ;;  %v1859_v10 = vld [vmem:[%s2478_s3 + $0x48] sm:$0xff] (!%p312_p2) }
   0x7   : > { %1975 = vmatprep.subr.mxu1 (!%p312_p2), %v2185_v6  ;;  %1977 = vmatprep.mubr.msk.f32.mxu1 (!%p312_p2), %vm2184_vm0, %v2185_v6  ;;  %v2100_v7 = vpack.c.bf16 (!%p312_p2), %v362_v5, %v361_v2  ;;  %v2109_v11 = vpack.c.bf16 (!%p312_p2), %v1859_v10, %v1858_v9  ;;  %v1860_v12 = vld [vmem:[%s2478_s3 + $0x50] sm:$0xff] (!%p312_p2)  ;;  %v1861_v13 = vld [vmem:[%s2478_s3 + $0x58] sm:$0xff] (!%p312_p2)  ;;  %v1851_v15 = vld [vmem:[%s2478_s3 + $0x20] sm:$0xff] (!%p312_p2)  ;;  %vm438_vm2 = vcmask (!%p312_p2), 64512   ;;  %v2186_v27 = vmov (!%p312_p2), 0  }
   0x8   : > { %2098 = vmatpush3.bf16.msra.mxu0 (!%p312_p2), %v2097_v4  ;;  %v2112_v14 = vpack.c.bf16 (!%p312_p2), %v1861_v13, %v1860_v12  ;;  %v1852_v16 = vld [vmem:[%s2478_s3 + $0x28] sm:$0xff] (!%p312_p2)  ;;  %v437_v17 = vld [vmem:[%s2476_s1] sm:$0xf] (!%p312_p2)  ;;  %v1853_v20 = vld [vmem:[%s2478_s3 + $0x30] sm:$0xff] (!%p312_p2)  ;;  %2169 = vset.pattern.permute.xlu0 (!%p312_p2), %v2186_v27  ;;  %vm904_vm3 = vcmask (!%p312_p2), 1043456   ;;  %vm900_vm4 = vcmask (!%p312_p2), 31744  }
   0x9   : > { %2099 = vmatprep.subr.bf16.mxu0 (!%p312_p2), %v2183_v3  ;;  %v2103_v18 = vpack.c.bf16 (!%p312_p2), %v1852_v16, %v1851_v15  ;;  %v1854_v21 = vld [vmem:[%s2478_s3 + $0x38] sm:$0xff] (!%p312_p2)  ;;  %v358_v26 = vld [vmem:[%s2477_s2] sm:$0xf] (!%p312_p2)  ;;  %2170 = vset.pattern.permute.xlu1 (!%p312_p2), %v2186_v27  ;;  %v1856_v29 = vld [vmem:[%s2476_s1 + $0x4] sm:$0xf] (!%p312_p2)  ;;  %vm1297_vm5 = vcmask (!%p312_p2), 130048  }
   0xa   : > { %v2106_v23 = vpack.c.bf16 (!%p312_p2), %v1854_v21, %v1853_v20  ;;  %514 = vperm.xlu0 (!%p312_p2), %2169, %v358_v26   ;;  %v821_v28 = vld [vmem:[%s2480_s5] sm:$0xff] (!%p312_p2)  ;;  %v1863_v32 = vld [vmem:[%s2476_s1 + $0x8] sm:$0xf] (!%p312_p2)  ;;  %v824_v35 = vld [vmem:[%s2481_s6 + $0x10] sm:$0xff] (!%p312_p2) }
   0xb   : > { %v822_v33 = vld [vmem:[%s2481_s6] sm:$0xff] (!%p312_p2)  ;;  %v823_v34 = vld [vmem:[%s2481_s6 + $0x8] sm:$0xff] (!%p312_p2)  ;;  %v825_v37 = vld [vmem:[%s2481_s6 + $0x18] sm:$0xff] (!%p312_p2) }
   0xc   : > { %2101 = vmatpush3.bf16.msra.mxu0 (!%p312_p2), %v2100_v7  ;;  %v2115_v36 = vpack.c.bf16 (!%p312_p2), %v823_v34, %v822_v33  ;;  %v2118_v38 = vpack.c.bf16 (!%p312_p2), %v825_v37, %v824_v35  ;;  %v1876_v43 = vld [vmem:[%s2481_s6 + $0x40] sm:$0xff] (!%p312_p2)  ;;  %v1877_v44 = vld [vmem:[%s2481_s6 + $0x48] sm:$0xff] (!%p312_p2)  ;;  %v1878_v46 = vld [vmem:[%s2481_s6 + $0x50] sm:$0xff] (!%p312_p2) }
   0xd   : > { %s2487_s14 = smov (!%p348_p3, %s1841_s14), 1  ;;  %2108 = vmatprep.subr.bf16.mxu0 %v2183_v3  ;;  %v2127_v45 = vpack.c.bf16 %v1877_v44, %v1876_v43  ;;  %v1879_v47 = vld [vmem:[%s2481_s6 + $0x58] sm:$0xff]  ;;  %v1868_v50 = vld [vmem:[%s2481_s6 + $0x20] sm:$0xff]  ;;  %v1869_v51 = vld [vmem:[%s2481_s6 + $0x28] sm:$0xff] }
   0xe   : > { %s1846_s23 = sshll.u32 %s2487_s14, 3  ;;  %980 = vperm.xlu0 %2169, %v821_v28   ;;  %v2130_v49 = vpack.c.bf16 %v1879_v47, %v1878_v46  ;;  %v899_v52 = vld [vmem:[%s2479_s4] sm:$0xff]  ;;  %v2121_v53 = vpack.c.bf16 %v1869_v51, %v1868_v50  ;;  %v1870_v55 = vld [vmem:[%s2481_s6 + $0x30] sm:$0xff]  ;;  %v1871_v56 = vld [vmem:[%s2481_s6 + $0x38] sm:$0xff]  ;;  %s1903_s21 = sshll.u32 %s2487_s14, 4 }
   0xf   : > { %s351_s26 = scalar_lea.vmem %s2475_s0, %s1846_s23  ;;  %v2124_v58 = vpack.c.bf16 %v1871_v56, %v1870_v55  ;;  %v1873_v61 = vld [vmem:[%s2479_s4 + $0x8] sm:$0xff]  ;;  %v1881_v0 = vld [vmem:[%s2479_s4 + $0x10] sm:$0xff]  ;;  %v1295_v1 = vld [vmem:[%s2484_s9] sm:$0xff]  ;;  %s356_s24 = scalar_lea.vmem %s2485_s10, %s1903_s21 }
  0x10   : > { %v357_v8 = vld [vmem:[%s351_s26] sm:$0xff]  ;;  %v1296_v2 = vld [vmem:[%s2484_s9 + $0x8] sm:$0xff]  ;;  %v1887_v4 = vld [vmem:[%s2484_s9 + $0x10] sm:$0xff] }
  0x11   : > { %1973 = vmatmul.mubr.msk.f32.vlgmr.msra.gmra.mrb[0].mxu0 %vm363_vm1, %v357_v8  ;;  %v2133_v5 = vpack.c.bf16 %v1296_v2, %v1295_v1  ;;  %v1888_v7 = vld [vmem:[%s2484_s9 + $0x18] sm:$0xff]  ;;  %v1894_v13 = vld [vmem:[%s2484_s9 + $0x20] sm:$0xff]  ;;  %v1898_v28 = vld [vmem:[%s2482_s7 + $0x28] sm:$0xff] }
  0x12   : > { %2004 = vmatprep.mubr.msk.f32.mxu0 %vm2184_vm0, %v2185_v6  ;;  %2110 = vmatpush3.bf16.msra.mxu0 %v2109_v11  ;;  %v1891_v26 = vld [vmem:[%s2482_s7 + $0x18] sm:$0xff]  ;;  %v1897_v27 = vld [vmem:[%s2482_s7 + $0x20] sm:$0xff] }
  0x13   : > { %2111 = vmatprep.subr.bf16.mxu0 %v2183_v3 }
  0x16   : > { %2113 = vmatpush3.bf16.msra.mxu0 %v2112_v14  ;;  %v1895_v14 = vld [vmem:[%s2484_s9 + $0x28] sm:$0xff] }
  0x17   : > { %2114 = vmatprep.subr.bf16.mxu0 %v2183_v3  ;;  %v2139_v15 = vpack.c.bf16 %v1895_v14, %v1894_v13 }
  0x19   : > { %2005 = vmatmul.mubr.msk.f32.vlgmr.msra.gmra.mrb[2].mxu0 %vm363_vm1, %v357_v8 }
  0x1a   : > { %2020 = vmatprep.mubr.msk.f32.mxu0 %vm2184_vm0, %v2185_v6  ;;  %2116 = vmatpush3.bf16.msra.mxu0 %v2115_v36 }
  0x1b   : > { %2117 = vmatprep.subr.bf16.mxu0 %v2183_v3 }
  0x1e   : > { %2119 = vmatpush3.bf16.msra.mxu0 %v2118_v38 }
  0x1f   : > { %2126 = vmatprep.subr.bf16.mxu0 %v2183_v3 }
  0x89   : > { %v515_v39 = vpop.permute.xlu0 %514 }
  0x8d   : > { %v981_v9 = vpop.permute.xlu0 %980 }
  0xe4   : > { %v433_v19 = vpop.f32.mrb[0].mxu0 }
  0xe5   : > { %v1974_v22 = vpop.f32.mrb[1].mxu0  ;;  %1976 = vmatpush3.msra.mxu1 %v433_v19 }
  0xe6   : > { %2102 = vmatprep.subr.bf16.mxu1 %v2183_v3  ;;  %1978 = vmatmul.mubr.msk.f32.vlgmr.msra.gmra.mrb[0].mxu1 %vm438_vm2, %v437_v17  ;;  %v1293_v17 = vld [vmem:[%s2483_s8] sm:$0xff] }
  0xe7   : > { %2104 = vmatpush3.bf16.msra.mxu1 %v2103_v18  ;;  %1988 = vmatprep.mubr.msk.f32.mxu1 %vm2184_vm0, %v2185_v6  ;;  %v1294_v18 = vld [vmem:[%s2483_s8 + $0x8] sm:$0xff] }
  0xe8   : > { %2105 = vmatprep.subr.bf16.mxu1 %v2183_v3  ;;  %1456 = vperm.xlu1 %2170, %v1293_v17  }
  0xeb   : > { %2107 = vmatpush3.bf16.msra.mxu1 %v2106_v23  ;;  %v1890_v23 = vld [vmem:[%s2482_s7 + $0x10] sm:$0xff] }
  0xec   : > { %1991 = vmatprep.subr.mxu1 %v2185_v6  ;;  %v740_v24 = vpop.f32.mrb[2].mxu0  ;;  %1461 = vperm.xlu1 %2170, %v1294_v18  }
  0xed   : > { %v2006_v25 = vpop.f32.mrb[3].mxu0 }
  0xee   : > { %1989 = vmatmul.mubr.msk.f32.vlgmr.msra.gmra.mrb[2].mxu1 %vm363_vm1, %v357_v8  ;;  %v2136_v8 = vpack.c.bf16 %v1888_v7, %v1887_v4 }
  0xef   : > { %1993 = vmatprep.mubr.msk.f32.mxu1 %vm2184_vm0, %v2185_v6 }
 0x1c1   : > { %v589_v30 = vpop.f32.mrb[2].mxu1 }
 0x1c2   : > { %v1990_v31 = vpop.f32.mrb[3].mxu1  ;;  %1992 = vmatpush3.msra.mxu1 %v589_v30 }
 0x1c3   : > { %1994 = vmatmul.mubr.msk.f32.vlgmr.msra.gmra.mrb[0].mxu1 %vm438_vm2, %v1856_v29  ;;  %2007 = vmatprep.subr.mxu1 %v2185_v6  ;;  %v1457_v29 = vpop.permute.xlu1 %1456 }
 0x1c4   : > { %2008 = vmatpush3.msra.mxu1 %v740_v24  ;;  %2009 = vmatprep.mubr.msk.f32.mxu1 %vm2184_vm0, %v2185_v6 }
 0x1c5   : > { %2023 = vmatprep.subr.mxu1 %v2185_v6 }
 0x1c7   : > { %v1462_v30 = vpop.permute.xlu1 %1461 }
 0x1cb   : > { %2010 = vmatmul.mubr.msk.f32.vlgmr.msra.gmra.mrb[0].mxu1 %vm438_vm2, %v1863_v32 }
 0x1cc   : > { %2025 = vmatprep.mubr.msk.f32.mxu1 %vm2184_vm0, %v2185_v6 }
 0x29e   : > { %v815_v40 = vpop.f32.mrb[0].mxu1 }
 0x29f   : > { %v2141_v41 = vadd.f32 %v815_v40, %v515_v39  ;;  %v2011_v42 = vpop.f32.mrb[1].mxu1 }
 0x2a1   : > { %2171 = vtanh.f32 %v2141_v41 }
 0x2ab   : > { %v2172_v48 = vpop.eup %2171 }
 0x2ac   : > { %2021 = vmatmul.mubr.msk.f32.vlgmr.msra.gmra.mrb[4].mxu0 %vm363_vm1, %v2172_v48 }
 0x2ad   : > { %2128 = vmatpush3.bf16.msra.mxu0 %v2127_v45  ;;  %2052 = vmatprep.mubr.msk.f32.mxu0 %vm2184_vm0, %v2185_v6 }
 0x2ae   : > { %2129 = vmatprep.subr.bf16.mxu0 %v2183_v3 }
 0x2b1   : > { %2131 = vmatpush3.bf16.msra.mxu0 %v2130_v49 }
 0x2b2   : > { %2132 = vmatprep.subr.bf16.mxu0 %v2183_v3 }
 0x2b4   : > { %2053 = vmatmul.mubr.msk.f32.vlgmr.msra.gmra.mrb[6].mxu0 %vm363_vm1, %v2172_v48 }
 0x2b5   : > { %2064 = vmatprep.mubr.msk.f32.mxu0 %vm2184_vm0, %v2185_v6  ;;  %2134 = vmatpush3.bf16.msra.mxu0 %v2133_v5 }
 0x37f   : > { %v895_v54 = vpop.f32.mrb[4].mxu0 }
 0x380   : > { %v2022_v57 = vpop.f32.mrb[5].mxu0  ;;  %2024 = vmatpush3.msk.msra.mxu1 %vm904_vm3, %v895_v54 }
 0x381   : > { %2120 = vmatprep.subr.bf16.mxu1 %v2183_v3  ;;  %2026 = vmatmul.mubr.msk.f32.vlgmr.msra.gmra.mrb[4].mxu1 %vm900_vm4, %v899_v52 }
 0x382   : > { %2122 = vmatpush3.bf16.msra.mxu1 %v2121_v53  ;;  %2036 = vmatprep.mubr.msk.f32.mxu1 %vm2184_vm0, %v2185_v6 }
 0x383   : > { %2123 = vmatprep.subr.bf16.mxu1 %v2183_v3 }
 0x386   : > { %2125 = vmatpush3.bf16.msra.mxu1 %v2124_v58 }
 0x387   : > { %v1209_v59 = vpop.f32.mrb[6].mxu0  ;;  %2039 = vmatprep.subr.mxu1 %v2185_v6 }
 0x388   : > { %v2054_v60 = vpop.f32.mrb[7].mxu0 }
 0x389   : > { %2037 = vmatmul.mubr.msk.f32.vlgmr.msra.gmra.mrb[6].mxu1 %vm363_vm1, %v2172_v48 }
 0x38a   : > { %2041 = vmatprep.mubr.msk.f32.mxu1 %vm2184_vm0, %v2185_v6 }
 0x45c   : > { %v1055_v62 = vpop.f32.mrb[6].mxu1 }
 0x45d   : > { %v2038_v63 = vpop.f32.mrb[7].mxu1  ;;  %2040 = vmatpush3.msk.msra.mxu1 %vm904_vm3, %v1055_v62 }
 0x45e   : > { %2042 = vmatmul.mubr.msk.f32.vlgmr.msra.gmra.mrb[4].mxu1 %vm900_vm4, %v1873_v61  ;;  %2055 = vmatprep.subr.mxu1 %v2185_v6 }
 0x45f   : > { %2056 = vmatpush3.msk.msra.mxu1 %vm904_vm3, %v1209_v59  ;;  %2057 = vmatprep.mubr.msk.f32.mxu1 %vm2184_vm0, %v2185_v6 }
 0x460   : > { %2135 = vmatprep.subr.bf16.mxu1 %v2183_v3 }
 0x466   : > { %2058 = vmatmul.mubr.msk.f32.vlgmr.msra.gmra.mrb[4].mxu1 %vm900_vm4, %v1881_v0 }
 0x467   : > { %2076 = vmatprep.mubr.msk.f32.mxu1 %vm2184_vm0, %v2185_v6  ;;  %2137 = vmatpush3.bf16.msra.mxu1 %v2136_v8 }
 0x468   : > { %2138 = vmatprep.subr.bf16.mxu1 %v2183_v3  ;;  %v1371_v3 = vld [vmem:[%s2482_s7] sm:$0xff] }
 0x539   : > { %v1287_v10 = vpop.f32.mrb[4].mxu1 }
 0x53a   : > { %v2142_v11 = vadd.f32 %v1287_v10, %v981_v9  ;;  %v2059_v12 = vpop.f32.mrb[5].mxu1 }
 0x53c   : > { %2173 = vtanh.f32 %v2142_v11 }
 0x546   : > { %v2174_v16 = vpop.eup %2173 }
 0x547   : > { %2065 = vmatmul.mubr.msk.f32.vlgmr.msra.gmra.mrb[8].mxu0 %vm1297_vm5, %v2174_v16  ;;  %2077 = vmatmul.mubr.msk.f32.vlgmr.msra.gmra.mrb[8].mxu1 %vm1297_vm5, %v2174_v16 }
 0x548   : > { %2140 = vmatpush3.bf16.msra.mxu1 %v2139_v15  ;;  %2088 = vmatprep.mubr.msk.f32.mxu1 %vm2184_vm0, %v2185_v6  ;;  %v1372_v6 = vld [vmem:[%s2482_s7 + $0x8] sm:$0xff] }
 0x549   : > { %2069 = vmatprep.mubr.msk.f32.mxu0 %vm438_vm2, %v1371_v3 }
 0x54b   : > { %2089 = vmatmul.mubr.msk.f32.vlgmr.msra.gmra.mrb[10].mxu1 %vm1297_vm5, %v2174_v16 }
 0x61a   : > { %v1367_v19 = vpop.f32.mrb[8].mxu0  ;;  %v1535_v20 = vpop.f32.mrb[8].mxu1 }
 0x61b   : > { %v2066_v21 = vpop.f32.mrb[9].mxu0  ;;  %2067 = vmatprep.subr.mxu0 %v1367_v19  ;;  %v2078_v22 = vpop.f32.mrb[9].mxu1 }
 0x61c   : > { %2068 = vmatpush3.msra.mxu0 %v1367_v19 }
 0x61d   : > { %2070 = vmatmul.mubr.msk.f32.vlgmr.msra.gmra.mrb[10].mxu0 %vm438_vm2, %v1372_v6  ;;  %2079 = vmatprep.subr.mxu0 %v1535_v20 }
 0x61e   : > { %2080 = vmatpush3.msra.mxu0 %v1535_v20  ;;  %v1694_v24 = vpop.f32.mrb[10].mxu1  ;;  %2081 = vmatprep.mubr.msk.f32.mxu0 %vm438_vm2, %v1890_v23 }
 0x61f   : > { %v2090_v25 = vpop.f32.mrb[11].mxu1  ;;  %2091 = vmatprep.subr.mxu0 %v1694_v24 }
 0x625   : > { %2082 = vmatmul.mubr.msk.f32.vlgmr.msra.gmra.mrb[10].mxu0 %vm438_vm2, %v1891_v26 }
 0x626   : > { %2092 = vmatpush3.msra.mxu0 %v1694_v24  ;;  %2093 = vmatprep.mubr.msk.f32.mxu0 %vm438_vm2, %v1897_v27 }
 0x62d   : > { %2094 = vmatmul.mubr.msk.f32.vlgmr.msra.gmra.mrb[10].mxu0 %vm438_vm2, %v1898_v28 }
 0x700   : > { %v2095_v31 = vpop.f32.mrb[10].mxu0 }
 0x701   : > { %v2143_v32 = vadd.f32 %v2095_v31, %v1462_v30  ;;  %v1773_v33 = vpop.f32.mrb[11].mxu0 }
 0x702   : > { %v2144_v34 = vadd.f32 %v1773_v33, %v1457_v29 }
 0x703   : > { %1785 = vst.msk [vmem:[%s356_s24 + $0x8] sm:$0xff] %vm438_vm2, %v2143_v32 }
 0x704   : > { %1784 = vst.msk [vmem:[%s356_s24] sm:$0xff] %vm438_vm2, %v2144_v34 }
 0x705 PF: > { %s20_s13 = sadd.s32 1, %s2181_s13  }
 0x706   : > { %p17_p4 = scmp.ge.s32.totalorder %s20_s13, 4  }
 0x708   :  { %19 = sbr.rel (!%p17_p4) target bundleno = 1 (0x1), region = 102 }

// kernel: forward.7
= control target key start
LH: loop header
LB: loop body
LE: loop exit
PB: predicated region body
PF: predicated region fallthrough
CT: control target
= control target key end

     0   :  { %14 = vsyncpa [#allocation4], 0  ;;  %s4315_s0 = inlined_call_operand.vmem [shape: f32[2], index: 0, kind: input, shape index: {}]   ;;  %s4316_s1 = inlined_call_operand.vmem [shape: f32[2], index: 1, kind: input, shape index: {}]   ;;  %s4317_s2 = inlined_call_operand.vmem [shape: f32[16,8], index: 2, kind: input, shape index: {}]   ;;  %s4318_s3 = inlined_call_operand.vmem [shape: f32[2,16,8], index: 3, kind: input, shape index: {}]   ;;  %s4319_s4 = inlined_call_operand.vmem [shape: f32[3,3,16,16], index: 4, kind: input, shape index: {}]   ;;  %s4320_s5 = inlined_call_operand.vmem [shape: f32[3,16,1], index: 5, kind: input, shape index: {}]   ;;  %s4321_s6 = inlined_call_operand.vmem [shape: f32[3,3,16,16], index: 6, kind: input, shape index: {}]   ;;  %s4322_s7 = inlined_call_operand.vmem [shape: f32[3,16,1], index: 7, kind: input, shape index: {}]   ;;  %s4323_s8 = inlined_call_operand.vmem [shape: f32[3,8,8], index: 8, kind: input, shape index: {}]   ;;  %s4324_s9 = inlined_call_operand.vmem [shape: f32[2,16,8], index: 9, kind: output, shape index: {}]  }
   0x1   :  { %15 = vsyncpa [#allocation6], 0  ;;  %s3945_s30 = smov 0  }
   0x2 LB: > { %s3951_s10 = sadd.s32 4294967295, %s3890_s30   ;;  %p3252_p0 = scmp.ge.s32.totalorder %s3890_s30, 1  ;;  %s3890_s30 = sphi %s3945_s30, %s21_s30  }
   0x3   : > { %p246_p1 = scmp.lt.s32.totalorder %s3890_s30, 3  ;;  %s259_s13 = sshll.u32 %s4315_s0, 4  ;;  %s260_s13 = int_to_ptr.vmem [resolvable:$true] %s259_s13 }
   0x4   : > { %p4325_p4 = scmp.eq.s32.totalorder %s3951_s10, 0  ;;  %s270_s17 = sshll.u32 %s4316_s1, 4  ;;  %s271_s17 = int_to_ptr.vmem [resolvable:$true] %s270_s17 }
   0x5   : > { %p3959_p3 = pnand %p3252_p0, %p246_p1  ;;  %s3846_s19 = scalar_lea.vmem %s260_s13, 16 }
   0x6   : > { %p3847_p7 = scmp.ne.s32.totalorder %s260_s13, %s3846_s19  ;;  %p3854_p11 = scmp.lt.s32.totalorder %s260_s13, %s260_s13 }
   0x7   : > { %s4327_s14 = scalar_select %p3959_p3, 1, 0 }
   0x8   : > { %p3802_p5 = pneg %p3959_p3  ;;  %p3855_p12 = scmp.lt.s32.totalorder %s3846_s19, %s3846_s19 }
   0xa   : > { %p3971_p6 = pnand %p4325_p4, %p3802_p5  ;;  %p3856_p13 = por %p3855_p12, %p3854_p11 }
   0xc   : > { %p3848_p8 = pneg %p3971_p6 }
   0xe   : > { %p3849_p9 = pnand %p3848_p8, %p3847_p7 }
  0x10   : > { %p3850_p10 = pneg %p3849_p9 }
  0x12   : > { %p3857_p0 = pnand %p3856_p13, %p3850_p10 }
  0x14   : > { %3860 = shalt.err (!%p3857_p0)
}
  0x15   : > { %s3892_s20 = smov [#allocation3]   ;;  %s3861_s21 = scalar_lea.vmem %s271_s17, 16 }
  0x16   : > { %3805 = dma.vmem_to_smem (!%p3971_p6), %s260_s13, 16, %s3892_s20, [#allocation4]  }
  0x17   : > { %p3862_p1 = scmp.ne.s32.totalorder %s271_s17, %s3861_s21  ;;  %p3869_p4 = scmp.lt.s32.totalorder %s271_s17, %s271_s17 }
  0x18   : > { %p3870_p3 = scmp.lt.s32.totalorder %s3861_s21, %s3861_s21 }
  0x19   : > { %p3864_p5 = pnand %p3862_p1, %p3848_p8 }
  0x1a   : > { %p3871_p7 = por %p3870_p3, %p3869_p4 }
  0x1b   : > { %p3865_p2 = pneg %p3864_p5 }
  0x1d   : > { %p3872_p9 = pnand %p3871_p7, %p3865_p2 }
  0x1f   : > { %3875 = shalt.err (!%p3872_p9)
}
  0x20   : > { %s3893_s22 = smov [#allocation5]   ;;  %p4329_p10 = scmp.ne.s32.totalorder %s4327_s14, 0 }
  0x21   : > { %3808 = dma.vmem_to_smem (!%p3971_p6), %s271_s17, 16, %s3893_s22, [#allocation6]  }
  0x22   : > { %309 = sbr.rel (%p4329_p10) target bundleno = 2383 (0x94f), region = 56  ;;  %p4330_p11 = scmp.eq.s32.totalorder (!%p4329_p10), %s3951_s10, 0 }
  0x29   : > { %3881 = dma.done.wait (%p4330_p11), [#allocation4], 16   ;;  %p4331_p12 = pmov %p4330_p11 }
  0x2a   : > { %p4332_p8 = pmov %p4330_p11 }
  0x2b   : > { %3883 = vsyncadd (%p4331_p12), [#allocation4], 4294967280 }
  0x2c   : > { %3885 = dma.done.wait (%p4332_p8), [#allocation6], 16   ;;  %p4333_p3 = pmov %p4332_p8 }
  0x2e   : > { %3887 = vsyncadd (%p4333_p3), [#allocation6], 4294967280 }
  0x2f   : > { %319 = sfence }
  0x30   : > { %p350_p2 = scmp.lt.s32.totalorder %s3951_s10, 1  ;;  %p4334_p4 = scmp.ne.s32.totalorder %s3951_s10, 0 }
  0x31   : > { %v364_v0 = vld [vmem:[%s4317_s2] sm:$0xff] (!%p4334_p4)  ;;  %vm366_vm0 = vcmask (!%p4334_p4), 64512   ;;  %v365_v1 = vld [vmem:[%s4317_s2 + $0x8] sm:$0xff] (!%p4334_p4) }
  0x32   : > { %s351_s23 = scalar_select %p350_p2, %s3951_s10, 1 }
  0x33   : > { %363 = sbr.rel (%p4334_p4) target bundleno = 58 (0x3a), region = 68  ;;  %367 = vst.msk [vmem:[#allocation2] sm:$0xff] (!%p4334_p4), %vm366_vm0, %v364_v0  ;;  %368 = vst.msk [vmem:[#allocation2 + $0x8] sm:$0xff] (!%p4334_p4), %vm366_vm0, %v365_v1 }
  0x34   : > { %s3366_s24 = sshll.u32 %s351_s23, 4 }
  0x35   : > { %s3996_s27 = scalar_lea.vmem %s4318_s3, %s3366_s24  ;;  %s4001_s11 = scalar_lea.vmem %s4324_s9, %s3366_s24 }
  0x3a PF: > { %v4014_v2 = vld [vmem:[%s4323_s8] sm:$0xff]  ;;  %vm380_vm1 = vcmask 64512   ;;  %v4018_v4 = vld [vmem:[#allocation2 + $0x8] sm:$0xff]  ;;  %v4032_v6 = vld [vmem:[%s4323_s8 + $0x10] sm:$0xff]  ;;  %vm462_vm2 = vcmask 130048   ;;  %v3894_v9 = vmov 0  }
  0x3b   : > { %v4016_v3 = vld [vmem:[#allocation2] sm:$0xff]  ;;  %3485 = vmatprep.subr.mxu0 %v4014_v2  ;;  %v4026_v5 = vld [vmem:[%s4323_s8 + $0x8] sm:$0xff]  ;;  %3824 = vset.pattern.permute.xlu0 %v3894_v9  ;;  %v3330_v12 = vld [vmem:[%s4322_s7 + $0x10] sm:$0xff]  ;;  %s3153_s16 = sld [smem:[#allocation3 + %s3951_s10]] }
  0x3c   : > { %3487 = vmatprep.mubr.msk.f32.mxu0 %vm380_vm1, %v4016_v3  ;;  %3486 = vmatpush3.msra.mxu0 %v4014_v2  ;;  %v371_v7 = vld [vmem:[%s4319_s4] sm:$0xff]  ;;  %v378_v10 = vld [vmem:[%s4320_s5 + $0x8] sm:$0xff]  ;;  %v373_v22 = vld [vmem:[%s4319_s4 + $0x10] sm:$0xff]  ;;  %s3154_s17 = sld [smem:[#allocation5 + %s3951_s10]] }
  0x3d   : > { %3488 = vmatmul.mubr.msk.f32.vlgmr.msra.gmra.mrb[0].mxu0 %vm380_vm1, %v4018_v4  ;;  %3497 = vmatprep.subr.mxu0 %v4026_v5  ;;  %v377_v8 = vld [vmem:[%s4320_s5] sm:$0xff]  ;;  %v372_v20 = vld [vmem:[%s4319_s4 + $0x8] sm:$0xff]  ;;  %v374_v26 = vld [vmem:[%s4319_s4 + $0x18] sm:$0xff] }
  0x3e   : > { %3498 = vmatpush3.msra.mxu0 %v4026_v5  ;;  %3499 = vmatprep.mubr.msk.f32.mxu0 %vm380_vm1, %v4016_v3  ;;  %v1886_v11 = vld [vmem:[%s4322_s7] sm:$0xff]  ;;  %v376_v28 = vld [vmem:[%s4319_s4 + $0x28] sm:$0xff]  ;;  %v3278_v37 = vld [vmem:[%s4319_s4 + $0x30] sm:$0xff] }
  0x3f   : > { %3509 = vmatprep.subr.mxu0 %v4032_v6  ;;  %3494 = vmatprep.mubr.msk.f32.mxu1 %vm462_vm2, %v371_v7  ;;  %v3350_v13 = vld [vmem:[%s4322_s7 + $0x20] sm:$0xff]  ;;  %v3284_v38 = vld [vmem:[%s4320_s5 + $0x10] sm:$0xff]  ;;  %v3285_v39 = vld [vmem:[%s4320_s5 + $0x18] sm:$0xff] }
  0x40   : > { %3825 = vset.pattern.permute.xlu1 %v3894_v9  ;;  %546 = vperm.xlu0 %3824, %v377_v8   ;;  %v3304_v14 = vld [vmem:[%s4320_s5 + $0x20] sm:$0xff]  ;;  %v1887_v40 = vld [vmem:[%s4322_s7 + $0x8] sm:$0xff]  ;;  %v3331_v41 = vld [vmem:[%s4322_s7 + $0x18] sm:$0xff] }
  0x41   : > { %3500 = vmatmul.mubr.msk.f32.vlgmr.msra.gmra.mrb[2].mxu0 %vm380_vm1, %v4018_v4  ;;  %v375_v27 = vld [vmem:[%s4319_s4 + $0x20] sm:$0xff]  ;;  %1052 = vperm.xlu1 %3825, %v3284_v38   ;;  %v3351_v42 = vld [vmem:[%s4322_s7 + $0x28] sm:$0xff]  ;;  %v3279_v49 = vld [vmem:[%s4319_s4 + $0x38] sm:$0xff] }
  0x42   : > { %3510 = vmatpush3.msra.mxu0 %v4032_v6  ;;  %3511 = vmatprep.mubr.msk.f32.mxu0 %vm380_vm1, %v4016_v3  ;;  %v3305_v43 = vld [vmem:[%s4320_s5 + $0x28] sm:$0xff]  ;;  %v3280_v51 = vld [vmem:[%s4319_s4 + $0x40] sm:$0xff]  ;;  %v3282_v56 = vld [vmem:[%s4319_s4 + $0x50] sm:$0xff] }
  0x43   : > { %3521 = vmatprep.subr.mxu0 %v4014_v2  ;;  %v3281_v55 = vld [vmem:[%s4319_s4 + $0x48] sm:$0xff]  ;;  %v3283_v57 = vld [vmem:[%s4319_s4 + $0x58] sm:$0xff]  ;;  %v1880_v7 = vld [vmem:[%s4321_s6] sm:$0xff] }
  0x44   : > { %551 = vperm.xlu0 %3824, %v378_v10   ;;  %v1881_v8 = vld [vmem:[%s4321_s6 + $0x8] sm:$0xff]  ;;  %v1882_v9 = vld [vmem:[%s4321_s6 + $0x10] sm:$0xff]  ;;  %v1883_v10 = vld [vmem:[%s4321_s6 + $0x18] sm:$0xff] }
  0x45   : > { %3512 = vmatmul.mubr.msk.f32.vlgmr.msra.gmra.mrb[4].mxu0 %vm380_vm1, %v4018_v4  ;;  %1057 = vperm.xlu1 %3825, %v3285_v39  }
  0x46   : > { %3522 = vmatpush3.msra.mxu0 %v4014_v2 }
  0x47   : > { %3533 = vmatprep.subr.mxu0 %v4026_v5 }
  0x48   : > { %1971 = vperm.xlu0 %3824, %v1886_v11   ;;  %v1884_v11 = vld [vmem:[%s4321_s6 + $0x20] sm:$0xff] }
  0x49   : > { %1976 = vperm.xlu1 %3825, %v1887_v40  }
  0x4c   : > { %2323 = vperm.xlu0 %3824, %v3330_v12   ;;  %v1885_v12 = vld [vmem:[%s4321_s6 + $0x28] sm:$0xff] }
  0x4d   : > { %2328 = vperm.xlu1 %3825, %v3331_v41  }
  0x50   : > { %2825 = vperm.xlu0 %3824, %v3350_v13   ;;  %v3298_v13 = vld [vmem:[%s4319_s4 + $0x60] sm:$0xff] }
  0x51   : > { %2830 = vperm.xlu1 %3825, %v3351_v42  }
  0x54   : > { %1554 = vperm.xlu0 %3824, %v3304_v14  }
  0x55   : > { %1559 = vperm.xlu1 %3825, %v3305_v43  }
  0xbf   : > { %v547_v29 = vpop.permute.xlu0 %546 }
  0xc0   : > { %v1053_v58 = vpop.permute.xlu1 %1052 }
  0xc3   : > { %v552_v30 = vpop.permute.xlu0 %551 }
  0xc4   : > { %v1058_v59 = vpop.permute.xlu1 %1057 }
 0x110   : > { %v3489_v15 = vpop.f32.mrb[0].mxu0 }
 0x111   : > { %v453_v16 = vpop.f32.mrb[1].mxu0 }
 0x112   : > { %v4073_v17 = vpack.c.bf16 %v3489_v15, %v453_v16 }
 0x114   : > { %3687 = vmatprep.subr.bf16.mxu1 %v4073_v17  ;;  %v3501_v18 = vpop.f32.mrb[2].mxu0 }
 0x115   : > { %3689 = vmatpush3.bf16.msra.mxu1 %v4073_v17  ;;  %v624_v19 = vpop.f32.mrb[3].mxu0 }
 0x116   : > { %v4080_v21 = vpack.c.bf16 %v3501_v18, %v624_v19  ;;  %v3299_v19 = vld [vmem:[%s4319_s4 + $0x68] sm:$0xff] }
 0x118   : > { %3495 = vmatmul.mubr.msk.f32.vlgmr.msra.gmra.mrb[0].mxu1 %vm462_vm2, %v372_v20  ;;  %3691 = vmatprep.subr.bf16.mxu1 %v4080_v21  ;;  %v3513_v23 = vpop.f32.mrb[4].mxu0 }
 0x119   : > { %3693 = vmatpush3.bf16.msra.mxu1 %v4080_v21  ;;  %v784_v24 = vpop.f32.mrb[5].mxu0  ;;  %3506 = vmatprep.mubr.msk.f32.mxu1 %vm462_vm2, %v373_v22 }
 0x11a   : > { %v4089_v25 = vpack.c.bf16 %v3513_v23, %v784_v24 }
 0x11c   : > { %3695 = vmatprep.subr.bf16.mxu1 %v4089_v25 }
 0x120   : > { %3507 = vmatmul.mubr.msk.f32.vlgmr.msra.gmra.mrb[0].mxu1 %vm462_vm2, %v374_v26  ;;  %v3302_v26 = vld [vmem:[%s4319_s4 + $0x80] sm:$0xff] }
 0x121   : > { %3697 = vmatpush3.bf16.msra.mxu1 %v4089_v25  ;;  %3518 = vmatprep.mubr.msk.f32.mxu1 %vm462_vm2, %v375_v27  ;;  %v3303_v27 = vld [vmem:[%s4319_s4 + $0x88] sm:$0xff] }
 0x128   : > { %3519 = vmatmul.mubr.msk.f32.vlgmr.msra.gmra.mrb[0].mxu1 %vm462_vm2, %v376_v28  ;;  %v1977_v28 = vpop.permute.xlu1 %1976 }
 0x129   : > { %3530 = vmatprep.mubr.msk.f32.mxu1 %vm462_vm2, %v3278_v37 }
 0x1fb   : > { %v3520_v31 = vpop.f32.mrb[0].mxu1 }
 0x1fc   : > { %v3758_v32 = vadd.f32 %v3520_v31, %v552_v30  ;;  %v865_v33 = vpop.f32.mrb[1].mxu1  ;;  %v1972_v30 = vpop.permute.xlu0 %1971 }
 0x1fd   : > { %v3759_v34 = vadd.f32 %v865_v33, %v547_v29 }
 0x1ff   : > { %3826 = vtanh.f32 %v3759_v34 }
 0x200   : > { %3828 = vtanh.f32 %v3758_v32 }
 0x209   : > { %v3827_v35 = vpop.eup %3826 }
 0x20a   : > { %v3829_v36 = vpop.eup %3828  ;;  %3523 = vmatprep.mubr.msk.f32.mxu0 %vm380_vm1, %v3827_v35 }
 0x20b   : > { %3524 = vmatmul.mubr.msk.f32.vlgmr.msra.gmra.mrb[6].mxu0 %vm380_vm1, %v3829_v36 }
 0x20c   : > { %3535 = vmatprep.mubr.msk.f32.mxu0 %vm380_vm1, %v3827_v35  ;;  %3534 = vmatpush3.msra.mxu0 %v4026_v5 }
 0x20d   : > { %3545 = vmatprep.subr.mxu0 %v4032_v6 }
 0x20f   : > { %3536 = vmatmul.mubr.msk.f32.vlgmr.msra.gmra.mrb[8].mxu0 %vm380_vm1, %v3829_v36 }
 0x210   : > { %3547 = vmatprep.mubr.msk.f32.mxu0 %vm380_vm1, %v3827_v35  ;;  %3546 = vmatpush3.msra.mxu0 %v4032_v6 }
 0x211   : > { %3557 = vmatprep.subr.mxu0 %v4014_v2 }
 0x213   : > { %3548 = vmatmul.mubr.msk.f32.vlgmr.msra.gmra.mrb[10].mxu0 %vm380_vm1, %v3829_v36  ;;  %v3324_v36 = vld [vmem:[%s4321_s6 + $0x30] sm:$0xff] }
 0x214   : > { %3558 = vmatpush3.msra.mxu0 %v4014_v2 }
 0x215   : > { %3569 = vmatprep.subr.mxu0 %v4026_v5 }
 0x2de   : > { %v3525_v44 = vpop.f32.mrb[6].mxu0 }
 0x2df   : > { %v960_v45 = vpop.f32.mrb[7].mxu0 }
 0x2e0   : > { %v3698_v46 = vpack.c.bf16 %v3525_v44, %v960_v45  ;;  %v3326_v45 = vld [vmem:[%s4321_s6 + $0x40] sm:$0xff] }
 0x2e2   : > { %3699 = vmatprep.subr.bf16.mxu1 %v3698_v46  ;;  %v3537_v47 = vpop.f32.mrb[8].mxu0 }
 0x2e3   : > { %3701 = vmatpush3.bf16.msra.mxu1 %v3698_v46  ;;  %v1128_v48 = vpop.f32.mrb[9].mxu0 }
 0x2e4   : > { %v3702_v50 = vpack.c.bf16 %v3537_v47, %v1128_v48 }
 0x2e6   : > { %3531 = vmatmul.mubr.msk.f32.vlgmr.msra.gmra.mrb[2].mxu1 %vm462_vm2, %v3279_v49  ;;  %3703 = vmatprep.subr.bf16.mxu1 %v3702_v50  ;;  %v3549_v52 = vpop.f32.mrb[10].mxu0  ;;  %v3327_v49 = vld [vmem:[%s4321_s6 + $0x48] sm:$0xff] }
 0x2e7   : > { %3705 = vmatpush3.bf16.msra.mxu1 %v3702_v50  ;;  %v1286_v53 = vpop.f32.mrb[11].mxu0  ;;  %3542 = vmatprep.mubr.msk.f32.mxu1 %vm462_vm2, %v3280_v51  ;;  %v3328_v50 = vld [vmem:[%s4321_s6 + $0x50] sm:$0xff]  ;;  %v3329_v51 = vld [vmem:[%s4321_s6 + $0x58] sm:$0xff] }
 0x2e8   : > { %v3706_v54 = vpack.c.bf16 %v3549_v52, %v1286_v53  ;;  %v2329_v52 = vpop.permute.xlu1 %2328 }
 0x2ea   : > { %3707 = vmatprep.subr.bf16.mxu1 %v3706_v54 }
 0x2ee   : > { %3543 = vmatmul.mubr.msk.f32.vlgmr.msra.gmra.mrb[2].mxu1 %vm462_vm2, %v3281_v55 }
 0x2ef   : > { %3709 = vmatpush3.bf16.msra.mxu1 %v3706_v54  ;;  %3554 = vmatprep.mubr.msk.f32.mxu1 %vm462_vm2, %v3282_v56  ;;  %v2324_v54 = vpop.permute.xlu0 %2323 }
 0x2f6   : > { %3555 = vmatmul.mubr.msk.f32.vlgmr.msra.gmra.mrb[2].mxu1 %vm462_vm2, %v3283_v57 }
 0x2f7   : > { %3566 = vmatprep.mubr.msk.f32.mxu1 %vm462_vm2, %v3298_v13  ;;  %v3349_v13 = vld [vmem:[%s4321_s6 + $0x88] sm:$0xff] }
 0x3c9   : > { %v3556_v60 = vpop.f32.mrb[2].mxu1 }
 0x3ca   : > { %v3760_v61 = vadd.f32 %v3556_v60, %v1058_v59  ;;  %v1367_v62 = vpop.f32.mrb[3].mxu1 }
 0x3cb   : > { %v3761_v63 = vadd.f32 %v1367_v62, %v1053_v58 }
 0x3cd   : > { %3830 = vtanh.f32 %v3761_v63 }
 0x3ce   : > { %3832 = vtanh.f32 %v3760_v61 }
 0x3d7   : > { %v3831_v0 = vpop.eup %3830 }
 0x3d8   : > { %v3833_v1 = vpop.eup %3832  ;;  %3559 = vmatprep.mubr.msk.f32.mxu0 %vm380_vm1, %v3831_v0 }
 0x3d9   : > { %3560 = vmatmul.mubr.msk.f32.vlgmr.msra.gmra.mrb[12].mxu0 %vm380_vm1, %v3833_v1 }
 0x3da   : > { %3570 = vmatpush3.msra.mxu0 %v4026_v5  ;;  %3571 = vmatprep.mubr.msk.f32.mxu0 %vm380_vm1, %v3831_v0 }
 0x3db   : > { %3581 = vmatprep.subr.mxu0 %v4032_v6 }
 0x3dd   : > { %3572 = vmatmul.mubr.msk.f32.vlgmr.msra.gmra.mrb[14].mxu0 %vm380_vm1, %v3833_v1 }
 0x3de   : > { %3582 = vmatpush3.msra.mxu0 %v4032_v6  ;;  %3583 = vmatprep.mubr.msk.f32.mxu0 %vm380_vm1, %v3831_v0 }
 0x3df   : > { %3723 = vmatprep.subr.bf16.mxu0 %v4073_v17 }
 0x3e1   : > { %3584 = vmatmul.mubr.msk.f32.vlgmr.msra.gmra.mrb[16].mxu0 %vm380_vm1, %v3833_v1 }
 0x3e2   : > { %3725 = vmatpush3.bf16.msra.mxu0 %v4073_v17  ;;  %3597 = vmatprep.mubr.msk.f32.mxu0 %vm462_vm2, %v1880_v7 }
 0x3e3   : > { %3727 = vmatprep.subr.bf16.mxu0 %v4080_v21 }
 0x3e5   : > { %3598 = vmatmul.mubr.msk.f32.vlgmr.msra.gmra.mrb[18].mxu0 %vm462_vm2, %v1881_v8 }
 0x3e6   : > { %3729 = vmatpush3.bf16.msra.mxu0 %v4080_v21  ;;  %3604 = vmatprep.mubr.msk.f32.mxu0 %vm462_vm2, %v1882_v9  ;;  %v3300_v21 = vld [vmem:[%s4319_s4 + $0x70] sm:$0xff] }
 0x3e7   : > { %3731 = vmatprep.subr.bf16.mxu0 %v4089_v25 }
 0x3ed   : > { %3605 = vmatmul.mubr.msk.f32.vlgmr.msra.gmra.mrb[18].mxu0 %vm462_vm2, %v1883_v10  ;;  %v3346_v10 = vld [vmem:[%s4321_s6 + $0x70] sm:$0xff] }
 0x3ee   : > { %3733 = vmatpush3.bf16.msra.mxu0 %v4089_v25  ;;  %3611 = vmatprep.mubr.msk.f32.mxu0 %vm462_vm2, %v1884_v11  ;;  %v3301_v25 = vld [vmem:[%s4319_s4 + $0x78] sm:$0xff] }
 0x3ef   : > { %3638 = vmatprep.subr.mxu0 %v4032_v6  ;;  %v3347_v11 = vld [vmem:[%s4321_s6 + $0x78] sm:$0xff] }
 0x3f5   : > { %3612 = vmatmul.mubr.msk.f32.vlgmr.msra.gmra.mrb[18].mxu0 %vm462_vm2, %v1885_v12  ;;  %v3348_v12 = vld [vmem:[%s4321_s6 + $0x80] sm:$0xff] }
 0x3f6   : > { %3639 = vmatpush3.msra.mxu0 %v4032_v6 }
 0x3f7   : > { %3650 = vmatprep.subr.mxu0 %v4014_v2 }
 0x4ac   : > { %v3561_v14 = vpop.f32.mrb[12].mxu0 }
 0x4ad   : > { %v1462_v15 = vpop.f32.mrb[13].mxu0 }
 0x4ae   : > { %v3710_v16 = vpack.c.bf16 %v3561_v14, %v1462_v15  ;;  %v2831_v14 = vpop.permute.xlu1 %2830  ;;  %v2826_v15 = vpop.permute.xlu0 %2825 }
 0x4b0   : > { %3711 = vmatprep.subr.bf16.mxu1 %v3710_v16  ;;  %v3573_v17 = vpop.f32.mrb[14].mxu0 }
 0x4b1   : > { %3713 = vmatpush3.bf16.msra.mxu1 %v3710_v16  ;;  %v1630_v18 = vpop.f32.mrb[15].mxu0 }
 0x4b2   : > { %v3714_v20 = vpack.c.bf16 %v3573_v17, %v1630_v18 }
 0x4b4   : > { %3567 = vmatmul.mubr.msk.f32.vlgmr.msra.gmra.mrb[4].mxu1 %vm462_vm2, %v3299_v19  ;;  %3715 = vmatprep.subr.bf16.mxu1 %v3714_v20  ;;  %v3585_v22 = vpop.f32.mrb[16].mxu0 }
 0x4b5   : > { %3717 = vmatpush3.bf16.msra.mxu1 %v3714_v20  ;;  %v1788_v23 = vpop.f32.mrb[17].mxu0  ;;  %3578 = vmatprep.mubr.msk.f32.mxu1 %vm462_vm2, %v3300_v21  ;;  %v1560_v20 = vpop.permute.xlu1 %1559 }
 0x4b6   : > { %v3718_v24 = vpack.c.bf16 %v3585_v22, %v1788_v23  ;;  %v1555_v21 = vpop.permute.xlu0 %1554  ;;  %v3155_v23 = vstv %s3153_s16 }
 0x4b8   : > { %3719 = vmatprep.subr.bf16.mxu1 %v3718_v24 }
 0x4bc   : > { %3579 = vmatmul.mubr.msk.f32.vlgmr.msra.gmra.mrb[4].mxu1 %vm462_vm2, %v3301_v25  ;;  %v3161_v25 = vld [vmem:[%s3996_s27 + $0x8] sm:$0xff] }
 0x4bd   : > { %3721 = vmatpush3.bf16.msra.mxu1 %v3718_v24  ;;  %3590 = vmatprep.mubr.msk.f32.mxu1 %vm462_vm2, %v3302_v26  ;;  %v3162_v26 = vstv %s3154_s17 }
 0x4be   : > { %3614 = vmatprep.subr.mxu1 %v4014_v2 }
 0x4c4   : > { %3591 = vmatmul.mubr.msk.f32.vlgmr.msra.gmra.mrb[4].mxu1 %vm462_vm2, %v3303_v27  ;;  %v3160_v27 = vld [vmem:[%s3996_s27] sm:$0xff] }
 0x4c5   : > { %3615 = vmatpush3.msra.mxu1 %v4014_v2 }
 0x4c8   : > { %v3613_v29 = vpop.f32.mrb[18].mxu0 }
 0x4c9   : > { %v3764_v31 = vadd.f32 %v3613_v29, %v1977_v28  ;;  %v2136_v32 = vpop.f32.mrb[19].mxu0  ;;  %v3164_v29 = vmul.f32 %v3162_v26, %v3161_v25 }
 0x4ca   : > { %v3765_v33 = vadd.f32 %v2136_v32, %v1972_v30 }
 0x4cc   : > { %3834 = vtanh.f32 %v3765_v33 }
 0x4cd   : > { %3836 = vtanh.f32 %v3764_v31  ;;  %v3163_v31 = vmul.f32 %v3162_v26, %v3160_v27 }
 0x4d6   : > { %v3835_v34 = vpop.eup %3834 }
 0x4d7   : > { %v3837_v35 = vpop.eup %3836  ;;  %3616 = vmatprep.mubr.msk.f32.mxu1 %vm380_vm1, %v3835_v34  ;;  %3640 = vmatprep.mubr.msk.f32.mxu0 %vm380_vm1, %v3835_v34 }
 0x4d8   : > { %3617 = vmatmul.mubr.msk.f32.vlgmr.msra.gmra.mrb[6].mxu1 %vm380_vm1, %v3837_v35  ;;  %3641 = vmatmul.mubr.msk.f32.vlgmr.msra.gmra.mrb[20].mxu0 %vm380_vm1, %v3837_v35 }
 0x4d9   : > { %3651 = vmatpush3.msra.mxu0 %v4014_v2  ;;  %3623 = vmatprep.mubr.msk.f32.mxu1 %vm462_vm2, %v3324_v36  ;;  %v3325_v2 = vld [vmem:[%s4321_s6 + $0x38] sm:$0xff] }
 0x597   : > { %v4236_v37 = vpop.f32.mrb[4].mxu1 }
 0x598   : > { %v4238_v38 = vpop.f32.mrb[5].mxu1  ;;  %v3762_v22 = vadd.f32 %v4236_v37, %v1560_v20 }
 0x599   : > { %v3763_v24 = vadd.f32 %v4238_v38, %v1555_v21 }
 0x59a   : > { %v3157_v28 = vmul.f32 %v3762_v22, %v3155_v23 }
 0x59b   : > { %v3156_v30 = vmul.f32 %v3763_v24, %v3155_v23 }
 0x59d   : > { %v3158_v36 = vadd.f32 %v3156_v30, %v4016_v3 }
 0x5ab   : > { %v3618_v39 = vpop.f32.mrb[6].mxu1  ;;  %v3642_v40 = vpop.f32.mrb[20].mxu0 }
 0x5ac   : > { %v2231_v41 = vpop.f32.mrb[7].mxu1  ;;  %v2557_v42 = vpop.f32.mrb[21].mxu0 }
 0x5ad   : > { %v3734_v43 = vpack.c.bf16 %v3618_v39, %v2231_v41  ;;  %v3742_v44 = vpack.c.bf16 %v3642_v40, %v2557_v42 }
 0x5af   : > { %3735 = vmatprep.subr.bf16.mxu1 %v3734_v43 }
 0x5b0   : > { %3737 = vmatpush3.bf16.msra.mxu1 %v3734_v43 }
 0x5b1   : > { %3626 = vmatprep.subr.mxu1 %v4026_v5 }
 0x5b3   : > { %3624 = vmatmul.mubr.msk.f32.vlgmr.msra.gmra.mrb[8].mxu1 %vm462_vm2, %v3325_v2 }
 0x5b4   : > { %3627 = vmatpush3.msra.mxu1 %v4026_v5  ;;  %3628 = vmatprep.mubr.msk.f32.mxu1 %vm380_vm1, %v3835_v34  ;;  %v3159_v34 = vadd.f32 %v3157_v28, %v4018_v4 }
 0x5b7   : > { %3629 = vmatmul.mubr.msk.f32.vlgmr.msra.gmra.mrb[10].mxu1 %vm380_vm1, %v3837_v35 }
 0x5b8   : > { %3635 = vmatprep.mubr.msk.f32.mxu1 %vm462_vm2, %v3326_v45 }
 0x68a   : > { %v3630_v46 = vpop.f32.mrb[10].mxu1 }
 0x68b   : > { %v2399_v47 = vpop.f32.mrb[11].mxu1 }
 0x68c   : > { %v3738_v48 = vpack.c.bf16 %v3630_v46, %v2399_v47 }
 0x68e   : > { %3739 = vmatprep.subr.bf16.mxu1 %v3738_v48 }
 0x68f   : > { %3741 = vmatpush3.bf16.msra.mxu1 %v3738_v48 }
 0x690   : > { %3743 = vmatprep.subr.bf16.mxu1 %v3742_v44 }
 0x692   : > { %3636 = vmatmul.mubr.msk.f32.vlgmr.msra.gmra.mrb[8].mxu1 %vm462_vm2, %v3327_v49 }
 0x693   : > { %3745 = vmatpush3.bf16.msra.mxu1 %v3742_v44  ;;  %3647 = vmatprep.mubr.msk.f32.mxu1 %vm462_vm2, %v3328_v50 }
 0x694   : > { %3662 = vmatprep.subr.mxu1 %v4026_v5 }
 0x69a   : > { %3648 = vmatmul.mubr.msk.f32.vlgmr.msra.gmra.mrb[8].mxu1 %vm462_vm2, %v3329_v51 }
 0x69b   : > { %3663 = vmatpush3.msra.mxu1 %v4026_v5  ;;  %v3344_v5 = vld [vmem:[%s4321_s6 + $0x60] sm:$0xff] }
 0x69c   : > { %3674 = vmatprep.subr.mxu1 %v4032_v6 }
 0x76d   : > { %v3649_v53 = vpop.f32.mrb[8].mxu1 }
 0x76e   : > { %v3766_v55 = vadd.f32 %v3649_v53, %v2329_v52  ;;  %v2638_v56 = vpop.f32.mrb[9].mxu1 }
 0x76f   : > { %v3767_v57 = vadd.f32 %v2638_v56, %v2324_v54 }
 0x771   : > { %3838 = vtanh.f32 %v3767_v57 }
 0x772   : > { %3840 = vtanh.f32 %v3766_v55 }
 0x77b   : > { %v3839_v58 = vpop.eup %3838 }
 0x77c   : > { %v3841_v59 = vpop.eup %3840  ;;  %3652 = vmatprep.mubr.msk.f32.mxu0 %vm380_vm1, %v3839_v58  ;;  %3664 = vmatprep.mubr.msk.f32.mxu1 %vm380_vm1, %v3839_v58 }
 0x77d   : > { %3653 = vmatmul.mubr.msk.f32.vlgmr.msra.gmra.mrb[22].mxu0 %vm380_vm1, %v3841_v59  ;;  %3665 = vmatmul.mubr.msk.f32.vlgmr.msra.gmra.mrb[12].mxu1 %vm380_vm1, %v3841_v59 }
 0x77e   : > { %3676 = vmatprep.mubr.msk.f32.mxu1 %vm380_vm1, %v3839_v58  ;;  %3675 = vmatpush3.msra.mxu1 %v4032_v6  ;;  %v3345_v6 = vld [vmem:[%s4321_s6 + $0x68] sm:$0xff] }
 0x77f   : > { %3659 = vmatprep.mubr.msk.f32.mxu0 %vm462_vm2, %v3344_v5 }
 0x781   : > { %3677 = vmatmul.mubr.msk.f32.vlgmr.msra.gmra.mrb[14].mxu1 %vm380_vm1, %v3841_v59 }
 0x850   : > { %v3654_v60 = vpop.f32.mrb[22].mxu0  ;;  %v3666_v61 = vpop.f32.mrb[12].mxu1 }
 0x851   : > { %v2733_v62 = vpop.f32.mrb[23].mxu0  ;;  %v2901_v63 = vpop.f32.mrb[13].mxu1 }
 0x852   : > { %v3746_v0 = vpack.c.bf16 %v3654_v60, %v2733_v62  ;;  %v3750_v1 = vpack.c.bf16 %v3666_v61, %v2901_v63 }
 0x854   : > { %3747 = vmatprep.subr.bf16.mxu0 %v3746_v0  ;;  %v3678_v7 = vpop.f32.mrb[14].mxu1 }
 0x855   : > { %3749 = vmatpush3.bf16.msra.mxu0 %v3746_v0  ;;  %v3059_v8 = vpop.f32.mrb[15].mxu1 }
 0x856   : > { %v3754_v9 = vpack.c.bf16 %v3678_v7, %v3059_v8  ;;  %3751 = vmatprep.subr.bf16.mxu0 %v3750_v1 }
 0x858   : > { %3660 = vmatmul.mubr.msk.f32.vlgmr.msra.gmra.mrb[24].mxu0 %vm462_vm2, %v3345_v6 }
 0x859   : > { %3753 = vmatpush3.bf16.msra.mxu0 %v3750_v1  ;;  %3671 = vmatprep.mubr.msk.f32.mxu0 %vm462_vm2, %v3346_v10 }
 0x85a   : > { %3755 = vmatprep.subr.bf16.mxu0 %v3754_v9 }
 0x860   : > { %3672 = vmatmul.mubr.msk.f32.vlgmr.msra.gmra.mrb[24].mxu0 %vm462_vm2, %v3347_v11 }
 0x861   : > { %3757 = vmatpush3.bf16.msra.mxu0 %v3754_v9  ;;  %3683 = vmatprep.mubr.msk.f32.mxu0 %vm462_vm2, %v3348_v12 }
 0x868   : > { %3684 = vmatmul.mubr.msk.f32.vlgmr.msra.gmra.mrb[24].mxu0 %vm462_vm2, %v3349_v13 }
 0x93b   : > { %v3685_v16 = vpop.f32.mrb[24].mxu0 }
 0x93c   : > { %v3768_v17 = vadd.f32 %v3685_v16, %v2831_v14  ;;  %v3140_v18 = vpop.f32.mrb[25].mxu0 }
 0x93d   : > { %v3769_v19 = vadd.f32 %v3140_v18, %v2826_v15 }
 0x93e   : > { %3842 = vtanh.f32 %v3768_v17 }
 0x93f   : > { %3844 = vtanh.f32 %v3769_v19 }
 0x948   : > { %v3843_v32 = vpop.eup %3842 }
 0x949   : > { %v3845_v33 = vpop.eup %3844  ;;  %v3166_v35 = vmul.f32 %v3843_v32, %v3164_v29 }
 0x94a   : > { %v3165_v37 = vmul.f32 %v3845_v33, %v3163_v31 }
 0x94b   : > { %v3168_v39 = vadd.f32 %v3166_v35, %v3159_v34 }
 0x94c   : > { %v3167_v40 = vadd.f32 %v3165_v37, %v3158_v36 }
 0x94d   : > { %3170 = vst.msk [vmem:[#allocation2 + $0x8] sm:$0xff] %vm380_vm1, %v3168_v39  ;;  %3172 = vst.msk [vmem:[%s4001_s11 + $0x8] sm:$0xff] %vm380_vm1, %v3168_v39 }
 0x94e   : > { %3169 = vst.msk [vmem:[#allocation2] sm:$0xff] %vm380_vm1, %v3167_v40  ;;  %3171 = vst.msk [vmem:[%s4001_s11] sm:$0xff] %vm380_vm1, %v3167_v40 }
 0x94f PF: > { %s21_s30 = sadd.s32 1, %s3890_s30  }
 0x950   : > { %p18_p6 = scmp.ge.s32.totalorder %s21_s30, 4  }
 0x952   :  { %20 = sbr.rel (!%p18_p6) target bundleno = 2 (0x2), region = 109 }
 0x959   :  { %3194 = vsyncpa [#allocation4], 1 }
 0x95a   :  { %3196 = vsyncpa [#allocation4 + $0x1], 1 }
 0x95b   :  { %3197 = vsyncpa [#allocation6], 1 }

</bundles_post_ra>
